<compile_context>
chip_gen: v6e
topology: v6e:2x2x1
jax: 0.10.0
libtpu: 0.0.40
codegen_flags: <defaults>
</compile_context>

<pallas_src>
import math
from functools import partial

import jax
import jax.numpy as jnp
from jax.experimental import pallas as pl
from jax.experimental.pallas import tpu as pltpu


# ------------------------------ kernel ---------------------------------------

def _layer_norm(x, w, b, eps=1e-5):
    mu = jnp.mean(x, axis=-1, keepdims=True)
    xc = x - mu
    var = jnp.mean(xc * xc, axis=-1, keepdims=True)
    return xc * jax.lax.rsqrt(var + eps) * w + b


def _encoder_layer_kernel(batch, seq, n_heads,
                          x_ref, wqkv_ref, bqkv_ref, wout_ref, bout_ref,
                          ln1w_ref, ln1b_ref, wff1_ref, bff1_ref,
                          wff2_ref, bff2_ref, ln2w_ref, ln2b_ref,
                          o_ref):
    """One encoder layer per grid step; o_ref is the VMEM-resident activation."""
    layer = pl.program_id(0)

    @pl.when(layer == 0)
    def _():
        o_ref[...] = x_ref[...]

    BT, D = o_ref.shape
    B, T, nh = batch, seq, n_heads
    hd = D // nh
    scale = 1.0 / math.sqrt(hd)

    h = o_ref[...]                                     # (BT, D) f32
    h_b = h.astype(jnp.bfloat16)

    # -------------------- multi-head self-attention --------------------------
    # TODO(synk): attn mask / key_padding_mask not implemented (module is
    # exercised with None); dropout is identity (eval-mode forward).
    q = (jnp.dot(h_b, wqkv_ref[0, 0], preferred_element_type=jnp.float32)
         + bqkv_ref[0, 0])                             # (BT, D) f32
    k = (jnp.dot(h_b, wqkv_ref[0, 1], preferred_element_type=jnp.float32)
         + bqkv_ref[0, 1])
    v = (jnp.dot(h_b, wqkv_ref[0, 2], preferred_element_type=jnp.float32)
         + bqkv_ref[0, 2])

    # leading-dim split (B, T, D): layout-trivial reshape, keeps lanes intact
    q3 = (q * scale).astype(jnp.bfloat16).reshape(B, T, D)
    k3 = k.astype(jnp.bfloat16).reshape(B, T, D)
    v3 = v.astype(jnp.bfloat16).reshape(B, T, D)

    ctx_heads = []
    for hh in range(nh):                               # static unroll, nh tiny
        cols = slice(hh * hd, (hh + 1) * hd)
        qh = q3[:, :, cols]                            # (B, T, hd) bf16
        kh = k3[:, :, cols]
        vh = v3[:, :, cols]
        s = jnp.einsum("bqd,bkd->bqk", qh, kh,
                       preferred_element_type=jnp.float32)      # (B, T, T)
        s = s - jnp.max(s, axis=-1, keepdims=True)
        e = jnp.exp(s)                                           # f32 (EUP)
        p = e * pl.reciprocal(jnp.sum(e, axis=-1, keepdims=True), approx=True)
        ctx_heads.append(
            jnp.einsum("bqk,bkd->bqd", p.astype(jnp.bfloat16), vh,
                       preferred_element_type=jnp.float32))      # (B, T, hd)

    # lane-dense context assembled in registers -> straight into out-proj
    ctx = jnp.concatenate(ctx_heads, axis=-1).reshape(BT, D).astype(jnp.bfloat16)

    attn = (jnp.dot(ctx, wout_ref[0], preferred_element_type=jnp.float32)
            + bout_ref[0])

    h1 = _layer_norm(h + attn, ln1w_ref[0], ln1b_ref[0])

    # ------------------------- feed-forward ----------------------------------
    f = (jnp.dot(h1.astype(jnp.bfloat16), wff1_ref[0],
                 preferred_element_type=jnp.float32) + bff1_ref[0])
    f = jnp.maximum(f, 0.0)                                      # ReLU
    f = (jnp.dot(f.astype(jnp.bfloat16), wff2_ref[0],
                 preferred_element_type=jnp.float32) + bff2_ref[0])

    o_ref[...] = _layer_norm(h1 + f, ln2w_ref[0], ln2b_ref[0])


# ------------------------------ wrapper ---------------------------------------

def tf_encoder_forward(x, params, n_heads):
    """x: (B, T, D) float32 (batch_first). Returns (B, T, D) float32."""
    (wqkv, bqkv, wout, bout, ln1w, ln1b,
     wff1, bff1, wff2, bff2, ln2w, ln2b) = params
    B, T, D = x.shape
    L = wqkv.shape[0]
    F = wff1.shape[-1]
    BT = B * T

    kernel = partial(_encoder_layer_kernel, B, T, n_heads)

    y2d = pl.pallas_call(
        kernel,
        out_shape=jax.ShapeDtypeStruct((BT, D), jnp.float32),
        grid_spec=pltpu.PrefetchScalarGridSpec(
            num_scalar_prefetch=0,
            grid=(L,),
            in_specs=[
                pl.BlockSpec((BT, D), lambda l: (0, 0)),             # x (flat)
                pl.BlockSpec((1, 3, D, D), lambda l: (l, 0, 0, 0)),  # wqkv bf16
                pl.BlockSpec((1, 3, 1, D), lambda l: (l, 0, 0, 0)),  # bqkv
                pl.BlockSpec((1, D, D), lambda l: (l, 0, 0)),        # wout bf16
                pl.BlockSpec((1, 1, D), lambda l: (l, 0, 0)),        # bout
                pl.BlockSpec((1, 1, D), lambda l: (l, 0, 0)),        # ln1w
                pl.BlockSpec((1, 1, D), lambda l: (l, 0, 0)),        # ln1b
                pl.BlockSpec((1, D, F), lambda l: (l, 0, 0)),        # wff1 bf16
                pl.BlockSpec((1, 1, F), lambda l: (l, 0, 0)),        # bff1
                pl.BlockSpec((1, F, D), lambda l: (l, 0, 0)),        # wff2 bf16
                pl.BlockSpec((1, 1, D), lambda l: (l, 0, 0)),        # bff2
                pl.BlockSpec((1, 1, D), lambda l: (l, 0, 0)),        # ln2w
                pl.BlockSpec((1, 1, D), lambda l: (l, 0, 0)),        # ln2b
            ],
            out_specs=pl.BlockSpec((BT, D), lambda l: (0, 0)),       # resident
        ),
        compiler_params=pltpu.CompilerParams(
            dimension_semantics=("arbitrary",)),
    )(x.reshape(BT, D), wqkv, bqkv, wout, bout, ln1w, ln1b,
      wff1, bff1, wff2, bff2, ln2w, ln2b)
    return y2d.reshape(B, T, D)


# --------------------------- parameter init -----------------------------------

def init_params(key, dim, n_layers=5, dim_ff=2048):
    """Weights stored transposed (in_dim, out_dim) so kernels compute x @ W.
    Big matmul weights are stored in bfloat16 (streamed as-is by the kernel);
    biases and LayerNorm params stay float32."""
    D, F = dim, dim_ff

    def uniform(k, shape, bound, dtype=jnp.float32):
        return jax.random.uniform(k, shape, jnp.float32, -bound, bound).astype(dtype)

    names = ["wqkv", "bqkv", "wout", "bout", "ln1w", "ln1b",
             "wff1", "bff1", "wff2", "bff2", "ln2w", "ln2b"]
    per = {n: [] for n in names}
    for _ in range(n_layers):
        key, k1, k2, k3, k4, k5, k6 = jax.random.split(key, 7)
        xb = math.sqrt(6.0 / (D + 3 * D))             # xavier_uniform (in_proj)
        per["wqkv"].append(uniform(k1, (3, D, D), xb, jnp.bfloat16))
        per["bqkv"].append(jnp.zeros((3, 1, D), jnp.float32))
        per["wout"].append(uniform(k2, (D, D), 1.0 / math.sqrt(D), jnp.bfloat16))
        per["bout"].append(jnp.zeros((1, D), jnp.float32))
        per["wff1"].append(uniform(k3, (D, F), 1.0 / math.sqrt(D), jnp.bfloat16))
        per["bff1"].append(uniform(k4, (1, F), 1.0 / math.sqrt(D)))
        per["wff2"].append(uniform(k5, (F, D), 1.0 / math.sqrt(F), jnp.bfloat16))
        per["bff2"].append(uniform(k6, (1, D), 1.0 / math.sqrt(F)))
        per["ln1w"].append(jnp.ones((1, D), jnp.float32))
        per["ln1b"].append(jnp.zeros((1, D), jnp.float32))
        per["ln2w"].append(jnp.ones((1, D), jnp.float32))
        per["ln2b"].append(jnp.zeros((1, D), jnp.float32))
    return tuple(jnp.stack(per[n], axis=0) for n in names)


# ------------------------- pure-JAX reference ----------------------------------

def _layer_norm_ref(x, w, b, eps=1e-5):
    mu = jnp.mean(x, axis=-1, keepdims=True)
    xc = x - mu
    var = jnp.mean(xc * xc, axis=-1, keepdims=True)
    return xc * jax.lax.rsqrt(var + eps) * w + b


def tf_encoder_ref(x, params, n_heads):
    (wqkv, bqkv, wout, bout, ln1w, ln1b,
     wff1, bff1, wff2, bff2, ln2w, ln2b) = params
    B, T, D = x.shape
    L = wqkv.shape[0]
    nh, hd = n_heads, D // n_heads
    h = x
    for l in range(L):
        wq, wk, wv = (wqkv[l, j].astype(jnp.float32) for j in range(3))
        bq, bk, bv = (bqkv[l, j] for j in range(3))
        q = h @ wq + bq
        k = h @ wk + bk
        v = h @ wv + bv
        q = q.reshape(B, T, nh, hd).transpose(0, 2, 1, 3)
        k = k.reshape(B, T, nh, hd).transpose(0, 2, 1, 3)
        v = v.reshape(B, T, nh, hd).transpose(0, 2, 1, 3)
        s = jnp.einsum("bhqd,bhkd->bhqk", q, k) / math.sqrt(hd)
        p = jax.nn.softmax(s, axis=-1)
        ctx = jnp.einsum("bhqk,bhkd->bhqd", p, v)
        ctx = ctx.transpose(0, 2, 1, 3).reshape(B, T, D)
        attn = ctx @ wout[l].astype(jnp.float32) + bout[l]
        h = _layer_norm_ref(h + attn, ln1w[l], ln1b[l])
        f = (jax.nn.relu(h @ wff1[l].astype(jnp.float32) + bff1[l])
             @ wff2[l].astype(jnp.float32) + bff2[l])
        h = _layer_norm_ref(h + f, ln2w[l], ln2b[l])
    return h


# --------------------------------- main ----------------------------------------

if __name__ == "__main__":
    dim, n_layers, n_heads = 64, 5, 8       # module defaults: 5 layers, 8 heads
    B, T = 2, 8                             # small batch / sequence

    key = jax.random.PRNGKey(0)
    key, xk = jax.random.split(key)
    x = jax.random.normal(xk, (B, T, dim), jnp.float32)
    params = init_params(key, dim, n_layers=n_layers)

    y = tf_encoder_forward(x, params, n_heads)
    jax.block_until_ready(y)

    y_ref = tf_encoder_ref(x, params, n_heads)
    assert y.shape == (B, T, dim)
    err = float(jnp.max(jnp.abs(y - y_ref)))
    # bf16 MXU operands vs f32 reference -> loose but meaningful tolerance
    assert jnp.allclose(y, y_ref, atol=5e-2, rtol=5e-2), f"max err {err}"
    print("KERNEL_OK")
</pallas_src>

<mosaic_0001>
module attributes {stable_mosaic.version = 11 : i64} {
  func.func @_encoder_layer_kernel(%arg0: i32, %arg1: memref<16x64xf32, #tpu.memory_space<vmem>>, %arg2: memref<1x3x64x64xbf16, #tpu.memory_space<vmem>>, %arg3: memref<1x3x1x64xf32, #tpu.memory_space<vmem>>, %arg4: memref<1x64x64xbf16, #tpu.memory_space<vmem>>, %arg5: memref<1x1x64xf32, #tpu.memory_space<vmem>>, %arg6: memref<1x1x64xf32, #tpu.memory_space<vmem>>, %arg7: memref<1x1x64xf32, #tpu.memory_space<vmem>>, %arg8: memref<1x64x2048xbf16, #tpu.memory_space<vmem>>, %arg9: memref<1x1x2048xf32, #tpu.memory_space<vmem>>, %arg10: memref<1x2048x64xbf16, #tpu.memory_space<vmem>>, %arg11: memref<1x1x64xf32, #tpu.memory_space<vmem>>, %arg12: memref<1x1x64xf32, #tpu.memory_space<vmem>>, %arg13: memref<1x1x64xf32, #tpu.memory_space<vmem>>, %arg14: memref<16x64xf32, #tpu.memory_space<vmem>>) attributes {dimension_semantics = [#tpu.dimension_semantics<arbitrary>], iteration_bounds = array<i64: 5>, scalar_prefetch = 0 : i64, scratch_operands = 0 : i64, tpu.core_type = #tpu.core_type<tc>, window_params = [{pipeline_mode = #tpu.pipeline_mode<synchronous>, transform_indices = @transform_0, window_bounds = array<i64: 16, 64>}, {transform_indices = @transform_1, window_bounds = array<i64: 1, 3, 64, 64>}, {transform_indices = @transform_2, window_bounds = array<i64: 1, 3, 1, 64>}, {transform_indices = @transform_3, window_bounds = array<i64: 1, 64, 64>}, {transform_indices = @transform_4, window_bounds = array<i64: 1, 1, 64>}, {transform_indices = @transform_5, window_bounds = array<i64: 1, 1, 64>}, {transform_indices = @transform_6, window_bounds = array<i64: 1, 1, 64>}, {transform_indices = @transform_7, window_bounds = array<i64: 1, 64, 2048>}, {transform_indices = @transform_8, window_bounds = array<i64: 1, 1, 2048>}, {transform_indices = @transform_9, window_bounds = array<i64: 1, 2048, 64>}, {transform_indices = @transform_10, window_bounds = array<i64: 1, 1, 64>}, {transform_indices = @transform_11, window_bounds = array<i64: 1, 1, 64>}, {transform_indices = @transform_12, window_bounds = array<i64: 1, 1, 64>}, {pipeline_mode = #tpu.pipeline_mode<synchronous>, transform_indices = @transform_13, window_bounds = array<i64: 16, 64>}]} {
    %c0_i32 = arith.constant 0 : i32
    %0 = arith.cmpi eq, %arg0, %c0_i32 : i32
    %1 = arith.extui %0 : i1 to i32
    %c0_i32_0 = arith.constant 0 : i32
    %2 = arith.cmpi ne, %1, %c0_i32_0 : i32
    scf.if %2 {
      %c0_105 = arith.constant 0 : index
      %c0_106 = arith.constant 0 : index
      %241 = vector.load %arg1[%c0_105, %c0_106] : memref<16x64xf32, #tpu.memory_space<vmem>>, vector<16x64xf32>
      %c0_107 = arith.constant 0 : index
      %c0_108 = arith.constant 0 : index
      %242 = vector.load %arg14[%c0_107, %c0_108] : memref<16x64xf32, #tpu.memory_space<vmem>>, vector<16x64xf32>
      tpu.vector_store %arg14[%c0_107, %c0_108], %241 {strides = array<i32>} : memref<16x64xf32, #tpu.memory_space<vmem>>, vector<16x64xf32>,
    } else {
    }
    %c0 = arith.constant 0 : index
    %c0_1 = arith.constant 0 : index
    %3 = vector.load %arg14[%c0, %c0_1] : memref<16x64xf32, #tpu.memory_space<vmem>>, vector<16x64xf32>
    %4 = arith.truncf %3 : vector<16x64xf32> to vector<16x64xbf16>
    %c0_2 = arith.constant 0 : index
    %c0_3 = arith.constant 0 : index
    %c0_4 = arith.constant 0 : index
    %c0_5 = arith.constant 0 : index
    %5 = vector.load %arg2[%c0_2, %c0_3, %c0_4, %c0_5] : memref<1x3x64x64xbf16, #tpu.memory_space<vmem>>, vector<1x1x64x64xbf16>
    %6 = vector.shape_cast %5 : vector<1x1x64x64xbf16> to vector<64x64xbf16>
    %cst = arith.constant dense<0.000000e+00> : vector<16x64xf32>
    %7 = tpu.matmul %4, %6, %cst {dimension_numbers = #tpu.dot_dimension_numbers<[1], [0], [0], [1], [0, 0, 1, 1], [], []>} : vector<16x64xbf16>, vector<64x64xbf16>, vector<16x64xf32> -> vector<16x64xf32>
    %c0_6 = arith.constant 0 : index
    %c0_7 = arith.constant 0 : index
    %c0_8 = arith.constant 0 : index
    %c0_9 = arith.constant 0 : index
    %8 = vector.load %arg3[%c0_6, %c0_7, %c0_8, %c0_9] : memref<1x3x1x64xf32, #tpu.memory_space<vmem>>, vector<1x1x1x64xf32>
    %9 = vector.shape_cast %8 : vector<1x1x1x64xf32> to vector<1x64xf32>
    %10 = vector.broadcast %9 : vector<1x64xf32> to vector<16x64xf32>
    %11 = arith.addf %7, %10 : vector<16x64xf32>
    %c0_10 = arith.constant 0 : index
    %c1 = arith.constant 1 : index
    %c0_11 = arith.constant 0 : index
    %c0_12 = arith.constant 0 : index
    %12 = vector.load %arg2[%c0_10, %c1, %c0_11, %c0_12] : memref<1x3x64x64xbf16, #tpu.memory_space<vmem>>, vector<1x1x64x64xbf16>
    %13 = vector.shape_cast %12 : vector<1x1x64x64xbf16> to vector<64x64xbf16>
    %cst_13 = arith.constant dense<0.000000e+00> : vector<16x64xf32>
    %14 = tpu.matmul %4, %13, %cst_13 {dimension_numbers = #tpu.dot_dimension_numbers<[1], [0], [0], [1], [0, 0, 1, 1], [], []>} : vector<16x64xbf16>, vector<64x64xbf16>, vector<16x64xf32> -> vector<16x64xf32>
    %c0_14 = arith.constant 0 : index
    %c1_15 = arith.constant 1 : index
    %c0_16 = arith.constant 0 : index
    %c0_17 = arith.constant 0 : index
    %15 = vector.load %arg3[%c0_14, %c1_15, %c0_16, %c0_17] : memref<1x3x1x64xf32, #tpu.memory_space<vmem>>, vector<1x1x1x64xf32>
    %16 = vector.shape_cast %15 : vector<1x1x1x64xf32> to vector<1x64xf32>
    %17 = vector.broadcast %16 : vector<1x64xf32> to vector<16x64xf32>
    %18 = arith.addf %14, %17 : vector<16x64xf32>
    %c0_18 = arith.constant 0 : index
    %c2 = arith.constant 2 : index
    %c0_19 = arith.constant 0 : index
    %c0_20 = arith.constant 0 : index
    %19 = vector.load %arg2[%c0_18, %c2, %c0_19, %c0_20] : memref<1x3x64x64xbf16, #tpu.memory_space<vmem>>, vector<1x1x64x64xbf16>
    %20 = vector.shape_cast %19 : vector<1x1x64x64xbf16> to vector<64x64xbf16>
    %cst_21 = arith.constant dense<0.000000e+00> : vector<16x64xf32>
    %21 = tpu.matmul %4, %20, %cst_21 {dimension_numbers = #tpu.dot_dimension_numbers<[1], [0], [0], [1], [0, 0, 1, 1], [], []>} : vector<16x64xbf16>, vector<64x64xbf16>, vector<16x64xf32> -> vector<16x64xf32>
    %c0_22 = arith.constant 0 : index
    %c2_23 = arith.constant 2 : index
    %c0_24 = arith.constant 0 : index
    %c0_25 = arith.constant 0 : index
    %22 = vector.load %arg3[%c0_22, %c2_23, %c0_24, %c0_25] : memref<1x3x1x64xf32, #tpu.memory_space<vmem>>, vector<1x1x1x64xf32>
    %23 = vector.shape_cast %22 : vector<1x1x1x64xf32> to vector<1x64xf32>
    %24 = vector.broadcast %23 : vector<1x64xf32> to vector<16x64xf32>
    %25 = arith.addf %21, %24 : vector<16x64xf32>
    %cst_26 = arith.constant 0.353553385 : f32
    %26 = vector.broadcast %cst_26 : f32 to vector<16x64xf32>
    %27 = arith.mulf %11, %26 : vector<16x64xf32>
    %28 = arith.truncf %27 : vector<16x64xf32> to vector<16x64xbf16>
    %29 = vector.shape_cast %28 : vector<16x64xbf16> to vector<2x8x64xbf16>
    %30 = arith.truncf %18 : vector<16x64xf32> to vector<16x64xbf16>
    %31 = vector.shape_cast %30 : vector<16x64xbf16> to vector<2x8x64xbf16>
    %32 = arith.truncf %25 : vector<16x64xf32> to vector<16x64xbf16>
    %33 = vector.shape_cast %32 : vector<16x64xbf16> to vector<2x8x64xbf16>
    %34 = vector.extract_strided_slice %29 {offsets = [0, 0, 0], sizes = [2, 8, 8], strides = [1, 1, 1]} : vector<2x8x64xbf16> to vector<2x8x8xbf16>
    %35 = vector.extract_strided_slice %31 {offsets = [0, 0, 0], sizes = [2, 8, 8], strides = [1, 1, 1]} : vector<2x8x64xbf16> to vector<2x8x8xbf16>
    %36 = vector.extract_strided_slice %33 {offsets = [0, 0, 0], sizes = [2, 8, 8], strides = [1, 1, 1]} : vector<2x8x64xbf16> to vector<2x8x8xbf16>
    "tpu.trace_start"() <{level = 10 : i32, message = "bqd,bkd->bqk"}> : () -> ()
    %cst_27 = arith.constant dense<0.000000e+00> : vector<2x8x8xf32>
    %37 = tpu.matmul %34, %35, %cst_27 {dimension_numbers = #tpu.dot_dimension_numbers<[2], [2], [1], [1], [0, 0, 0, 1, 1, 1], [0], [0]>} : vector<2x8x8xbf16>, vector<2x8x8xbf16>, vector<2x8x8xf32> -> vector<2x8x8xf32>
    "tpu.trace_stop"() : () -> ()
    %cst_28 = arith.constant dense<0xFF800000> : vector<2x8xf32>
    %38 = vector.multi_reduction <maximumf>, %37, %cst_28 [2] : vector<2x8x8xf32> to vector<2x8xf32>
    %39 = vector.shape_cast %38 : vector<2x8xf32> to vector<2x8x1xf32>
    %40 = vector.broadcast %39 : vector<2x8x1xf32> to vector<2x8x8xf32>
    %41 = arith.subf %37, %40 : vector<2x8x8xf32>
    %42 = math.exp %41 : vector<2x8x8xf32>
    %cst_29 = arith.constant dense<0.000000e+00> : vector<2x8xf32>
    %43 = vector.multi_reduction <add>, %42, %cst_29 [2] : vector<2x8x8xf32> to vector<2x8xf32>
    %44 = vector.shape_cast %43 : vector<2x8xf32> to vector<2x8x1xf32>
    %45 = tpu.reciprocal %44 {approx = true} : vector<2x8x1xf32> -> vector<2x8x1xf32>
    %46 = vector.broadcast %45 : vector<2x8x1xf32> to vector<2x8x8xf32>
    %47 = arith.mulf %42, %46 : vector<2x8x8xf32>
    %48 = arith.truncf %47 : vector<2x8x8xf32> to vector<2x8x8xbf16>
    "tpu.trace_start"() <{level = 10 : i32, message = "bqk,bkd->bqd"}> : () -> ()
    %cst_30 = arith.constant dense<0.000000e+00> : vector<2x8x8xf32>
    %49 = tpu.matmul %48, %36, %cst_30 {dimension_numbers = #tpu.dot_dimension_numbers<[2], [1], [1], [2], [0, 0, 0, 1, 1, 2], [0], [0]>} : vector<2x8x8xbf16>, vector<2x8x8xbf16>, vector<2x8x8xf32> -> vector<2x8x8xf32>
    "tpu.trace_stop"() : () -> ()
    %50 = vector.extract_strided_slice %29 {offsets = [0, 0, 8], sizes = [2, 8, 8], strides = [1, 1, 1]} : vector<2x8x64xbf16> to vector<2x8x8xbf16>
    %51 = vector.extract_strided_slice %31 {offsets = [0, 0, 8], sizes = [2, 8, 8], strides = [1, 1, 1]} : vector<2x8x64xbf16> to vector<2x8x8xbf16>
    %52 = vector.extract_strided_slice %33 {offsets = [0, 0, 8], sizes = [2, 8, 8], strides = [1, 1, 1]} : vector<2x8x64xbf16> to vector<2x8x8xbf16>
    "tpu.trace_start"() <{level = 10 : i32, message = "bqd,bkd->bqk"}> : () -> ()
    %cst_31 = arith.constant dense<0.000000e+00> : vector<2x8x8xf32>
    %53 = tpu.matmul %50, %51, %cst_31 {dimension_numbers = #tpu.dot_dimension_numbers<[2], [2], [1], [1], [0, 0, 0, 1, 1, 1], [0], [0]>} : vector<2x8x8xbf16>, vector<2x8x8xbf16>, vector<2x8x8xf32> -> vector<2x8x8xf32>
    "tpu.trace_stop"() : () -> ()
    %cst_32 = arith.constant dense<0xFF800000> : vector<2x8xf32>
    %54 = vector.multi_reduction <maximumf>, %53, %cst_32 [2] : vector<2x8x8xf32> to vector<2x8xf32>
    %55 = vector.shape_cast %54 : vector<2x8xf32> to vector<2x8x1xf32>
    %56 = vector.broadcast %55 : vector<2x8x1xf32> to vector<2x8x8xf32>
    %57 = arith.subf %53, %56 : vector<2x8x8xf32>
    %58 = math.exp %57 : vector<2x8x8xf32>
    %cst_33 = arith.constant dense<0.000000e+00> : vector<2x8xf32>
    %59 = vector.multi_reduction <add>, %58, %cst_33 [2] : vector<2x8x8xf32> to vector<2x8xf32>
    %60 = vector.shape_cast %59 : vector<2x8xf32> to vector<2x8x1xf32>
    %61 = tpu.reciprocal %60 {approx = true} : vector<2x8x1xf32> -> vector<2x8x1xf32>
    %62 = vector.broadcast %61 : vector<2x8x1xf32> to vector<2x8x8xf32>
    %63 = arith.mulf %58, %62 : vector<2x8x8xf32>
    %64 = arith.truncf %63 : vector<2x8x8xf32> to vector<2x8x8xbf16>
    "tpu.trace_start"() <{level = 10 : i32, message = "bqk,bkd->bqd"}> : () -> ()
    %cst_34 = arith.constant dense<0.000000e+00> : vector<2x8x8xf32>
    %65 = tpu.matmul %64, %52, %cst_34 {dimension_numbers = #tpu.dot_dimension_numbers<[2], [1], [1], [2], [0, 0, 0, 1, 1, 2], [0], [0]>} : vector<2x8x8xbf16>, vector<2x8x8xbf16>, vector<2x8x8xf32> -> vector<2x8x8xf32>
    "tpu.trace_stop"() : () -> ()
    %66 = vector.extract_strided_slice %29 {offsets = [0, 0, 16], sizes = [2, 8, 8], strides = [1, 1, 1]} : vector<2x8x64xbf16> to vector<2x8x8xbf16>
    %67 = vector.extract_strided_slice %31 {offsets = [0, 0, 16], sizes = [2, 8, 8], strides = [1, 1, 1]} : vector<2x8x64xbf16> to vector<2x8x8xbf16>
    %68 = vector.extract_strided_slice %33 {offsets = [0, 0, 16], sizes = [2, 8, 8], strides = [1, 1, 1]} : vector<2x8x64xbf16> to vector<2x8x8xbf16>
    "tpu.trace_start"() <{level = 10 : i32, message = "bqd,bkd->bqk"}> : () -> ()
    %cst_35 = arith.constant dense<0.000000e+00> : vector<2x8x8xf32>
    %69 = tpu.matmul %66, %67, %cst_35 {dimension_numbers = #tpu.dot_dimension_numbers<[2], [2], [1], [1], [0, 0, 0, 1, 1, 1], [0], [0]>} : vector<2x8x8xbf16>, vector<2x8x8xbf16>, vector<2x8x8xf32> -> vector<2x8x8xf32>
    "tpu.trace_stop"() : () -> ()
    %cst_36 = arith.constant dense<0xFF800000> : vector<2x8xf32>
    %70 = vector.multi_reduction <maximumf>, %69, %cst_36 [2] : vector<2x8x8xf32> to vector<2x8xf32>
    %71 = vector.shape_cast %70 : vector<2x8xf32> to vector<2x8x1xf32>
    %72 = vector.broadcast %71 : vector<2x8x1xf32> to vector<2x8x8xf32>
    %73 = arith.subf %69, %72 : vector<2x8x8xf32>
    %74 = math.exp %73 : vector<2x8x8xf32>
    %cst_37 = arith.constant dense<0.000000e+00> : vector<2x8xf32>
    %75 = vector.multi_reduction <add>, %74, %cst_37 [2] : vector<2x8x8xf32> to vector<2x8xf32>
    %76 = vector.shape_cast %75 : vector<2x8xf32> to vector<2x8x1xf32>
    %77 = tpu.reciprocal %76 {approx = true} : vector<2x8x1xf32> -> vector<2x8x1xf32>
    %78 = vector.broadcast %77 : vector<2x8x1xf32> to vector<2x8x8xf32>
    %79 = arith.mulf %74, %78 : vector<2x8x8xf32>
    %80 = arith.truncf %79 : vector<2x8x8xf32> to vector<2x8x8xbf16>
    "tpu.trace_start"() <{level = 10 : i32, message = "bqk,bkd->bqd"}> : () -> ()
    %cst_38 = arith.constant dense<0.000000e+00> : vector<2x8x8xf32>
    %81 = tpu.matmul %80, %68, %cst_38 {dimension_numbers = #tpu.dot_dimension_numbers<[2], [1], [1], [2], [0, 0, 0, 1, 1, 2], [0], [0]>} : vector<2x8x8xbf16>, vector<2x8x8xbf16>, vector<2x8x8xf32> -> vector<2x8x8xf32>
    "tpu.trace_stop"() : () -> ()
    %82 = vector.extract_strided_slice %29 {offsets = [0, 0, 24], sizes = [2, 8, 8], strides = [1, 1, 1]} : vector<2x8x64xbf16> to vector<2x8x8xbf16>
    %83 = vector.extract_strided_slice %31 {offsets = [0, 0, 24], sizes = [2, 8, 8], strides = [1, 1, 1]} : vector<2x8x64xbf16> to vector<2x8x8xbf16>
    %84 = vector.extract_strided_slice %33 {offsets = [0, 0, 24], sizes = [2, 8, 8], strides = [1, 1, 1]} : vector<2x8x64xbf16> to vector<2x8x8xbf16>
    "tpu.trace_start"() <{level = 10 : i32, message = "bqd,bkd->bqk"}> : () -> ()
    %cst_39 = arith.constant dense<0.000000e+00> : vector<2x8x8xf32>
    %85 = tpu.matmul %82, %83, %cst_39 {dimension_numbers = #tpu.dot_dimension_numbers<[2], [2], [1], [1], [0, 0, 0, 1, 1, 1], [0], [0]>} : vector<2x8x8xbf16>, vector<2x8x8xbf16>, vector<2x8x8xf32> -> vector<2x8x8xf32>
    "tpu.trace_stop"() : () -> ()
    %cst_40 = arith.constant dense<0xFF800000> : vector<2x8xf32>
    %86 = vector.multi_reduction <maximumf>, %85, %cst_40 [2] : vector<2x8x8xf32> to vector<2x8xf32>
    %87 = vector.shape_cast %86 : vector<2x8xf32> to vector<2x8x1xf32>
    %88 = vector.broadcast %87 : vector<2x8x1xf32> to vector<2x8x8xf32>
    %89 = arith.subf %85, %88 : vector<2x8x8xf32>
    %90 = math.exp %89 : vector<2x8x8xf32>
    %cst_41 = arith.constant dense<0.000000e+00> : vector<2x8xf32>
    %91 = vector.multi_reduction <add>, %90, %cst_41 [2] : vector<2x8x8xf32> to vector<2x8xf32>
    %92 = vector.shape_cast %91 : vector<2x8xf32> to vector<2x8x1xf32>
    %93 = tpu.reciprocal %92 {approx = true} : vector<2x8x1xf32> -> vector<2x8x1xf32>
    %94 = vector.broadcast %93 : vector<2x8x1xf32> to vector<2x8x8xf32>
    %95 = arith.mulf %90, %94 : vector<2x8x8xf32>
    %96 = arith.truncf %95 : vector<2x8x8xf32> to vector<2x8x8xbf16>
    "tpu.trace_start"() <{level = 10 : i32, message = "bqk,bkd->bqd"}> : () -> ()
    %cst_42 = arith.constant dense<0.000000e+00> : vector<2x8x8xf32>
    %97 = tpu.matmul %96, %84, %cst_42 {dimension_numbers = #tpu.dot_dimension_numbers<[2], [1], [1], [2], [0, 0, 0, 1, 1, 2], [0], [0]>} : vector<2x8x8xbf16>, vector<2x8x8xbf16>, vector<2x8x8xf32> -> vector<2x8x8xf32>
    "tpu.trace_stop"() : () -> ()
    %98 = vector.extract_strided_slice %29 {offsets = [0, 0, 32], sizes = [2, 8, 8], strides = [1, 1, 1]} : vector<2x8x64xbf16> to vector<2x8x8xbf16>
    %99 = vector.extract_strided_slice %31 {offsets = [0, 0, 32], sizes = [2, 8, 8], strides = [1, 1, 1]} : vector<2x8x64xbf16> to vector<2x8x8xbf16>
    %100 = vector.extract_strided_slice %33 {offsets = [0, 0, 32], sizes = [2, 8, 8], strides = [1, 1, 1]} : vector<2x8x64xbf16> to vector<2x8x8xbf16>
    "tpu.trace_start"() <{level = 10 : i32, message = "bqd,bkd->bqk"}> : () -> ()
    %cst_43 = arith.constant dense<0.000000e+00> : vector<2x8x8xf32>
    %101 = tpu.matmul %98, %99, %cst_43 {dimension_numbers = #tpu.dot_dimension_numbers<[2], [2], [1], [1], [0, 0, 0, 1, 1, 1], [0], [0]>} : vector<2x8x8xbf16>, vector<2x8x8xbf16>, vector<2x8x8xf32> -> vector<2x8x8xf32>
    "tpu.trace_stop"() : () -> ()
    %cst_44 = arith.constant dense<0xFF800000> : vector<2x8xf32>
    %102 = vector.multi_reduction <maximumf>, %101, %cst_44 [2] : vector<2x8x8xf32> to vector<2x8xf32>
    %103 = vector.shape_cast %102 : vector<2x8xf32> to vector<2x8x1xf32>
    %104 = vector.broadcast %103 : vector<2x8x1xf32> to vector<2x8x8xf32>
    %105 = arith.subf %101, %104 : vector<2x8x8xf32>
    %106 = math.exp %105 : vector<2x8x8xf32>
    %cst_45 = arith.constant dense<0.000000e+00> : vector<2x8xf32>
    %107 = vector.multi_reduction <add>, %106, %cst_45 [2] : vector<2x8x8xf32> to vector<2x8xf32>
    %108 = vector.shape_cast %107 : vector<2x8xf32> to vector<2x8x1xf32>
    %109 = tpu.reciprocal %108 {approx = true} : vector<2x8x1xf32> -> vector<2x8x1xf32>
    %110 = vector.broadcast %109 : vector<2x8x1xf32> to vector<2x8x8xf32>
    %111 = arith.mulf %106, %110 : vector<2x8x8xf32>
    %112 = arith.truncf %111 : vector<2x8x8xf32> to vector<2x8x8xbf16>
    "tpu.trace_start"() <{level = 10 : i32, message = "bqk,bkd->bqd"}> : () -> ()
    %cst_46 = arith.constant dense<0.000000e+00> : vector<2x8x8xf32>
    %113 = tpu.matmul %112, %100, %cst_46 {dimension_numbers = #tpu.dot_dimension_numbers<[2], [1], [1], [2], [0, 0, 0, 1, 1, 2], [0], [0]>} : vector<2x8x8xbf16>, vector<2x8x8xbf16>, vector<2x8x8xf32> -> vector<2x8x8xf32>
    "tpu.trace_stop"() : () -> ()
    %114 = vector.extract_strided_slice %29 {offsets = [0, 0, 40], sizes = [2, 8, 8], strides = [1, 1, 1]} : vector<2x8x64xbf16> to vector<2x8x8xbf16>
    %115 = vector.extract_strided_slice %31 {offsets = [0, 0, 40], sizes = [2, 8, 8], strides = [1, 1, 1]} : vector<2x8x64xbf16> to vector<2x8x8xbf16>
    %116 = vector.extract_strided_slice %33 {offsets = [0, 0, 40], sizes = [2, 8, 8], strides = [1, 1, 1]} : vector<2x8x64xbf16> to vector<2x8x8xbf16>
    "tpu.trace_start"() <{level = 10 : i32, message = "bqd,bkd->bqk"}> : () -> ()
    %cst_47 = arith.constant dense<0.000000e+00> : vector<2x8x8xf32>
    %117 = tpu.matmul %114, %115, %cst_47 {dimension_numbers = #tpu.dot_dimension_numbers<[2], [2], [1], [1], [0, 0, 0, 1, 1, 1], [0], [0]>} : vector<2x8x8xbf16>, vector<2x8x8xbf16>, vector<2x8x8xf32> -> vector<2x8x8xf32>
    "tpu.trace_stop"() : () -> ()
    %cst_48 = arith.constant dense<0xFF800000> : vector<2x8xf32>
    %118 = vector.multi_reduction <maximumf>, %117, %cst_48 [2] : vector<2x8x8xf32> to vector<2x8xf32>
    %119 = vector.shape_cast %118 : vector<2x8xf32> to vector<2x8x1xf32>
    %120 = vector.broadcast %119 : vector<2x8x1xf32> to vector<2x8x8xf32>
    %121 = arith.subf %117, %120 : vector<2x8x8xf32>
    %122 = math.exp %121 : vector<2x8x8xf32>
    %cst_49 = arith.constant dense<0.000000e+00> : vector<2x8xf32>
    %123 = vector.multi_reduction <add>, %122, %cst_49 [2] : vector<2x8x8xf32> to vector<2x8xf32>
    %124 = vector.shape_cast %123 : vector<2x8xf32> to vector<2x8x1xf32>
    %125 = tpu.reciprocal %124 {approx = true} : vector<2x8x1xf32> -> vector<2x8x1xf32>
    %126 = vector.broadcast %125 : vector<2x8x1xf32> to vector<2x8x8xf32>
    %127 = arith.mulf %122, %126 : vector<2x8x8xf32>
    %128 = arith.truncf %127 : vector<2x8x8xf32> to vector<2x8x8xbf16>
    "tpu.trace_start"() <{level = 10 : i32, message = "bqk,bkd->bqd"}> : () -> ()
    %cst_50 = arith.constant dense<0.000000e+00> : vector<2x8x8xf32>
    %129 = tpu.matmul %128, %116, %cst_50 {dimension_numbers = #tpu.dot_dimension_numbers<[2], [1], [1], [2], [0, 0, 0, 1, 1, 2], [0], [0]>} : vector<2x8x8xbf16>, vector<2x8x8xbf16>, vector<2x8x8xf32> -> vector<2x8x8xf32>
    "tpu.trace_stop"() : () -> ()
    %130 = vector.extract_strided_slice %29 {offsets = [0, 0, 48], sizes = [2, 8, 8], strides = [1, 1, 1]} : vector<2x8x64xbf16> to vector<2x8x8xbf16>
    %131 = vector.extract_strided_slice %31 {offsets = [0, 0, 48], sizes = [2, 8, 8], strides = [1, 1, 1]} : vector<2x8x64xbf16> to vector<2x8x8xbf16>
    %132 = vector.extract_strided_slice %33 {offsets = [0, 0, 48], sizes = [2, 8, 8], strides = [1, 1, 1]} : vector<2x8x64xbf16> to vector<2x8x8xbf16>
    "tpu.trace_start"() <{level = 10 : i32, message = "bqd,bkd->bqk"}> : () -> ()
    %cst_51 = arith.constant dense<0.000000e+00> : vector<2x8x8xf32>
    %133 = tpu.matmul %130, %131, %cst_51 {dimension_numbers = #tpu.dot_dimension_numbers<[2], [2], [1], [1], [0, 0, 0, 1, 1, 1], [0], [0]>} : vector<2x8x8xbf16>, vector<2x8x8xbf16>, vector<2x8x8xf32> -> vector<2x8x8xf32>
    "tpu.trace_stop"() : () -> ()
    %cst_52 = arith.constant dense<0xFF800000> : vector<2x8xf32>
    %134 = vector.multi_reduction <maximumf>, %133, %cst_52 [2] : vector<2x8x8xf32> to vector<2x8xf32>
    %135 = vector.shape_cast %134 : vector<2x8xf32> to vector<2x8x1xf32>
    %136 = vector.broadcast %135 : vector<2x8x1xf32> to vector<2x8x8xf32>
    %137 = arith.subf %133, %136 : vector<2x8x8xf32>
    %138 = math.exp %137 : vector<2x8x8xf32>
    %cst_53 = arith.constant dense<0.000000e+00> : vector<2x8xf32>
    %139 = vector.multi_reduction <add>, %138, %cst_53 [2] : vector<2x8x8xf32> to vector<2x8xf32>
    %140 = vector.shape_cast %139 : vector<2x8xf32> to vector<2x8x1xf32>
    %141 = tpu.reciprocal %140 {approx = true} : vector<2x8x1xf32> -> vector<2x8x1xf32>
    %142 = vector.broadcast %141 : vector<2x8x1xf32> to vector<2x8x8xf32>
    %143 = arith.mulf %138, %142 : vector<2x8x8xf32>
    %144 = arith.truncf %143 : vector<2x8x8xf32> to vector<2x8x8xbf16>
    "tpu.trace_start"() <{level = 10 : i32, message = "bqk,bkd->bqd"}> : () -> ()
    %cst_54 = arith.constant dense<0.000000e+00> : vector<2x8x8xf32>
    %145 = tpu.matmul %144, %132, %cst_54 {dimension_numbers = #tpu.dot_dimension_numbers<[2], [1], [1], [2], [0, 0, 0, 1, 1, 2], [0], [0]>} : vector<2x8x8xbf16>, vector<2x8x8xbf16>, vector<2x8x8xf32> -> vector<2x8x8xf32>
    "tpu.trace_stop"() : () -> ()
    %146 = vector.extract_strided_slice %29 {offsets = [0, 0, 56], sizes = [2, 8, 8], strides = [1, 1, 1]} : vector<2x8x64xbf16> to vector<2x8x8xbf16>
    %147 = vector.extract_strided_slice %31 {offsets = [0, 0, 56], sizes = [2, 8, 8], strides = [1, 1, 1]} : vector<2x8x64xbf16> to vector<2x8x8xbf16>
    %148 = vector.extract_strided_slice %33 {offsets = [0, 0, 56], sizes = [2, 8, 8], strides = [1, 1, 1]} : vector<2x8x64xbf16> to vector<2x8x8xbf16>
    "tpu.trace_start"() <{level = 10 : i32, message = "bqd,bkd->bqk"}> : () -> ()
    %cst_55 = arith.constant dense<0.000000e+00> : vector<2x8x8xf32>
    %149 = tpu.matmul %146, %147, %cst_55 {dimension_numbers = #tpu.dot_dimension_numbers<[2], [2], [1], [1], [0, 0, 0, 1, 1, 1], [0], [0]>} : vector<2x8x8xbf16>, vector<2x8x8xbf16>, vector<2x8x8xf32> -> vector<2x8x8xf32>
    "tpu.trace_stop"() : () -> ()
    %cst_56 = arith.constant dense<0xFF800000> : vector<2x8xf32>
    %150 = vector.multi_reduction <maximumf>, %149, %cst_56 [2] : vector<2x8x8xf32> to vector<2x8xf32>
    %151 = vector.shape_cast %150 : vector<2x8xf32> to vector<2x8x1xf32>
    %152 = vector.broadcast %151 : vector<2x8x1xf32> to vector<2x8x8xf32>
    %153 = arith.subf %149, %152 : vector<2x8x8xf32>
    %154 = math.exp %153 : vector<2x8x8xf32>
    %cst_57 = arith.constant dense<0.000000e+00> : vector<2x8xf32>
    %155 = vector.multi_reduction <add>, %154, %cst_57 [2] : vector<2x8x8xf32> to vector<2x8xf32>
    %156 = vector.shape_cast %155 : vector<2x8xf32> to vector<2x8x1xf32>
    %157 = tpu.reciprocal %156 {approx = true} : vector<2x8x1xf32> -> vector<2x8x1xf32>
    %158 = vector.broadcast %157 : vector<2x8x1xf32> to vector<2x8x8xf32>
    %159 = arith.mulf %154, %158 : vector<2x8x8xf32>
    %160 = arith.truncf %159 : vector<2x8x8xf32> to vector<2x8x8xbf16>
    "tpu.trace_start"() <{level = 10 : i32, message = "bqk,bkd->bqd"}> : () -> ()
    %cst_58 = arith.constant dense<0.000000e+00> : vector<2x8x8xf32>
    %161 = tpu.matmul %160, %148, %cst_58 {dimension_numbers = #tpu.dot_dimension_numbers<[2], [1], [1], [2], [0, 0, 0, 1, 1, 2], [0], [0]>} : vector<2x8x8xbf16>, vector<2x8x8xbf16>, vector<2x8x8xf32> -> vector<2x8x8xf32>
    "tpu.trace_stop"() : () -> ()
    %162 = tpu.concatenate %49, %65, %81, %97, %113, %129, %145, %161 in 2 : vector<2x8x8xf32>, vector<2x8x8xf32>, vector<2x8x8xf32>, vector<2x8x8xf32>, vector<2x8x8xf32>, vector<2x8x8xf32>, vector<2x8x8xf32>, vector<2x8x8xf32> -> vector<2x8x64xf32>
    %163 = vector.shape_cast %162 : vector<2x8x64xf32> to vector<16x64xf32>
    %164 = arith.truncf %163 : vector<16x64xf32> to vector<16x64xbf16>
    %c0_59 = arith.constant 0 : index
    %c0_60 = arith.constant 0 : index
    %c0_61 = arith.constant 0 : index
    %165 = vector.load %arg4[%c0_59, %c0_60, %c0_61] : memref<1x64x64xbf16, #tpu.memory_space<vmem>>, vector<1x64x64xbf16>
    %166 = vector.shape_cast %165 : vector<1x64x64xbf16> to vector<64x64xbf16>
    %cst_62 = arith.constant dense<0.000000e+00> : vector<16x64xf32>
    %167 = tpu.matmul %164, %166, %cst_62 {dimension_numbers = #tpu.dot_dimension_numbers<[1], [0], [0], [1], [0, 0, 1, 1], [], []>} : vector<16x64xbf16>, vector<64x64xbf16>, vector<16x64xf32> -> vector<16x64xf32>
    %c0_63 = arith.constant 0 : index
    %c0_64 = arith.constant 0 : index
    %c0_65 = arith.constant 0 : index
    %168 = vector.load %arg5[%c0_63, %c0_64, %c0_65] : memref<1x1x64xf32, #tpu.memory_space<vmem>>, vector<1x1x64xf32>
    %169 = vector.shape_cast %168 : vector<1x1x64xf32> to vector<1x64xf32>
    %170 = vector.broadcast %169 : vector<1x64xf32> to vector<16x64xf32>
    %171 = arith.addf %167, %170 : vector<16x64xf32>
    %172 = arith.addf %3, %171 : vector<16x64xf32>
    %c0_66 = arith.constant 0 : index
    %c0_67 = arith.constant 0 : index
    %c0_68 = arith.constant 0 : index
    %173 = vector.load %arg6[%c0_66, %c0_67, %c0_68] : memref<1x1x64xf32, #tpu.memory_space<vmem>>, vector<1x1x64xf32>
    %174 = vector.shape_cast %173 : vector<1x1x64xf32> to vector<1x64xf32>
    %c0_69 = arith.constant 0 : index
    %c0_70 = arith.constant 0 : index
    %c0_71 = arith.constant 0 : index
    %175 = vector.load %arg7[%c0_69, %c0_70, %c0_71] : memref<1x1x64xf32, #tpu.memory_space<vmem>>, vector<1x1x64xf32>
    %176 = vector.shape_cast %175 : vector<1x1x64xf32> to vector<1x64xf32>
    %cst_72 = arith.constant dense<0.000000e+00> : vector<16xf32>
    %177 = vector.multi_reduction <add>, %172, %cst_72 [1] : vector<16x64xf32> to vector<16xf32>
    %178 = vector.shape_cast %177 : vector<16xf32> to vector<16x1xf32>
    %cst_73 = arith.constant 6.400000e+01 : f32
    %179 = vector.broadcast %cst_73 : f32 to vector<16x1xf32>
    %180 = arith.divf %178, %179 : vector<16x1xf32>
    %181 = vector.broadcast %180 : vector<16x1xf32> to vector<16x64xf32>
    %182 = arith.subf %172, %181 : vector<16x64xf32>
    %183 = arith.mulf %182, %182 : vector<16x64xf32>
    %cst_74 = arith.constant dense<0.000000e+00> : vector<16xf32>
    %184 = vector.multi_reduction <add>, %183, %cst_74 [1] : vector<16x64xf32> to vector<16xf32>
    %185 = vector.shape_cast %184 : vector<16xf32> to vector<16x1xf32>
    %cst_75 = arith.constant 6.400000e+01 : f32
    %186 = vector.broadcast %cst_75 : f32 to vector<16x1xf32>
    %187 = arith.divf %185, %186 : vector<16x1xf32>
    %cst_76 = arith.constant 9.99999974E-6 : f32
    %188 = vector.broadcast %cst_76 : f32 to vector<16x1xf32>
    %189 = arith.addf %187, %188 : vector<16x1xf32>
    %190 = math.rsqrt %189 : vector<16x1xf32>
    %191 = vector.broadcast %190 : vector<16x1xf32> to vector<16x64xf32>
    %192 = arith.mulf %182, %191 : vector<16x64xf32>
    %193 = vector.broadcast %174 : vector<1x64xf32> to vector<16x64xf32>
    %194 = arith.mulf %192, %193 : vector<16x64xf32>
    %195 = vector.broadcast %176 : vector<1x64xf32> to vector<16x64xf32>
    %196 = arith.addf %194, %195 : vector<16x64xf32>
    %197 = arith.truncf %196 : vector<16x64xf32> to vector<16x64xbf16>
    %c0_77 = arith.constant 0 : index
    %c0_78 = arith.constant 0 : index
    %c0_79 = arith.constant 0 : index
    %198 = vector.load %arg8[%c0_77, %c0_78, %c0_79] : memref<1x64x2048xbf16, #tpu.memory_space<vmem>>, vector<1x64x2048xbf16>
    %199 = vector.shape_cast %198 : vector<1x64x2048xbf16> to vector<64x2048xbf16>
    %cst_80 = arith.constant dense<0.000000e+00> : vector<16x2048xf32>
    %200 = tpu.matmul %197, %199, %cst_80 {dimension_numbers = #tpu.dot_dimension_numbers<[1], [0], [0], [1], [0, 0, 1, 1], [], []>} : vector<16x64xbf16>, vector<64x2048xbf16>, vector<16x2048xf32> -> vector<16x2048xf32>
    %c0_81 = arith.constant 0 : index
    %c0_82 = arith.constant 0 : index
    %c0_83 = arith.constant 0 : index
    %201 = vector.load %arg9[%c0_81, %c0_82, %c0_83] : memref<1x1x2048xf32, #tpu.memory_space<vmem>>, vector<1x1x2048xf32>
    %202 = vector.shape_cast %201 : vector<1x1x2048xf32> to vector<1x2048xf32>
    %203 = vector.broadcast %202 : vector<1x2048xf32> to vector<16x2048xf32>
    %204 = arith.addf %200, %203 : vector<16x2048xf32>
    %cst_84 = arith.constant 0.000000e+00 : f32
    %205 = vector.broadcast %cst_84 : f32 to vector<16x2048xf32>
    %206 = arith.maximumf %204, %205 : vector<16x2048xf32>
    %207 = arith.truncf %206 : vector<16x2048xf32> to vector<16x2048xbf16>
    %c0_85 = arith.constant 0 : index
    %c0_86 = arith.constant 0 : index
    %c0_87 = arith.constant 0 : index
    %208 = vector.load %arg10[%c0_85, %c0_86, %c0_87] : memref<1x2048x64xbf16, #tpu.memory_space<vmem>>, vector<1x2048x64xbf16>
    %209 = vector.shape_cast %208 : vector<1x2048x64xbf16> to vector<2048x64xbf16>
    %cst_88 = arith.constant dense<0.000000e+00> : vector<16x64xf32>
    %210 = tpu.matmul %207, %209, %cst_88 {dimension_numbers = #tpu.dot_dimension_numbers<[1], [0], [0], [1], [0, 0, 1, 1], [], []>} : vector<16x2048xbf16>, vector<2048x64xbf16>, vector<16x64xf32> -> vector<16x64xf32>
    %c0_89 = arith.constant 0 : index
    %c0_90 = arith.constant 0 : index
    %c0_91 = arith.constant 0 : index
    %211 = vector.load %arg11[%c0_89, %c0_90, %c0_91] : memref<1x1x64xf32, #tpu.memory_space<vmem>>, vector<1x1x64xf32>
    %212 = vector.shape_cast %211 : vector<1x1x64xf32> to vector<1x64xf32>
    %213 = vector.broadcast %212 : vector<1x64xf32> to vector<16x64xf32>
    %214 = arith.addf %210, %213 : vector<16x64xf32>
    %215 = arith.addf %196, %214 : vector<16x64xf32>
    %c0_92 = arith.constant 0 : index
    %c0_93 = arith.constant 0 : index
    %c0_94 = arith.constant 0 : index
    %216 = vector.load %arg12[%c0_92, %c0_93, %c0_94] : memref<1x1x64xf32, #tpu.memory_space<vmem>>, vector<1x1x64xf32>
    %217 = vector.shape_cast %216 : vector<1x1x64xf32> to vector<1x64xf32>
    %c0_95 = arith.constant 0 : index
    %c0_96 = arith.constant 0 : index
    %c0_97 = arith.constant 0 : index
    %218 = vector.load %arg13[%c0_95, %c0_96, %c0_97] : memref<1x1x64xf32, #tpu.memory_space<vmem>>, vector<1x1x64xf32>
    %219 = vector.shape_cast %218 : vector<1x1x64xf32> to vector<1x64xf32>
    %cst_98 = arith.constant dense<0.000000e+00> : vector<16xf32>
    %220 = vector.multi_reduction <add>, %215, %cst_98 [1] : vector<16x64xf32> to vector<16xf32>
    %221 = vector.shape_cast %220 : vector<16xf32> to vector<16x1xf32>
    %cst_99 = arith.constant 6.400000e+01 : f32
    %222 = vector.broadcast %cst_99 : f32 to vector<16x1xf32>
    %223 = arith.divf %221, %222 : vector<16x1xf32>
    %224 = vector.broadcast %223 : vector<16x1xf32> to vector<16x64xf32>
    %225 = arith.subf %215, %224 : vector<16x64xf32>
    %226 = arith.mulf %225, %225 : vector<16x64xf32>
    %cst_100 = arith.constant dense<0.000000e+00> : vector<16xf32>
    %227 = vector.multi_reduction <add>, %226, %cst_100 [1] : vector<16x64xf32> to vector<16xf32>
    %228 = vector.shape_cast %227 : vector<16xf32> to vector<16x1xf32>
    %cst_101 = arith.constant 6.400000e+01 : f32
    %229 = vector.broadcast %cst_101 : f32 to vector<16x1xf32>
    %230 = arith.divf %228, %229 : vector<16x1xf32>
    %cst_102 = arith.constant 9.99999974E-6 : f32
    %231 = vector.broadcast %cst_102 : f32 to vector<16x1xf32>
    %232 = arith.addf %230, %231 : vector<16x1xf32>
    %233 = math.rsqrt %232 : vector<16x1xf32>
    %234 = vector.broadcast %233 : vector<16x1xf32> to vector<16x64xf32>
    %235 = arith.mulf %225, %234 : vector<16x64xf32>
    %236 = vector.broadcast %217 : vector<1x64xf32> to vector<16x64xf32>
    %237 = arith.mulf %235, %236 : vector<16x64xf32>
    %238 = vector.broadcast %219 : vector<1x64xf32> to vector<16x64xf32>
    %239 = arith.addf %237, %238 : vector<16x64xf32>
    %c0_103 = arith.constant 0 : index
    %c0_104 = arith.constant 0 : index
    %240 = vector.load %arg14[%c0_103, %c0_104] : memref<16x64xf32, #tpu.memory_space<vmem>>, vector<16x64xf32>
    tpu.vector_store %arg14[%c0_103, %c0_104], %239 {strides = array<i32>} : memref<16x64xf32, #tpu.memory_space<vmem>>, vector<16x64xf32>,
    return
  }
  func.func @transform_0(%arg0: i32) -> (i32, i32) {
    %c0_i32 = arith.constant 0 : i32
    %c0_i32_0 = arith.constant 0 : i32
    %c0_i32_1 = arith.constant 0 : i32
    return %c0_i32, %c0_i32_0 : i32, i32
  }
  func.func @transform_1(%arg0: i32) -> (i32, i32, i32, i32) {
    %c0_i32 = arith.constant 0 : i32
    %c0_i32_0 = arith.constant 0 : i32
    %c0_i32_1 = arith.constant 0 : i32
    %c0_i32_2 = arith.constant 0 : i32
    return %arg0, %c0_i32, %c0_i32_0, %c0_i32_1 : i32, i32, i32, i32
  }
  func.func @transform_2(%arg0: i32) -> (i32, i32, i32, i32) {
    %c0_i32 = arith.constant 0 : i32
    %c0_i32_0 = arith.constant 0 : i32
    %c0_i32_1 = arith.constant 0 : i32
    %c0_i32_2 = arith.constant 0 : i32
    return %arg0, %c0_i32, %c0_i32_0, %c0_i32_1 : i32, i32, i32, i32
  }
  func.func @transform_3(%arg0: i32) -> (i32, i32, i32) {
    %c0_i32 = arith.constant 0 : i32
    %c0_i32_0 = arith.constant 0 : i32
    %c0_i32_1 = arith.constant 0 : i32
    return %arg0, %c0_i32, %c0_i32_0 : i32, i32, i32
  }
  func.func @transform_4(%arg0: i32) -> (i32, i32, i32) {
    %c0_i32 = arith.constant 0 : i32
    %c0_i32_0 = arith.constant 0 : i32
    %c0_i32_1 = arith.constant 0 : i32
    return %arg0, %c0_i32, %c0_i32_0 : i32, i32, i32
  }
  func.func @transform_5(%arg0: i32) -> (i32, i32, i32) {
    %c0_i32 = arith.constant 0 : i32
    %c0_i32_0 = arith.constant 0 : i32
    %c0_i32_1 = arith.constant 0 : i32
    return %arg0, %c0_i32, %c0_i32_0 : i32, i32, i32
  }
  func.func @transform_6(%arg0: i32) -> (i32, i32, i32) {
    %c0_i32 = arith.constant 0 : i32
    %c0_i32_0 = arith.constant 0 : i32
    %c0_i32_1 = arith.constant 0 : i32
    return %arg0, %c0_i32, %c0_i32_0 : i32, i32, i32
  }
  func.func @transform_7(%arg0: i32) -> (i32, i32, i32) {
    %c0_i32 = arith.constant 0 : i32
    %c0_i32_0 = arith.constant 0 : i32
    %c0_i32_1 = arith.constant 0 : i32
    return %arg0, %c0_i32, %c0_i32_0 : i32, i32, i32
  }
  func.func @transform_8(%arg0: i32) -> (i32, i32, i32) {
    %c0_i32 = arith.constant 0 : i32
    %c0_i32_0 = arith.constant 0 : i32
    %c0_i32_1 = arith.constant 0 : i32
    return %arg0, %c0_i32, %c0_i32_0 : i32, i32, i32
  }
  func.func @transform_9(%arg0: i32) -> (i32, i32, i32) {
    %c0_i32 = arith.constant 0 : i32
    %c0_i32_0 = arith.constant 0 : i32
    %c0_i32_1 = arith.constant 0 : i32
    return %arg0, %c0_i32, %c0_i32_0 : i32, i32, i32
  }
  func.func @transform_10(%arg0: i32) -> (i32, i32, i32) {
    %c0_i32 = arith.constant 0 : i32
    %c0_i32_0 = arith.constant 0 : i32
    %c0_i32_1 = arith.constant 0 : i32
    return %arg0, %c0_i32, %c0_i32_0 : i32, i32, i32
  }
  func.func @transform_11(%arg0: i32) -> (i32, i32, i32) {
    %c0_i32 = arith.constant 0 : i32
    %c0_i32_0 = arith.constant 0 : i32
    %c0_i32_1 = arith.constant 0 : i32
    return %arg0, %c0_i32, %c0_i32_0 : i32, i32, i32
  }
  func.func @transform_12(%arg0: i32) -> (i32, i32, i32) {
    %c0_i32 = arith.constant 0 : i32
    %c0_i32_0 = arith.constant 0 : i32
    %c0_i32_1 = arith.constant 0 : i32
    return %arg0, %c0_i32, %c0_i32_0 : i32, i32, i32
  }
  func.func @transform_13(%arg0: i32) -> (i32, i32) {
    %c0_i32 = arith.constant 0 : i32
    %c0_i32_0 = arith.constant 0 : i32
    %c0_i32_1 = arith.constant 0 : i32
    return %c0_i32, %c0_i32_0 : i32, i32
  }
}

</mosaic_0001>

<bundles_post_ra>
// kernel: tpu_custom_call.1
= control target key start
LH: loop header
LB: loop body
LE: loop exit
PB: predicated region body
PF: predicated region fallthrough
CT: control target
= control target key end

     0   :  { %s7366_s0 = inlined_call_operand.vmem [shape: f32[16,64], index: 0, kind: input, shape index: {}]   ;;  %s7367_s1 = inlined_call_operand.vmem [shape: bf16[5,3,64,64], index: 1, kind: input, shape index: {}]   ;;  %s7368_s2 = inlined_call_operand.vmem [shape: f32[5,3,1,64], index: 2, kind: input, shape index: {}]   ;;  %s7369_s3 = inlined_call_operand.vmem [shape: bf16[5,64,64], index: 3, kind: input, shape index: {}]   ;;  %s7370_s4 = inlined_call_operand.vmem [shape: f32[5,1,64], index: 4, kind: input, shape index: {}]   ;;  %s7371_s5 = inlined_call_operand.vmem [shape: f32[5,1,64], index: 5, kind: input, shape index: {}]   ;;  %s7372_s6 = inlined_call_operand.vmem [shape: f32[5,1,64], index: 6, kind: input, shape index: {}]   ;;  %s7373_s7 = inlined_call_operand.vmem [shape: bf16[5,64,2048], index: 7, kind: input, shape index: {}]   ;;  %s7374_s8 = inlined_call_operand.vmem [shape: f32[5,1,2048], index: 8, kind: input, shape index: {}]   ;;  %s7375_s9 = inlined_call_operand.vmem [shape: bf16[5,2048,64], index: 9, kind: input, shape index: {}]   ;;  %s7376_s10 = inlined_call_operand.vmem [shape: f32[5,1,64], index: 10, kind: input, shape index: {}]   ;;  %s7377_s11 = inlined_call_operand.vmem [shape: f32[5,1,64], index: 11, kind: input, shape index: {}]   ;;  %s7378_s12 = inlined_call_operand.vmem [shape: f32[5,1,64], index: 12, kind: input, shape index: {}]   ;;  %s7379_s13 = inlined_call_operand.hbm [shape: f32[16,64], index: 13, kind: output, shape index: {}]  }
   0x1   :  { %7382 = sst [smem:[#allocation6_spill]] %s7366_s0 }
   0x2   :  { %7383 = sst [smem:[#allocation7_spill]] %s7367_s1 }
   0x3   :  { %7384 = sst [smem:[#allocation8_spill]] %s7368_s2 }
   0x4   :  { %7385 = sst [smem:[#allocation9_spill]] %s7369_s3 }
   0x5   :  { %7386 = sst [smem:[#allocation10_spill]] %s7379_s13 }
   0x6   :  { %18 = vsyncpa [#allocation3], 0  ;;  %s6500_s25 = smov 0  }
   0x7 LB: > { %7387 = sst [smem:[#allocation5_spill]] %s6409_s25  ;;  %s6506_s26 = sadd.s32 4294967295, %s6409_s25   ;;  %s6409_s25 = sphi %s6500_s25, %s24_s25  }
   0x8   : > { %p5279_p0 = scmp.ge.s32.totalorder %s6409_s25, 1  ;;  %p479_p1 = scmp.lt.s32.totalorder %s6409_s25, 6 }
   0xa   : > { %p480_p2 = pnand %p5279_p0, %p479_p1 }
   0xb   : > { %p559_p3 = scmp.lt.s32.totalorder (!%p480_p2), %s6506_s26, 4  ;;  %s7388_s3 = sld [smem:[#allocation9_spill]] (!%p480_p2) }
   0xc   : > { %483 = sbr.rel (%p480_p2) target bundleno = 6074 (0x17ba), region = 72  ;;  %s7389_s1 = sld [smem:[#allocation7_spill]] (!%p480_p2) }
   0xd   : > { %s7390_s2 = sld [smem:[#allocation8_spill]] (!%p480_p2)  ;;  %p5288_p4 = scmp.ne.s32.totalorder (!%p480_p2), %s6506_s26, 0 }
  0x11   : > { %s6512_s27 = scalar_select %p559_p3, %s6506_s26, 4 }
  0x12   : > { %s7391_s24 = sld [smem:[#allocation6_spill]] (!%p5288_p4) }
  0x13   : > { %s6087_s28 = smul.u32 96, %s6512_s27  ;;  %s5578_s29 = sshll.u32 %s6512_s27, 5 }
  0x14   : > { %s6088_s30 = smul.u32 3, %s6512_s27  ;;  %s6520_s16 = scalar_lea.vmem %s7388_s3, %s5578_s29 }
  0x15   : > { %s6525_s19 = scalar_lea.vmem %s7389_s1, %s6087_s28  ;;  %s5579_s17 = sshll.u32 %s6512_s27, 9 }
  0x16   : > { %s6534_s25 = scalar_lea.vmem %s7390_s2, %s6088_s30  ;;  %s6548_s1 = scalar_lea.vmem %s7373_s7, %s5579_s17 }
  0x17   : > { %s5285_s20 = sshll.u32 %s6512_s27, 4  ;;  %s5580_s23 = sshll.u32 %s6512_s27, 10 }
  0x18   : > { %s6554_s30 = scalar_lea.vmem %s7374_s8, %s5285_s20  ;;  %s6560_s13 = scalar_lea.vmem %s7375_s9, %s5580_s23 }
  0x19   : > { %s598_s3 = scalar_lea.vmem %s7376_s10, %s6512_s27  ;;  %s601_s17 = scalar_lea.vmem %s7377_s11, %s6512_s27 }
  0x1a   : > { %s604_s22 = scalar_lea.vmem %s7378_s12, %s6512_s27  ;;  %609 = sbr.rel (%p5288_p4) target bundleno = 33 (0x21), region = 76 }
  0x1f   : > { %v610_v0 = vld [vmem:[%s7391_s24] sm:$0xff]  ;;  %vm612_vm0 = vcmask 523264   ;;  %v611_v1 = vld [vmem:[%s7391_s24 + $0x8] sm:$0xff] }
  0x20   : > { %613 = vst.msk [vmem:[#allocation2] sm:$0xff] %vm612_vm0, %v610_v0  ;;  %614 = vst.msk [vmem:[#allocation2 + $0x8] sm:$0xff] %vm612_vm0, %v611_v1 }
  0x21 PF: > { %v6157_v2 = vld [vmem:[%s6525_s19 + $0x38] sm:$0xff]   ;;  %v6411_v3 = vmov 0.0   ;;  %v6159_v5 = vld [vmem:[%s6525_s19 + $0x30] sm:$0xff]   ;;  %vm6412_vm1 = vmmov 0   ;;  %v6161_v7 = vld [vmem:[%s6525_s19 + $0x28] sm:$0xff]   ;;  %vm657_vm2 = vcmask 523264  }
  0x22   : > { %5859 = vmatprep.subr.bf16.mxu1 %v6411_v3  ;;  %5847 = vmatprep.subr.bf16.mxu0 %v6411_v3  ;;  %v6158_v4 = vld [vmem:[%s6525_s19 + $0x18] sm:$0xff]   ;;  %v6160_v6 = vld [vmem:[%s6525_s19 + $0x10] sm:$0xff]   ;;  %v6162_v8 = vld [vmem:[%s6525_s19 + $0x8] sm:$0xff]   ;;  %vm886_vm3 = vcmask 64512   ;;  %s6413_s2 = smov 120   ;;  %vm1006_vm4 = vcmask 1043456  }
  0x23   : > { %5860 = vmatpush3.bf16.msra.mxu1 %v6157_v2  ;;  %5867 = vmatprep.mubr.msk.bf16.mxu1 %vm6412_vm1, %v6411_v3  ;;  %v6163_v9 = vld [vmem:[%s6525_s19 + $0x20] sm:$0xff]   ;;  %v6165_v36 = vld [vmem:[%s6525_s19 + $0x58] sm:$0xff]   ;;  %v6166_v37 = vld [vmem:[%s6525_s19 + $0x50] sm:$0xff]   ;;  %s6416_s14 = smov 96   ;;  %s6417_s29 = smov 88   ;;  %vm2694_vm5 = vcmask 130048  }
  0x24   : > { %5848 = vmatpush3.bf16.msra.mxu0 %v6158_v4  ;;  %5861 = vmatprep.subr.bf16.mxu1 %v6411_v3  ;;  %v6164_v12 = vld [vmem:[%s6525_s19] sm:$0xff]   ;;  %v6167_v38 = vld [vmem:[%s6525_s19 + $0x48] sm:$0xff]   ;;  %s6418_s15 = smov 80   ;;  %s6419_s28 = smov 72   ;;  %vm2697_vm6 = vcmask 195584   ;;  %vm2700_vm7 = vcmask 261120  }
  0x25   : > { %5849 = vmatprep.subr.bf16.mxu0 %v6411_v3  ;;  %5855 = vmatprep.mubr.msk.bf16.mxu0 %vm6412_vm1, %v6411_v3  ;;  %v5304_v14 = vld [vmem:[%s6534_s25 + $0x1] ss:$0 sm:$0xff]  ;;  %v5289_v15 = vld [vmem:[%s6534_s25] ss:$0 sm:$0xff]  ;;  %v5319_v58 = vld [vmem:[%s6534_s25 + $0x2] ss:$0 sm:$0xff] }
  0x26   : > { %v6168_v39 = vld [vmem:[%s6525_s19 + $0x40] sm:$0xff]   ;;  %s6414_s25 = smov 112   ;;  %s6415_s19 = smov 104   ;;  %vm2703_vm8 = vcmask 326656   ;;  %vm2706_vm9 = vcmask 392192   ;;  %vm2709_vm10 = vcmask 457728  }
  0x27   : > { %5862 = vmatpush3.bf16.msra.mxu1 %v6159_v5  ;;  %v615_v10 = vld [vmem:[#allocation2] sm:$0xff]  ;;  %v616_v11 = vld [vmem:[#allocation2 + $0x8] sm:$0xff]  ;;  %s6420_s18 = smov 8   ;;  %s6421_s20 = smov 16  }
  0x28   : > { %5850 = vmatpush3.bf16.msra.mxu0 %v6160_v6  ;;  %5863 = vmatprep.subr.bf16.mxu1 %v6411_v3  ;;  %v617_v13 = vpack.c.bf16 %v616_v11, %v615_v10  ;;  %s6422_s21 = smov 32   ;;  %s6423_s23 = smov 48  }
  0x29   : > { %5851 = vmatprep.subr.bf16.mxu0 %v6411_v3  ;;  %s6424_s0 = smov 24   ;;  %p6093_p5 = scmp.eq.s32.totalorder %s6506_s26, 4 }
  0x2b   : > { %5864 = vmatpush3.bf16.msra.mxu1 %v6161_v7 }
  0x2c   : > { %5852 = vmatpush3.bf16.msra.mxu0 %v6162_v8  ;;  %5865 = vmatprep.subr.bf16.mxu1 %v6411_v3 }
  0x2d   : > { %5853 = vmatprep.subr.bf16.mxu0 %v6411_v3 }
  0x2f   : > { %5866 = vmatpush3.bf16.msra.mxu1 %v6163_v9 }
  0x30   : > { %5854 = vmatpush3.bf16.msra.mxu0 %v6164_v12  ;;  %5883 = vmatprep.subr.bf16.mxu1 %v6411_v3 }
  0x31   : > { %5871 = vmatprep.subr.bf16.mxu0 %v6411_v3 }
  0x32   : > { %5868 = vmatmul.mubr.msk.bf16.vlgmr.msra.gmra.mxu1 %vm657_vm2, %v617_v13 }
  0x33   : > { %5856 = vmatmul.mubr.msk.bf16.vlgmr.msra.gmra.mxu0 %vm657_vm2, %v617_v13  ;;  %5885 = vmatprep.mubr.msk.bf16.mxu1 %vm6412_vm1, %v6411_v3 }
  0x34   : > { %5879 = vmatprep.mubr.msk.bf16.mxu0 %vm6412_vm1, %v6411_v3  ;;  %5872 = vmatpush3.bf16.msra.mxu0 %v6165_v36 }
  0x35   : > { %5873 = vmatprep.subr.bf16.mxu0 %v6411_v3 }
  0x38   : > { %5874 = vmatpush3.bf16.msra.mxu0 %v6166_v37 }
  0x39   : > { %5875 = vmatprep.subr.bf16.mxu0 %v6411_v3 }
  0x3c   : > { %5876 = vmatpush3.bf16.msra.mxu0 %v6167_v38 }
  0x3d   : > { %5877 = vmatprep.subr.bf16.mxu0 %v6411_v3 }
  0x40   : > { %5878 = vmatpush3.bf16.msra.mxu0 %v6168_v39 }
  0x41   : > { %5907 = vmatprep.subr.bf16.mxu0 %v6411_v3 }
  0x43   : > { %5880 = vmatmul.mubr.msk.bf16.vlgmr.msra.gmra.mxu0 %vm657_vm2, %v617_v13 }
  0x44   : > { %5909 = vmatprep.mubr.msk.bf16.mxu0 %vm6412_vm1, %v6411_v3 }
  0xf2   : > { %v777_v16 = vpop.f32.mrf.mxu1 }
  0xf3   : > { %v778_v17 = vadd.f32 %v5304_v14, %v777_v16  ;;  %v695_v18 = vpop.f32.mrf.mxu0 }
  0xf4   : > { %v696_v19 = vadd.f32 %v5289_v15, %v695_v18  ;;  %v5869_v20 = vpop.f32.mrf.mxu1 }
  0xf5   : > { %v6611_v21 = vpack.c.bf16 %v778_v17, %v778_v17  ;;  %v5857_v22 = vpop.f32.mrf.mxu0 }
  0xf6   : > { %v780_v23 = vpop.f32.mrf.mxu1  ;;  %v866_v24 = vmul.f32 0.35355338, %v696_v19 }
  0xf7   : > { %v781_v25 = vadd.f32 %v5304_v14, %v780_v23  ;;  %v698_v26 = vpop.f32.mrf.mxu0  ;;  %v891_v27 = vsel %vm886_vm3, %v6611_v21, 0 }
  0xf8   : > { %v5870_v28 = vpop.f32.mrf.mxu1  ;;  %5884 = vmatpush3.bf16.xpose.msra.mxu1 %v891_v27  ;;  %v6616_v30 = vpack.c.bf16 %v866_v24, %v866_v24  ;;  %v699_v32 = vadd.f32 %v5289_v15, %v698_v26 }
  0xf9   : > { %v5858_v29 = vpop.f32.mrf.mxu0  ;;  %5889 = vmatprep.subr.bf16.mxu1 %v6411_v3  ;;  %v6618_v31 = vpack.c.bf16 %v781_v25, %v781_v25 }
  0xfa   : > { %v867_v34 = vmul.f32 0.35355338, %v699_v32 }
  0xfb   : > { %v937_v33 = vsel %vm886_vm3, %v6618_v31, 0 }
  0xfc   : > { %v6627_v35 = vpack.c.bf16 %v867_v34, %v867_v34 }
  0xff   : > { %5886 = vmatmul.mubr.msk.bf16.vlgmr.msra.gmra.mxu1 %vm886_vm3, %v6616_v30 }
 0x100   : > { %5890 = vmatpush3.bf16.xpose.msra.mxu1 %v937_v33  ;;  %5891 = vmatprep.mubr.msk.bf16.mxu1 %vm6412_vm1, %v6411_v3 }
 0x101   : > { %5895 = vmatprep.subr.bf16.mxu1 %v6411_v3 }
 0x103   : > { %v859_v59 = vpop.f32.mrf.mxu0 }
 0x104   : > { %v860_v60 = vadd.f32 %v5319_v58, %v859_v59 }
 0x105   : > { %v5881_v61 = vpop.f32.mrf.mxu0 }
 0x106   : > { %v6654_v62 = vpack.c.bf16 %v860_v60, %v860_v60 }
 0x107   : > { %5892 = vmatmul.mubr.msk.bf16.vlgmr.msra.gmra.mxu1 %vm886_vm3, %v6627_v35  ;;  %v862_v1 = vpop.f32.mrf.mxu0 }
 0x108   : > { %5897 = vmatprep.mubr.msk.bf16.mxu1 %vm6412_vm1, %v6411_v3  ;;  %v1008_v63 = vsel %vm1006_vm4, %v6654_v62, 0  ;;  %v863_v2 = vadd.f32 %v5319_v58, %v862_v1 }
 0x109   : > { %5896 = vmatpush3.bf16.msra.mxu1 %v1008_v63  ;;  %v5882_v4 = vpop.f32.mrf.mxu0 }
 0x10a   : > { %5901 = vmatprep.subr.bf16.mxu1 %v6411_v3  ;;  %v6664_v9 = vpack.c.bf16 %v863_v2, %v863_v2 }
 0x10c   : > { %v1054_v13 = vsel %vm1006_vm4, %v6664_v9, 0 }
 0x1bf   : > { %v927_v40 = vpop.f32.mrf.mxu1 }
 0x1c0   : > { %v979_v41 = vsel %vm886_vm3, %v927_v40, -inf }
 0x1c1   : > { %980 = vmax.xlane.f32.xlu0 %v979_v41  ;;  %v5887_v42 = vpop.f32.mrf.mxu1 }
 0x1c3   : > { %v930_v43 = vpop.f32.mrf.mxu1 }
 0x1c5   : > { %v5888_v44 = vpop.f32.mrf.mxu1 }
 0x1c7   : > { %v973_v45 = vpop.f32.mrf.mxu1 }
 0x1c8   : > { %v982_v46 = vsel %vm886_vm3, %v973_v45, -inf }
 0x1c9   : > { %983 = vmax.xlane.f32.xlu0 %v982_v46  ;;  %v5893_v47 = vpop.f32.mrf.mxu1 }
 0x1cb   : > { %v976_v48 = vpop.f32.mrf.mxu1 }
 0x1cd   : > { %v5894_v49 = vpop.f32.mrf.mxu1 }
 0x1df   : > { %1098 = vrot.lane.b32.xlu0 %v6611_v21, %s6413_s2 }
 0x24a   : > { %v981_v50 = vpop.xlane.xlu0 %980 }
 0x24b   : > { %v985_v51 = vsub.f32 %v927_v40, %v981_v50 }
 0x24d   : > { %v987_v52 = vmul.f32 1.442695, %v985_v51 }
 0x24f   : > { %6301 = vpow2.f32 %v987_v52 }
 0x252   : > { %v984_v53 = vpop.xlane.xlu0 %983 }
 0x253   : > { %v986_v0 = vsub.f32 %v973_v45, %v984_v53 }
 0x255   : > { %v989_v5 = vmul.f32 1.442695, %v986_v0 }
 0x256   : > { %v1099_v54 = vpop.permute.xlu0 %1098 }
 0x257   : > { %v1104_v55 = vsel %vm886_vm3, %v1099_v54, 0  ;;  %6303 = vpow2.f32 %v989_v5 }
 0x258   : > { %5908 = vmatpush3.bf16.xpose.msra.mxu0 %v1104_v55 }
 0x259   : > { %5919 = vmatprep.subr.bf16.mxu0 %v6411_v3 }
 0x25c   : > { %v6302_v56 = vpop.eup %6301 }
 0x25d   : > { %v991_v57 = vsel %vm886_vm3, %v6302_v56, 0.0 }
 0x25e   : > { %992 = vadd.xlane.f32.xlu1 %v991_v57 }
 0x264   : > { %v6304_v6 = vpop.eup %6303 }
 0x265   : > { %v994_v7 = vsel %vm886_vm3, %v6304_v6, 0.0 }
 0x26f   : > { %1148 = vrot.lane.b32.xlu1 %v6618_v31, %s6413_s2 }
 0x293   : > { %995 = vadd.xlane.f32.xlu1 %v994_v7 }
 0x2a4   : > { %1096 = vrot.lane.b32.xlu1 %v6616_v30, %s6413_s2 }
 0x2a8   : > { %1146 = vrot.lane.b32.xlu1 %v6627_v35, %s6413_s2 }
 0x2e7   : > { %v993_v8 = vpop.xlane.xlu1 %992 }
 0x2e8   : > { %6305 = vrcp.f32 %v993_v8 }
 0x2eb   : > { %v1149_v14 = vpop.permute.xlu1 %1148 }
 0x2ec   : > { %v1154_v20 = vsel %vm886_vm3, %v1149_v14, 0 }
 0x2f5   : > { %v6306_v10 = vpop.eup %6305 }
 0x2f6   : > { %v999_v11 = vmul.f32 %v6306_v10, %v6302_v56 }
 0x2f8   : > { %v1001_v12 = vpack.c.bf16 %v999_v11, %v999_v11 }
 0x2fa   : > { %5898 = vmatmul.mubr.msk.bf16.vlgmr.msra.gmra.mxu1 %vm886_vm3, %v1001_v12 }
 0x2fb   : > { %5902 = vmatpush3.bf16.msra.mxu1 %v1054_v13  ;;  %5903 = vmatprep.mubr.msk.bf16.mxu1 %vm6412_vm1, %v6411_v3 }
 0x2fc   : > { %5913 = vmatprep.subr.bf16.mxu1 %v6411_v3 }
 0x31c   : > { %v996_v15 = vpop.xlane.xlu1 %995 }
 0x31d   : > { %6307 = vrcp.f32 %v996_v15 }
 0x320   : > { %v1097_v16 = vpop.permute.xlu1 %1096 }
 0x321   : > { %5910 = vmatmul.mubr.msk.bf16.vlgmr.msra.gmra.mxu0 %vm886_vm3, %v1097_v16 }
 0x322   : > { %5921 = vmatprep.mubr.msk.bf16.mxu0 %vm6412_vm1, %v6411_v3 }
 0x324   : > { %v1147_v22 = vpop.permute.xlu1 %1146 }
 0x32a   : > { %v6308_v17 = vpop.eup %6307 }
 0x32b   : > { %v1000_v18 = vmul.f32 %v6308_v17, %v6304_v6 }
 0x32d   : > { %v1002_v19 = vpack.c.bf16 %v1000_v18, %v1000_v18 }
 0x32f   : > { %5904 = vmatmul.mubr.msk.bf16.vlgmr.msra.gmra.mxu1 %vm886_vm3, %v1002_v19 }
 0x330   : > { %5914 = vmatpush3.bf16.xpose.msra.mxu1 %v1154_v20  ;;  %5915 = vmatprep.mubr.msk.bf16.mxu1 %vm6412_vm1, %v6411_v3 }
 0x331   : > { %5925 = vmatprep.subr.bf16.mxu1 %v6411_v3 }
 0x337   : > { %5916 = vmatmul.mubr.msk.bf16.vlgmr.msra.gmra.mxu1 %vm886_vm3, %v1147_v22 }
 0x338   : > { %5927 = vmatprep.mubr.msk.bf16.mxu1 %vm6412_vm1, %v6411_v3 }
 0x3ba   : > { %v6683_v23 = vpop.f32.mrf.mxu1 }
 0x3bc   : > { %v5899_v24 = vpop.f32.mrf.mxu1 }
 0x3be   : > { %v1047_v25 = vpop.f32.mrf.mxu1 }
 0x3c0   : > { %v5900_v26 = vpop.f32.mrf.mxu1 }
 0x3e1   : > { %v1140_v27 = vpop.f32.mrf.mxu0 }
 0x3e2   : > { %v1196_v28 = vsel %vm886_vm3, %v1140_v27, -inf }
 0x3e3   : > { %1197 = vmax.xlane.f32.xlu0 %v1196_v28  ;;  %v5911_v29 = vpop.f32.mrf.mxu0 }
 0x3e5   : > { %v1143_v32 = vpop.f32.mrf.mxu0 }
 0x3e7   : > { %v5912_v33 = vpop.f32.mrf.mxu0 }
 0x3ef   : > { %v6686_v34 = vpop.f32.mrf.mxu1 }
 0x3f1   : > { %v5905_v36 = vpop.f32.mrf.mxu1 }
 0x3f3   : > { %v1093_v37 = vpop.f32.mrf.mxu1 }
 0x3f5   : > { %v5906_v38 = vpop.f32.mrf.mxu1 }
 0x3f7   : > { %v1190_v39 = vpop.f32.mrf.mxu1 }
 0x3f8   : > { %v1199_v40 = vsel %vm886_vm3, %v1190_v39, -inf }
 0x3f9   : > { %1200 = vmax.xlane.f32.xlu1 %v1199_v40  ;;  %v5917_v41 = vpop.f32.mrf.mxu1 }
 0x3fb   : > { %v1193_v42 = vpop.f32.mrf.mxu1 }
 0x3fd   : > { %v5918_v43 = vpop.f32.mrf.mxu1 }
 0x40a   : > { %1268 = vrot.lane.b32.xlu1 %v6664_v9, %s6413_s2 }
 0x40e   : > { %1318 = vrot.lane.b32.xlu1 %v6611_v21, %s6414_s25 }
 0x412   : > { %1368 = vrot.lane.b32.xlu1 %v6618_v31, %s6414_s25 }
 0x416   : > { %1366 = vrot.lane.b32.xlu1 %v6627_v35, %s6414_s25 }
 0x46c   : > { %v1198_v44 = vpop.xlane.xlu0 %1197 }
 0x46d   : > { %v1202_v45 = vsub.f32 %v1140_v27, %v1198_v44 }
 0x46f   : > { %v1204_v46 = vmul.f32 1.442695, %v1202_v45 }
 0x471   : > { %6309 = vpow2.f32 %v1204_v46 }
 0x47e   : > { %v6310_v47 = vpop.eup %6309 }
 0x47f   : > { %v1208_v48 = vsel %vm886_vm3, %v6310_v47, 0.0 }
 0x480   : > { %1209 = vadd.xlane.f32.xlu0 %v1208_v48 }
 0x482   : > { %v1201_v49 = vpop.xlane.xlu1 %1200 }
 0x483   : > { %v1203_v50 = vsub.f32 %v1190_v39, %v1201_v49 }
 0x485   : > { %v1206_v51 = vmul.f32 1.442695, %v1203_v50 }
 0x486   : > { %v1269_v52 = vpop.permute.xlu1 %1268 }
 0x487   : > { %6311 = vpow2.f32 %v1206_v51  ;;  %v1274_v53 = vsel %vm1006_vm4, %v1269_v52, 0 }
 0x488   : > { %5926 = vmatpush3.bf16.msra.mxu1 %v1274_v53 }
 0x489   : > { %5937 = vmatprep.subr.bf16.mxu1 %v6411_v3 }
 0x48a   : > { %v1319_v63 = vpop.permute.xlu1 %1318 }
 0x48b   : > { %v1324_v1 = vsel %vm886_vm3, %v1319_v63, 0 }
 0x48e   : > { %v1369_v5 = vpop.permute.xlu1 %1368 }
 0x48f   : > { %v1374_v8 = vsel %vm886_vm3, %v1369_v5, 0 }
 0x492   : > { %v1367_v10 = vpop.permute.xlu1 %1366 }
 0x494   : > { %v6312_v54 = vpop.eup %6311 }
 0x495   : > { %v1211_v55 = vsel %vm886_vm3, %v6312_v54, 0.0 }
 0x496   : > { %1212 = vadd.xlane.f32.xlu0 %v1211_v55 }
 0x4ac   : > { %1220 = vrot.lane.b32.xlu0 %v6654_v62, %s6413_s2  ;;  %s6425_s2 = smov 40  }
 0x4b0   : > { %1316 = vrot.lane.b32.xlu0 %v6616_v30, %s6414_s25 }
 0x509   : > { %v1210_v56 = vpop.xlane.xlu0 %1209 }
 0x50a   : > { %6313 = vrcp.f32 %v1210_v56 }
 0x517   : > { %v6314_v57 = vpop.eup %6313 }
 0x518   : > { %v1216_v59 = vmul.f32 %v6314_v57, %v6310_v47 }
 0x51a   : > { %v1218_v0 = vpack.c.bf16 %v1216_v59, %v1216_v59 }
 0x51f   : > { %v1213_v58 = vpop.xlane.xlu0 %1212 }
 0x520   : > { %6315 = vrcp.f32 %v1213_v58 }
 0x523   : > { %v1221_v60 = vpop.permute.xlu0 %1220 }
 0x524   : > { %v1226_v61 = vsel %vm1006_vm4, %v1221_v60, 0 }
 0x525   : > { %5920 = vmatpush3.bf16.msra.mxu0 %v1226_v61 }
 0x526   : > { %5931 = vmatprep.subr.bf16.mxu0 %v6411_v3 }
 0x527   : > { %v1317_v6 = vpop.permute.xlu0 %1316 }
 0x528   : > { %5922 = vmatmul.mubr.msk.bf16.vlgmr.msra.gmra.mxu0 %vm886_vm3, %v1218_v0 }
 0x529   : > { %5932 = vmatpush3.bf16.xpose.msra.mxu0 %v1324_v1  ;;  %5933 = vmatprep.mubr.msk.bf16.mxu0 %vm6412_vm1, %v6411_v3 }
 0x52a   : > { %5943 = vmatprep.subr.bf16.mxu0 %v6411_v3 }
 0x52d   : > { %v6316_v2 = vpop.eup %6315 }
 0x52e   : > { %v1217_v4 = vmul.f32 %v6316_v2, %v6312_v54 }
 0x530   : > { %5934 = vmatmul.mubr.msk.bf16.vlgmr.msra.gmra.mxu0 %vm886_vm3, %v1317_v6  ;;  %v1219_v7 = vpack.c.bf16 %v1217_v4, %v1217_v4 }
 0x531   : > { %5945 = vmatprep.mubr.msk.bf16.mxu0 %vm6412_vm1, %v6411_v3 }
 0x532   : > { %5928 = vmatmul.mubr.msk.bf16.vlgmr.msra.gmra.mxu1 %vm886_vm3, %v1219_v7 }
 0x533   : > { %5938 = vmatpush3.bf16.xpose.msra.mxu1 %v1374_v8  ;;  %5939 = vmatprep.mubr.msk.bf16.mxu1 %vm6412_vm1, %v6411_v3 }
 0x534   : > { %5949 = vmatprep.subr.bf16.mxu1 %v6411_v3 }
 0x53a   : > { %5940 = vmatmul.mubr.msk.bf16.vlgmr.msra.gmra.mxu1 %vm886_vm3, %v1367_v10 }
 0x53b   : > { %5951 = vmatprep.mubr.msk.bf16.mxu1 %vm6412_vm1, %v6411_v3 }
 0x5e8   : > { %v6723_v11 = vpop.f32.mrf.mxu0 }
 0x5ea   : > { %v5923_v12 = vpop.f32.mrf.mxu0 }
 0x5ec   : > { %v1265_v13 = vpop.f32.mrf.mxu0 }
 0x5ee   : > { %v5924_v14 = vpop.f32.mrf.mxu0 }
 0x5f0   : > { %v1360_v15 = vpop.f32.mrf.mxu0 }
 0x5f1   : > { %v1416_v16 = vsel %vm886_vm3, %v1360_v15, -inf }
 0x5f2   : > { %v6726_v17 = vpop.f32.mrf.mxu1  ;;  %1417 = vmax.xlane.f32.xlu0 %v1416_v16  ;;  %v5935_v18 = vpop.f32.mrf.mxu0 }
 0x5f3   : > { %v6122_v19 = vpack.i.bf16 %v6726_v17, %v6723_v11 }
 0x5f4   : > { %v5929_v20 = vpop.f32.mrf.mxu1  ;;  %v1363_v22 = vpop.f32.mrf.mxu0 }
 0x5f6   : > { %v1313_v24 = vpop.f32.mrf.mxu1  ;;  %v5936_v25 = vpop.f32.mrf.mxu0 }
 0x5f8   : > { %v5930_v26 = vpop.f32.mrf.mxu1 }
 0x5fa   : > { %v1410_v27 = vpop.f32.mrf.mxu1 }
 0x5fb   : > { %v1419_v28 = vsel %vm886_vm3, %v1410_v27, -inf }
 0x5fc   : > { %1420 = vmax.xlane.f32.xlu1 %v1419_v28  ;;  %v5941_v29 = vpop.f32.mrf.mxu1 }
 0x5fe   : > { %v1413_v32 = vpop.f32.mrf.mxu1 }
 0x600   : > { %v5942_v33 = vpop.f32.mrf.mxu1 }
 0x60d   : > { %1488 = vrot.lane.b32.xlu1 %v6664_v9, %s6414_s25 }
 0x611   : > { %1538 = vrot.lane.b32.xlu1 %v6611_v21, %s6415_s19 }
 0x615   : > { %1588 = vrot.lane.b32.xlu1 %v6618_v31, %s6415_s19 }
 0x619   : > { %1586 = vrot.lane.b32.xlu1 %v6627_v35, %s6415_s19 }
 0x67b   : > { %v1418_v36 = vpop.xlane.xlu0 %1417 }
 0x67c   : > { %v1422_v37 = vsub.f32 %v1360_v15, %v1418_v36 }
 0x67e   : > { %v1424_v38 = vmul.f32 1.442695, %v1422_v37 }
 0x680   : > { %6317 = vpow2.f32 %v1424_v38 }
 0x685   : > { %v1421_v39 = vpop.xlane.xlu1 %1420 }
 0x686   : > { %v1423_v40 = vsub.f32 %v1410_v27, %v1421_v39 }
 0x688   : > { %v1426_v41 = vmul.f32 1.442695, %v1423_v40 }
 0x689   : > { %v1489_v42 = vpop.permute.xlu1 %1488 }
 0x68a   : > { %6319 = vpow2.f32 %v1426_v41  ;;  %v1494_v43 = vsel %vm1006_vm4, %v1489_v42, 0 }
 0x68b   : > { %5950 = vmatpush3.bf16.msra.mxu1 %v1494_v43 }
 0x68c   : > { %5961 = vmatprep.subr.bf16.mxu1 %v6411_v3 }
 0x68d   : > { %v6318_v44 = vpop.eup %6317  ;;  %v1539_v54 = vpop.permute.xlu1 %1538 }
 0x68e   : > { %v1428_v45 = vsel %vm886_vm3, %v6318_v44, 0.0  ;;  %v1544_v56 = vsel %vm886_vm3, %v1539_v54, 0 }
 0x68f   : > { %1429 = vadd.xlane.f32.xlu0 %v1428_v45 }
 0x691   : > { %v1589_v59 = vpop.permute.xlu1 %1588 }
 0x692   : > { %v1594_v63 = vsel %vm886_vm3, %v1589_v59, 0 }
 0x695   : > { %v1587_v0 = vpop.permute.xlu1 %1586 }
 0x697   : > { %v6320_v46 = vpop.eup %6319 }
 0x698   : > { %v1431_v47 = vsel %vm886_vm3, %v6320_v46, 0.0 }
 0x699   : > { %1432 = vadd.xlane.f32.xlu0 %v1431_v47 }
 0x6af   : > { %1440 = vrot.lane.b32.xlu0 %v6654_v62, %s6414_s25  ;;  %s6426_s25 = smov 56  }
 0x6b3   : > { %1536 = vrot.lane.b32.xlu0 %v6616_v30, %s6415_s19 }
 0x718   : > { %v1430_v48 = vpop.xlane.xlu0 %1429 }
 0x719   : > { %6321 = vrcp.f32 %v1430_v48 }
 0x722   : > { %v1433_v49 = vpop.xlane.xlu0 %1432 }
 0x723   : > { %6323 = vrcp.f32 %v1433_v49 }
 0x726   : > { %v6322_v50 = vpop.eup %6321  ;;  %v1441_v51 = vpop.permute.xlu0 %1440 }
 0x727   : > { %v1446_v52 = vsel %vm1006_vm4, %v1441_v51, 0  ;;  %v1436_v53 = vmul.f32 %v6322_v50, %v6318_v44 }
 0x728   : > { %5944 = vmatpush3.bf16.msra.mxu0 %v1446_v52 }
 0x729   : > { %v1438_v55 = vpack.c.bf16 %v1436_v53, %v1436_v53  ;;  %5955 = vmatprep.subr.bf16.mxu0 %v6411_v3 }
 0x72a   : > { %v1537_v60 = vpop.permute.xlu0 %1536 }
 0x72b   : > { %5946 = vmatmul.mubr.msk.bf16.vlgmr.msra.gmra.mxu0 %vm886_vm3, %v1438_v55 }
 0x72c   : > { %5956 = vmatpush3.bf16.xpose.msra.mxu0 %v1544_v56  ;;  %5957 = vmatprep.mubr.msk.bf16.mxu0 %vm6412_vm1, %v6411_v3 }
 0x72d   : > { %5967 = vmatprep.subr.bf16.mxu0 %v6411_v3 }
 0x730   : > { %v6324_v57 = vpop.eup %6323 }
 0x731   : > { %v1437_v58 = vmul.f32 %v6324_v57, %v6320_v46 }
 0x733   : > { %5958 = vmatmul.mubr.msk.bf16.vlgmr.msra.gmra.mxu0 %vm886_vm3, %v1537_v60  ;;  %v1439_v61 = vpack.c.bf16 %v1437_v58, %v1437_v58 }
 0x734   : > { %5969 = vmatprep.mubr.msk.bf16.mxu0 %vm6412_vm1, %v6411_v3 }
 0x735   : > { %5952 = vmatmul.mubr.msk.bf16.vlgmr.msra.gmra.mxu1 %vm886_vm3, %v1439_v61 }
 0x736   : > { %5962 = vmatpush3.bf16.xpose.msra.mxu1 %v1594_v63  ;;  %5963 = vmatprep.mubr.msk.bf16.mxu1 %vm6412_vm1, %v6411_v3 }
 0x737   : > { %5973 = vmatprep.subr.bf16.mxu1 %v6411_v3 }
 0x73d   : > { %5964 = vmatmul.mubr.msk.bf16.vlgmr.msra.gmra.mxu1 %vm886_vm3, %v1587_v0 }
 0x73e   : > { %5975 = vmatprep.mubr.msk.bf16.mxu1 %vm6412_vm1, %v6411_v3 }
 0x7eb   : > { %v6765_v1 = vpop.f32.mrf.mxu0 }
 0x7ed   : > { %v5947_v2 = vpop.f32.mrf.mxu0 }
 0x7ef   : > { %v1485_v4 = vpop.f32.mrf.mxu0 }
 0x7f1   : > { %v5948_v5 = vpop.f32.mrf.mxu0 }
 0x7f3   : > { %v1580_v6 = vpop.f32.mrf.mxu0 }
 0x7f4   : > { %v1636_v7 = vsel %vm886_vm3, %v1580_v6, -inf }
 0x7f5   : > { %v6768_v8 = vpop.f32.mrf.mxu1  ;;  %1637 = vmax.xlane.f32.xlu0 %v1636_v7  ;;  %v5959_v10 = vpop.f32.mrf.mxu0 }
 0x7f6   : > { %v6127_v12 = vpack.i.bf16 %v6768_v8, %v6765_v1 }
 0x7f7   : > { %v5953_v13 = vpop.f32.mrf.mxu1  ;;  %v1583_v14 = vpop.f32.mrf.mxu0 }
 0x7f9   : > { %v1533_v15 = vpop.f32.mrf.mxu1  ;;  %v5960_v16 = vpop.f32.mrf.mxu0 }
 0x7fb   : > { %v5954_v18 = vpop.f32.mrf.mxu1 }
 0x7fd   : > { %v1630_v20 = vpop.f32.mrf.mxu1 }
 0x7fe   : > { %v1639_v22 = vsel %vm886_vm3, %v1630_v20, -inf }
 0x7ff   : > { %1640 = vmax.xlane.f32.xlu1 %v1639_v22  ;;  %v5965_v24 = vpop.f32.mrf.mxu1 }
 0x801   : > { %v1633_v25 = vpop.f32.mrf.mxu1 }
 0x803   : > { %v5966_v26 = vpop.f32.mrf.mxu1 }
 0x810   : > { %1708 = vrot.lane.b32.xlu1 %v6664_v9, %s6415_s19 }
 0x814   : > { %1758 = vrot.lane.b32.xlu1 %v6611_v21, %s6416_s14 }
 0x818   : > { %1808 = vrot.lane.b32.xlu1 %v6618_v31, %s6416_s14 }
 0x81c   : > { %1806 = vrot.lane.b32.xlu1 %v6627_v35, %s6416_s14 }
 0x87e   : > { %v1638_v27 = vpop.xlane.xlu0 %1637 }
 0x87f   : > { %v1642_v28 = vsub.f32 %v1580_v6, %v1638_v27 }
 0x881   : > { %v1644_v29 = vmul.f32 1.442695, %v1642_v28 }
 0x883   : > { %6325 = vpow2.f32 %v1644_v29 }
 0x888   : > { %v1641_v32 = vpop.xlane.xlu1 %1640 }
 0x889   : > { %v1643_v33 = vsub.f32 %v1630_v20, %v1641_v32 }
 0x88b   : > { %v1646_v36 = vmul.f32 1.442695, %v1643_v33 }
 0x88c   : > { %v1709_v37 = vpop.permute.xlu1 %1708 }
 0x88d   : > { %6327 = vpow2.f32 %v1646_v36  ;;  %v1714_v38 = vsel %vm1006_vm4, %v1709_v37, 0 }
 0x88e   : > { %5974 = vmatpush3.bf16.msra.mxu1 %v1714_v38 }
 0x88f   : > { %5985 = vmatprep.subr.bf16.mxu1 %v6411_v3 }
 0x890   : > { %v6326_v39 = vpop.eup %6325  ;;  %v1759_v49 = vpop.permute.xlu1 %1758 }
 0x891   : > { %v1648_v40 = vsel %vm886_vm3, %v6326_v39, 0.0  ;;  %v1764_v51 = vsel %vm886_vm3, %v1759_v49, 0 }
 0x892   : > { %1649 = vadd.xlane.f32.xlu0 %v1648_v40 }
 0x894   : > { %v1809_v54 = vpop.permute.xlu1 %1808 }
 0x895   : > { %v1814_v57 = vsel %vm886_vm3, %v1809_v54, 0 }
 0x898   : > { %v1807_v58 = vpop.permute.xlu1 %1806 }
 0x89a   : > { %v6328_v41 = vpop.eup %6327 }
 0x89b   : > { %v1651_v42 = vsel %vm886_vm3, %v6328_v41, 0.0 }
 0x89c   : > { %1652 = vadd.xlane.f32.xlu0 %v1651_v42 }
 0x8b2   : > { %1660 = vrot.lane.b32.xlu0 %v6654_v62, %s6415_s19 }
 0x8b6   : > { %1756 = vrot.lane.b32.xlu0 %v6616_v30, %s6416_s14 }
 0x91b   : > { %v1650_v43 = vpop.xlane.xlu0 %1649 }
 0x91c   : > { %6329 = vrcp.f32 %v1650_v43 }
 0x925   : > { %v1653_v44 = vpop.xlane.xlu0 %1652 }
 0x926   : > { %6331 = vrcp.f32 %v1653_v44 }
 0x929   : > { %v6330_v45 = vpop.eup %6329  ;;  %v1661_v46 = vpop.permute.xlu0 %1660 }
 0x92a   : > { %v1666_v47 = vsel %vm1006_vm4, %v1661_v46, 0  ;;  %v1656_v48 = vmul.f32 %v6330_v45, %v6326_v39 }
 0x92b   : > { %5968 = vmatpush3.bf16.msra.mxu0 %v1666_v47 }
 0x92c   : > { %v1658_v50 = vpack.c.bf16 %v1656_v48, %v1656_v48  ;;  %5979 = vmatprep.subr.bf16.mxu0 %v6411_v3 }
 0x92d   : > { %v1757_v55 = vpop.permute.xlu0 %1756 }
 0x92e   : > { %5970 = vmatmul.mubr.msk.bf16.vlgmr.msra.gmra.mxu0 %vm886_vm3, %v1658_v50 }
 0x92f   : > { %5980 = vmatpush3.bf16.xpose.msra.mxu0 %v1764_v51  ;;  %5981 = vmatprep.mubr.msk.bf16.mxu0 %vm6412_vm1, %v6411_v3 }
 0x930   : > { %5991 = vmatprep.subr.bf16.mxu0 %v6411_v3 }
 0x933   : > { %v6332_v52 = vpop.eup %6331 }
 0x934   : > { %v1657_v53 = vmul.f32 %v6332_v52, %v6328_v41 }
 0x936   : > { %5982 = vmatmul.mubr.msk.bf16.vlgmr.msra.gmra.mxu0 %vm886_vm3, %v1757_v55  ;;  %v1659_v56 = vpack.c.bf16 %v1657_v53, %v1657_v53 }
 0x937   : > { %5993 = vmatprep.mubr.msk.bf16.mxu0 %vm6412_vm1, %v6411_v3 }
 0x938   : > { %5976 = vmatmul.mubr.msk.bf16.vlgmr.msra.gmra.mxu1 %vm886_vm3, %v1659_v56 }
 0x939   : > { %5986 = vmatpush3.bf16.xpose.msra.mxu1 %v1814_v57  ;;  %5987 = vmatprep.mubr.msk.bf16.mxu1 %vm6412_vm1, %v6411_v3 }
 0x93a   : > { %5997 = vmatprep.subr.bf16.mxu1 %v6411_v3 }
 0x940   : > { %5988 = vmatmul.mubr.msk.bf16.vlgmr.msra.gmra.mxu1 %vm886_vm3, %v1807_v58 }
 0x941   : > { %5999 = vmatprep.mubr.msk.bf16.mxu1 %vm6412_vm1, %v6411_v3 }
 0x9ee   : > { %v6807_v59 = vpop.f32.mrf.mxu0 }
 0x9f0   : > { %v5971_v60 = vpop.f32.mrf.mxu0 }
 0x9f2   : > { %v1705_v61 = vpop.f32.mrf.mxu0 }
 0x9f4   : > { %v5972_v63 = vpop.f32.mrf.mxu0 }
 0x9f6   : > { %v1800_v0 = vpop.f32.mrf.mxu0 }
 0x9f7   : > { %v1856_v2 = vsel %vm886_vm3, %v1800_v0, -inf }
 0x9f8   : > { %v6810_v4 = vpop.f32.mrf.mxu1  ;;  %1857 = vmax.xlane.f32.xlu0 %v1856_v2  ;;  %v5983_v5 = vpop.f32.mrf.mxu0 }
 0x9f9   : > { %v6132_v6 = vpack.i.bf16 %v6810_v4, %v6807_v59 }
 0x9fa   : > { %v5977_v7 = vpop.f32.mrf.mxu1  ;;  %v1803_v10 = vpop.f32.mrf.mxu0 }
 0x9fc   : > { %v1753_v13 = vpop.f32.mrf.mxu1  ;;  %v5984_v14 = vpop.f32.mrf.mxu0 }
 0x9fe   : > { %v5978_v15 = vpop.f32.mrf.mxu1 }
 0xa00   : > { %v1850_v16 = vpop.f32.mrf.mxu1 }
 0xa01   : > { %v1859_v18 = vsel %vm886_vm3, %v1850_v16, -inf }
 0xa02   : > { %1860 = vmax.xlane.f32.xlu1 %v1859_v18  ;;  %v5989_v20 = vpop.f32.mrf.mxu1 }
 0xa04   : > { %v1853_v22 = vpop.f32.mrf.mxu1 }
 0xa06   : > { %v5990_v24 = vpop.f32.mrf.mxu1 }
 0xa13   : > { %1928 = vrot.lane.b32.xlu1 %v6664_v9, %s6416_s14 }
 0xa17   : > { %1978 = vrot.lane.b32.xlu1 %v6611_v21, %s6417_s29 }
 0xa1b   : > { %2028 = vrot.lane.b32.xlu1 %v6618_v31, %s6417_s29 }
 0xa1f   : > { %2026 = vrot.lane.b32.xlu1 %v6627_v35, %s6417_s29 }
 0xa81   : > { %v1858_v25 = vpop.xlane.xlu0 %1857 }
 0xa82   : > { %v1862_v26 = vsub.f32 %v1800_v0, %v1858_v25 }
 0xa84   : > { %v1864_v27 = vmul.f32 1.442695, %v1862_v26 }
 0xa86   : > { %6333 = vpow2.f32 %v1864_v27 }
 0xa8b   : > { %v1861_v28 = vpop.xlane.xlu1 %1860 }
 0xa8c   : > { %v1863_v29 = vsub.f32 %v1850_v16, %v1861_v28 }
 0xa8e   : > { %v1866_v32 = vmul.f32 1.442695, %v1863_v29 }
 0xa8f   : > { %v1929_v33 = vpop.permute.xlu1 %1928 }
 0xa90   : > { %6335 = vpow2.f32 %v1866_v32  ;;  %v1934_v36 = vsel %vm1006_vm4, %v1929_v33, 0 }
 0xa91   : > { %5998 = vmatpush3.bf16.msra.mxu1 %v1934_v36 }
 0xa92   : > { %6009 = vmatprep.subr.bf16.mxu1 %v6411_v3 }
 0xa93   : > { %v6334_v37 = vpop.eup %6333  ;;  %v1979_v47 = vpop.permute.xlu1 %1978 }
 0xa94   : > { %v1868_v38 = vsel %vm886_vm3, %v6334_v37, 0.0  ;;  %v1984_v49 = vsel %vm886_vm3, %v1979_v47, 0 }
 0xa95   : > { %1869 = vadd.xlane.f32.xlu0 %v1868_v38 }
 0xa97   : > { %v2029_v52 = vpop.permute.xlu1 %2028 }
 0xa98   : > { %v2034_v55 = vsel %vm886_vm3, %v2029_v52, 0 }
 0xa9b   : > { %v2027_v56 = vpop.permute.xlu1 %2026 }
 0xa9d   : > { %v6336_v39 = vpop.eup %6335 }
 0xa9e   : > { %v1871_v40 = vsel %vm886_vm3, %v6336_v39, 0.0 }
 0xa9f   : > { %1872 = vadd.xlane.f32.xlu0 %v1871_v40 }
 0xab5   : > { %1880 = vrot.lane.b32.xlu0 %v6654_v62, %s6416_s14  ;;  %s7392_s14 = scalar_lea.vmem %s7370_s4, %s6512_s27 }
 0xab9   : > { %1976 = vrot.lane.b32.xlu0 %v6616_v30, %s6417_s29 }
 0xb1e   : > { %v1870_v41 = vpop.xlane.xlu0 %1869 }
 0xb1f   : > { %6337 = vrcp.f32 %v1870_v41 }
 0xb28   : > { %v1873_v42 = vpop.xlane.xlu0 %1872 }
 0xb29   : > { %6339 = vrcp.f32 %v1873_v42 }
 0xb2c   : > { %v6338_v43 = vpop.eup %6337  ;;  %v1881_v44 = vpop.permute.xlu0 %1880 }
 0xb2d   : > { %v1886_v45 = vsel %vm1006_vm4, %v1881_v44, 0  ;;  %v1876_v46 = vmul.f32 %v6338_v43, %v6334_v37 }
 0xb2e   : > { %5992 = vmatpush3.bf16.msra.mxu0 %v1886_v45 }
 0xb2f   : > { %v1878_v48 = vpack.c.bf16 %v1876_v46, %v1876_v46  ;;  %6003 = vmatprep.subr.bf16.mxu0 %v6411_v3 }
 0xb30   : > { %v1977_v53 = vpop.permute.xlu0 %1976 }
 0xb31   : > { %5994 = vmatmul.mubr.msk.bf16.vlgmr.msra.gmra.mxu0 %vm886_vm3, %v1878_v48 }
 0xb32   : > { %6004 = vmatpush3.bf16.xpose.msra.mxu0 %v1984_v49  ;;  %6005 = vmatprep.mubr.msk.bf16.mxu0 %vm6412_vm1, %v6411_v3 }
 0xb33   : > { %6015 = vmatprep.subr.bf16.mxu0 %v6411_v3 }
 0xb36   : > { %v6340_v50 = vpop.eup %6339 }
 0xb37   : > { %v1877_v51 = vmul.f32 %v6340_v50, %v6336_v39 }
 0xb39   : > { %6006 = vmatmul.mubr.msk.bf16.vlgmr.msra.gmra.mxu0 %vm886_vm3, %v1977_v53  ;;  %v1879_v54 = vpack.c.bf16 %v1877_v51, %v1877_v51 }
 0xb3a   : > { %6017 = vmatprep.mubr.msk.bf16.mxu0 %vm6412_vm1, %v6411_v3 }
 0xb3b   : > { %6000 = vmatmul.mubr.msk.bf16.vlgmr.msra.gmra.mxu1 %vm886_vm3, %v1879_v54 }
 0xb3c   : > { %6010 = vmatpush3.bf16.xpose.msra.mxu1 %v2034_v55  ;;  %6011 = vmatprep.mubr.msk.bf16.mxu1 %vm6412_vm1, %v6411_v3 }
 0xb3d   : > { %6021 = vmatprep.subr.bf16.mxu1 %v6411_v3 }
 0xb43   : > { %6012 = vmatmul.mubr.msk.bf16.vlgmr.msra.gmra.mxu1 %vm886_vm3, %v2027_v56 }
 0xb44   : > { %6023 = vmatprep.mubr.msk.bf16.mxu1 %vm6412_vm1, %v6411_v3 }
 0xbf1   : > { %v6849_v57 = vpop.f32.mrf.mxu0 }
 0xbf3   : > { %v5995_v58 = vpop.f32.mrf.mxu0 }
 0xbf5   : > { %v1925_v60 = vpop.f32.mrf.mxu0 }
 0xbf7   : > { %v5996_v61 = vpop.f32.mrf.mxu0 }
 0xbf9   : > { %v2020_v63 = vpop.f32.mrf.mxu0 }
 0xbfa   : > { %v2076_v0 = vsel %vm886_vm3, %v2020_v63, -inf }
 0xbfb   : > { %v6852_v2 = vpop.f32.mrf.mxu1  ;;  %2077 = vmax.xlane.f32.xlu0 %v2076_v0  ;;  %v6007_v5 = vpop.f32.mrf.mxu0 }
 0xbfc   : > { %v6137_v7 = vpack.i.bf16 %v6852_v2, %v6849_v57 }
 0xbfd   : > { %v6001_v10 = vpop.f32.mrf.mxu1  ;;  %v2023_v13 = vpop.f32.mrf.mxu0 }
 0xbff   : > { %v1973_v14 = vpop.f32.mrf.mxu1  ;;  %v6008_v15 = vpop.f32.mrf.mxu0 }
 0xc01   : > { %v6002_v16 = vpop.f32.mrf.mxu1 }
 0xc03   : > { %v2070_v18 = vpop.f32.mrf.mxu1 }
 0xc04   : > { %v2079_v20 = vsel %vm886_vm3, %v2070_v18, -inf }
 0xc05   : > { %2080 = vmax.xlane.f32.xlu1 %v2079_v20  ;;  %v6013_v22 = vpop.f32.mrf.mxu1 }
 0xc07   : > { %v2073_v24 = vpop.f32.mrf.mxu1 }
 0xc09   : > { %v6014_v25 = vpop.f32.mrf.mxu1 }
 0xc16   : > { %2148 = vrot.lane.b32.xlu1 %v6664_v9, %s6417_s29 }
 0xc1a   : > { %2198 = vrot.lane.b32.xlu1 %v6611_v21, %s6418_s15 }
 0xc1e   : > { %2248 = vrot.lane.b32.xlu1 %v6618_v31, %s6418_s15 }
 0xc22   : > { %2246 = vrot.lane.b32.xlu1 %v6627_v35, %s6418_s15 }
 0xc84   : > { %v2078_v26 = vpop.xlane.xlu0 %2077 }
 0xc85   : > { %v2082_v27 = vsub.f32 %v2020_v63, %v2078_v26 }
 0xc87   : > { %v2084_v28 = vmul.f32 1.442695, %v2082_v27 }
 0xc89   : > { %6341 = vpow2.f32 %v2084_v28 }
 0xc8e   : > { %v2081_v29 = vpop.xlane.xlu1 %2080 }
 0xc8f   : > { %v2083_v32 = vsub.f32 %v2070_v18, %v2081_v29 }
 0xc91   : > { %v2086_v33 = vmul.f32 1.442695, %v2083_v32 }
 0xc92   : > { %v2149_v36 = vpop.permute.xlu1 %2148 }
 0xc93   : > { %6343 = vpow2.f32 %v2086_v33  ;;  %v2154_v37 = vsel %vm1006_vm4, %v2149_v36, 0 }
 0xc94   : > { %6022 = vmatpush3.bf16.msra.mxu1 %v2154_v37 }
 0xc95   : > { %6033 = vmatprep.subr.bf16.mxu1 %v6411_v3 }
 0xc96   : > { %v6342_v38 = vpop.eup %6341  ;;  %v2199_v48 = vpop.permute.xlu1 %2198 }
 0xc97   : > { %v2088_v39 = vsel %vm886_vm3, %v6342_v38, 0.0  ;;  %v2204_v50 = vsel %vm886_vm3, %v2199_v48, 0 }
 0xc98   : > { %2089 = vadd.xlane.f32.xlu0 %v2088_v39 }
 0xc9a   : > { %v2249_v53 = vpop.permute.xlu1 %2248 }
 0xc9b   : > { %v2254_v56 = vsel %vm886_vm3, %v2249_v53, 0 }
 0xc9e   : > { %v2247_v58 = vpop.permute.xlu1 %2246 }
 0xca0   : > { %v6344_v40 = vpop.eup %6343 }
 0xca1   : > { %v2091_v41 = vsel %vm886_vm3, %v6344_v40, 0.0 }
 0xca2   : > { %2092 = vadd.xlane.f32.xlu0 %v2091_v41 }
 0xcb8   : > { %2100 = vrot.lane.b32.xlu0 %v6654_v62, %s6417_s29 }
 0xcbc   : > { %2196 = vrot.lane.b32.xlu0 %v6616_v30, %s6418_s15 }
 0xd21   : > { %v2090_v42 = vpop.xlane.xlu0 %2089 }
 0xd22   : > { %6345 = vrcp.f32 %v2090_v42 }
 0xd2b   : > { %v2093_v43 = vpop.xlane.xlu0 %2092 }
 0xd2c   : > { %6347 = vrcp.f32 %v2093_v43 }
 0xd2f   : > { %v6346_v44 = vpop.eup %6345  ;;  %v2101_v45 = vpop.permute.xlu0 %2100 }
 0xd30   : > { %v2106_v46 = vsel %vm1006_vm4, %v2101_v45, 0  ;;  %v2096_v47 = vmul.f32 %v6346_v44, %v6342_v38 }
 0xd31   : > { %6016 = vmatpush3.bf16.msra.mxu0 %v2106_v46 }
 0xd32   : > { %v2098_v49 = vpack.c.bf16 %v2096_v47, %v2096_v47  ;;  %6027 = vmatprep.subr.bf16.mxu0 %v6411_v3 }
 0xd33   : > { %v2197_v54 = vpop.permute.xlu0 %2196 }
 0xd34   : > { %6018 = vmatmul.mubr.msk.bf16.vlgmr.msra.gmra.mxu0 %vm886_vm3, %v2098_v49 }
 0xd35   : > { %6028 = vmatpush3.bf16.xpose.msra.mxu0 %v2204_v50  ;;  %6029 = vmatprep.mubr.msk.bf16.mxu0 %vm6412_vm1, %v6411_v3 }
 0xd36   : > { %6039 = vmatprep.subr.bf16.mxu0 %v6411_v3 }
 0xd39   : > { %v6348_v51 = vpop.eup %6347 }
 0xd3a   : > { %v2097_v52 = vmul.f32 %v6348_v51, %v6344_v40 }
 0xd3c   : > { %6030 = vmatmul.mubr.msk.bf16.vlgmr.msra.gmra.mxu0 %vm886_vm3, %v2197_v54  ;;  %v2099_v55 = vpack.c.bf16 %v2097_v52, %v2097_v52 }
 0xd3d   : > { %6041 = vmatprep.mubr.msk.bf16.mxu0 %vm6412_vm1, %v6411_v3 }
 0xd3e   : > { %6024 = vmatmul.mubr.msk.bf16.vlgmr.msra.gmra.mxu1 %vm886_vm3, %v2099_v55 }
 0xd3f   : > { %6034 = vmatpush3.bf16.xpose.msra.mxu1 %v2254_v56  ;;  %6035 = vmatprep.mubr.msk.bf16.mxu1 %vm6412_vm1, %v6411_v3 }
 0xd40   : > { %6045 = vmatprep.subr.bf16.mxu1 %v6411_v3 }
 0xd46   : > { %6036 = vmatmul.mubr.msk.bf16.vlgmr.msra.gmra.mxu1 %vm886_vm3, %v2247_v58 }
 0xd47   : > { %6047 = vmatprep.mubr.msk.bf16.mxu1 %vm6412_vm1, %v6411_v3 }
 0xdf4   : > { %v6891_v60 = vpop.f32.mrf.mxu0 }
 0xdf6   : > { %v6019_v61 = vpop.f32.mrf.mxu0 }
 0xdf8   : > { %v2145_v63 = vpop.f32.mrf.mxu0 }
 0xdfa   : > { %v6020_v0 = vpop.f32.mrf.mxu0 }
 0xdfc   : > { %v2240_v5 = vpop.f32.mrf.mxu0 }
 0xdfd   : > { %v2296_v10 = vsel %vm886_vm3, %v2240_v5, -inf }
 0xdfe   : > { %v6894_v13 = vpop.f32.mrf.mxu1  ;;  %2297 = vmax.xlane.f32.xlu0 %v2296_v10  ;;  %v6031_v14 = vpop.f32.mrf.mxu0 }
 0xdff   : > { %v6142_v15 = vpack.i.bf16 %v6894_v13, %v6891_v60  ;;  %v6169_v13 = vld [vmem:[%s6520_s16 + $0x18] sm:$0xff]  }
 0xe00   : > { %v6025_v16 = vpop.f32.mrf.mxu1  ;;  %v2243_v18 = vpop.f32.mrf.mxu0 }
 0xe02   : > { %v2193_v20 = vpop.f32.mrf.mxu1  ;;  %v6032_v22 = vpop.f32.mrf.mxu0 }
 0xe04   : > { %v6026_v24 = vpop.f32.mrf.mxu1 }
 0xe06   : > { %v2290_v25 = vpop.f32.mrf.mxu1 }
 0xe07   : > { %v2299_v26 = vsel %vm886_vm3, %v2290_v25, -inf }
 0xe08   : > { %2300 = vmax.xlane.f32.xlu1 %v2299_v26  ;;  %v6037_v27 = vpop.f32.mrf.mxu1 }
 0xe0a   : > { %v2293_v28 = vpop.f32.mrf.mxu1 }
 0xe0c   : > { %v6038_v29 = vpop.f32.mrf.mxu1 }
 0xe19   : > { %2368 = vrot.lane.b32.xlu1 %v6664_v9, %s6418_s15 }
 0xe1d   : > { %2418 = vrot.lane.b32.xlu1 %v6611_v21, %s6419_s28 }
 0xe21   : > { %2468 = vrot.lane.b32.xlu1 %v6618_v31, %s6419_s28 }
 0xe25   : > { %2466 = vrot.lane.b32.xlu1 %v6627_v35, %s6419_s28 }
 0xe87   : > { %v2298_v32 = vpop.xlane.xlu0 %2297 }
 0xe88   : > { %v2302_v33 = vsub.f32 %v2240_v5, %v2298_v32 }
 0xe8a   : > { %v2304_v36 = vmul.f32 1.442695, %v2302_v33 }
 0xe8c   : > { %6349 = vpow2.f32 %v2304_v36 }
 0xe91   : > { %v2301_v37 = vpop.xlane.xlu1 %2300 }
 0xe92   : > { %v2303_v38 = vsub.f32 %v2290_v25, %v2301_v37 }
 0xe94   : > { %v2306_v39 = vmul.f32 1.442695, %v2303_v38 }
 0xe95   : > { %v2369_v40 = vpop.permute.xlu1 %2368 }
 0xe96   : > { %6351 = vpow2.f32 %v2306_v39  ;;  %v2374_v41 = vsel %vm1006_vm4, %v2369_v40, 0 }
 0xe97   : > { %6046 = vmatpush3.bf16.msra.mxu1 %v2374_v41 }
 0xe98   : > { %6057 = vmatprep.subr.bf16.mxu1 %v6411_v3 }
 0xe99   : > { %v6350_v21 = vpop.eup %6349  ;;  %v2419_v49 = vpop.permute.xlu1 %2418 }
 0xe9a   : > { %v2308_v31 = vsel %vm886_vm3, %v6350_v21, 0.0  ;;  %v2424_v51 = vsel %vm886_vm3, %v2419_v49, 0 }
 0xe9b   : > { %2309 = vadd.xlane.f32.xlu0 %v2308_v31 }
 0xe9d   : > { %v2469_v53 = vpop.permute.xlu1 %2468 }
 0xe9e   : > { %v2474_v56 = vsel %vm886_vm3, %v2469_v53, 0 }
 0xea1   : > { %v2467_v58 = vpop.permute.xlu1 %2466 }
 0xea3   : > { %v6352_v42 = vpop.eup %6351 }
 0xea4   : > { %v2311_v35 = vsel %vm886_vm3, %v6352_v42, 0.0 }
 0xea5   : > { %2312 = vadd.xlane.f32.xlu0 %v2311_v35 }
 0xebb   : > { %2320 = vrot.lane.b32.xlu0 %v6654_v62, %s6418_s15 }
 0xebf   : > { %2416 = vrot.lane.b32.xlu0 %v6616_v30, %s6419_s28 }
 0xf24   : > { %v2310_v43 = vpop.xlane.xlu0 %2309 }
 0xf25   : > { %6353 = vrcp.f32 %v2310_v43  ;;  %v6172_v43 = vld [vmem:[%s6520_s16] sm:$0xff]  }
 0xf2e   : > { %v2313_v44 = vpop.xlane.xlu0 %2312 }
 0xf2f   : > { %6355 = vrcp.f32 %v2313_v44 }
 0xf32   : > { %v6354_v45 = vpop.eup %6353  ;;  %v2321_v46 = vpop.permute.xlu0 %2320 }
 0xf33   : > { %v2326_v47 = vsel %vm1006_vm4, %v2321_v46, 0  ;;  %v2316_v48 = vmul.f32 %v6354_v45, %v6350_v21 }
 0xf34   : > { %6040 = vmatpush3.bf16.msra.mxu0 %v2326_v47 }
 0xf35   : > { %v2318_v50 = vpack.c.bf16 %v2316_v48, %v2316_v48  ;;  %6051 = vmatprep.subr.bf16.mxu0 %v6411_v3 }
 0xf36   : > { %v2417_v54 = vpop.permute.xlu0 %2416 }
 0xf37   : > { %6042 = vmatmul.mubr.msk.bf16.vlgmr.msra.gmra.mxu0 %vm886_vm3, %v2318_v50 }
 0xf38   : > { %6052 = vmatpush3.bf16.xpose.msra.mxu0 %v2424_v51  ;;  %6053 = vmatprep.mubr.msk.bf16.mxu0 %vm6412_vm1, %v6411_v3 }
 0xf39   : > { %6063 = vmatprep.subr.bf16.mxu0 %v6411_v3 }
 0xf3c   : > { %v6356_v30 = vpop.eup %6355 }
 0xf3d   : > { %v2317_v52 = vmul.f32 %v6356_v30, %v6352_v42  ;;  %v6171_v42 = vld [vmem:[%s6520_s16 + $0x8] sm:$0xff]  }
 0xf3f   : > { %6054 = vmatmul.mubr.msk.bf16.vlgmr.msra.gmra.mxu0 %vm886_vm3, %v2417_v54  ;;  %v2319_v55 = vpack.c.bf16 %v2317_v52, %v2317_v52 }
 0xf40   : > { %6065 = vmatprep.mubr.msk.bf16.mxu0 %vm6412_vm1, %v6411_v3 }
 0xf41   : > { %6048 = vmatmul.mubr.msk.bf16.vlgmr.msra.gmra.mxu1 %vm886_vm3, %v2319_v55 }
 0xf42   : > { %6058 = vmatpush3.bf16.xpose.msra.mxu1 %v2474_v56  ;;  %6059 = vmatprep.mubr.msk.bf16.mxu1 %vm6412_vm1, %v6411_v3 }
 0xf43   : > { %6069 = vmatprep.subr.bf16.mxu1 %v6411_v3 }
 0xf49   : > { %6060 = vmatmul.mubr.msk.bf16.vlgmr.msra.gmra.mxu1 %vm886_vm3, %v2467_v58 }
 0xf4a   : > { %6071 = vmatprep.mubr.msk.bf16.mxu1 %vm6412_vm1, %v6411_v3 }
 0xff7   : > { %v2362_v61 = vpop.f32.mrf.mxu0 }
 0xff9   : > { %v6043_v63 = vpop.f32.mrf.mxu0 }
 0xffb   : > { %v2365_v0 = vpop.f32.mrf.mxu0 }
 0xffd   : > { %v6044_v5 = vpop.f32.mrf.mxu0 }
 0xfff   : > { %v2460_v10 = vpop.f32.mrf.mxu0 }
0x1000   : > { %v2516_v14 = vsel %vm886_vm3, %v2460_v10, -inf }
0x1001   : > { %v2410_v16 = vpop.f32.mrf.mxu1  ;;  %2517 = vmax.xlane.f32.xlu0 %v2516_v14  ;;  %v6055_v18 = vpop.f32.mrf.mxu0 }
0x1002   : > { %v6147_v36 = vpack.i.bf16 %v2410_v16, %v2362_v61 }
0x1003   : > { %v6049_v20 = vpop.f32.mrf.mxu1  ;;  %v2463_v22 = vpop.f32.mrf.mxu0 }
0x1005   : > { %v2413_v24 = vpop.f32.mrf.mxu1  ;;  %v6056_v25 = vpop.f32.mrf.mxu0 }
0x1007   : > { %v6050_v26 = vpop.f32.mrf.mxu1 }
0x1009   : > { %v2510_v27 = vpop.f32.mrf.mxu1 }
0x100a   : > { %v2519_v28 = vsel %vm886_vm3, %v2510_v27, -inf }
0x100b   : > { %2520 = vmax.xlane.f32.xlu1 %v2519_v28  ;;  %v6061_v29 = vpop.f32.mrf.mxu1 }
0x100d   : > { %v2513_v32 = vpop.f32.mrf.mxu1 }
0x100f   : > { %v6062_v33 = vpop.f32.mrf.mxu1 }
0x101c   : > { %2588 = vrot.lane.b32.xlu1 %v6664_v9, %s6419_s28 }
0x1020   : > { %6123 = vrot.lane.b32.xlu1 %v6122_v19, %s6420_s18 }
0x1024   : > { %6128 = vrot.lane.b32.xlu1 %v6127_v12, %s6421_s20 }
0x1028   : > { %6138 = vrot.lane.b32.xlu1 %v6137_v7, %s6422_s21 }
0x102c   : > { %6148 = vrot.lane.b32.xlu1 %v6147_v36, %s6423_s23  ;;  %s7394_s23 = scalar_lea.vmem %s7372_s6, %s6512_s27 }
0x108a   : > { %v2518_v9 = vpop.xlane.xlu0 %2517 }
0x108b   : > { %v2522_v37 = vsub.f32 %v2460_v10, %v2518_v9 }
0x108d   : > { %v2524_v38 = vmul.f32 1.442695, %v2522_v37 }
0x108f   : > { %6357 = vpow2.f32 %v2524_v38 }
0x1094   : > { %v2521_v39 = vpop.xlane.xlu1 %2520 }
0x1095   : > { %v2523_v11 = vsub.f32 %v2510_v27, %v2521_v39 }
0x1097   : > { %v2526_v17 = vmul.f32 1.442695, %v2523_v11 }
0x1098   : > { %v2589_v19 = vpop.permute.xlu1 %2588 }
0x1099   : > { %6359 = vpow2.f32 %v2526_v17  ;;  %v2594_v1 = vsel %vm1006_vm4, %v2589_v19, 0 }
0x109a   : > { %6070 = vmatpush3.bf16.msra.mxu1 %v2594_v1  ;;  %v5363_v1 = vld [vmem:[%s7392_s14] ss:$0 sm:$0xff] }
0x109c   : > { %v6358_v8 = vpop.eup %6357  ;;  %v6124_v30 = vpop.permute.xlu1 %6123 }
0x109d   : > { %v2528_v12 = vsel %vm886_vm3, %v6358_v8, 0.0  ;;  %v6126_v54 = vunpack.i.h.bf16 %v6124_v30  ;;  %v6125_v55 = vunpack.i.l.bf16 %v6124_v30 }
0x109e   : > { %2529 = vadd.xlane.f32.xlu0 %v2528_v12 }
0x109f   : > { %v2693_v5 = vsel %vm886_vm3, %v6686_v34, %v6126_v54  ;;  %v2692_v10 = vsel %vm886_vm3, %v6683_v23, %v6125_v55  ;;  %v2876_v54 = vld [vmem:[%s6548_s1 + $0x100] sm:$0xff] }
0x10a0   : > { %v6129_v52 = vpop.permute.xlu1 %6128  ;;  %v2884_v55 = vld [vmem:[%s6548_s1 + $0x140] sm:$0xff] }
0x10a1   : > { %v6131_v56 = vunpack.i.h.bf16 %v6129_v52 }
0x10a3   : > { %v2696_v16 = vsel %vm2694_vm5, %v2693_v5, %v6131_v56  ;;  %v2877_v56 = vld [vmem:[%s6548_s1 + $0x108] sm:$0xff]  ;;  %v2860_v5 = vld [vmem:[%s6548_s1 + $0x80] sm:$0xff] }
0x10a4   : > { %v6139_v58 = vpop.permute.xlu1 %6138 }
0x10a5   : > { %v6141_v25 = vunpack.i.h.bf16 %v6139_v58  ;;  %v6140_v26 = vunpack.i.l.bf16 %v6139_v58  ;;  %v2885_v58 = vld [vmem:[%s6548_s1 + $0x148] sm:$0xff] }
0x10a6   : > { %v6360_v57 = vpop.eup %6359 }
0x10a7   : > { %v2531_v2 = vsel %vm886_vm3, %v6360_v57, 0.0 }
0x10a8   : > { %2532 = vadd.xlane.f32.xlu0 %v2531_v2  ;;  %v6149_v27 = vpop.permute.xlu1 %6148  ;;  %v6373_v2 = vld [vmem:[#allocation2] sm:$0xff] }
0x10a9   : > { %v6151_v34 = vunpack.i.h.bf16 %v6149_v27  ;;  %v6150_v36 = vunpack.i.l.bf16 %v6149_v27  ;;  %v2845_v27 = vld [vmem:[%s6548_s1 + $0x8] sm:$0xff] }
0x10be   : > { %2540 = vrot.lane.b32.xlu0 %v6654_v62, %s6419_s28  ;;  %s7393_s28 = scalar_lea.vmem %s7371_s5, %s6512_s27 }
0x10c2   : > { %6133 = vrot.lane.b32.xlu0 %v6132_v6, %s6424_s0 }
0x10c6   : > { %6143 = vrot.lane.b32.xlu0 %v6142_v15, %s6425_s2  ;;  %v6170_v15 = vld [vmem:[%s6520_s16 + $0x10] sm:$0xff]  }
0x1127   : > { %v2530_v7 = vpop.xlane.xlu0 %2529 }
0x1128   : > { %6361 = vrcp.f32 %v2530_v7 }
0x1131   : > { %v2533_v40 = vpop.xlane.xlu0 %2532 }
0x1132   : > { %6363 = vrcp.f32 %v2533_v40 }
0x1135   : > { %v6362_v41 = vpop.eup %6361  ;;  %v2541_v21 = vpop.permute.xlu0 %2540 }
0x1136   : > { %v2546_v62 = vsel %vm1006_vm4, %v2541_v21, 0  ;;  %v2536_v31 = vmul.f32 %v6362_v41, %v6358_v8 }
0x1137   : > { %6064 = vmatpush3.bf16.msra.mxu0 %v2546_v62 }
0x1138   : > { %v2538_v59 = vpack.c.bf16 %v2536_v31, %v2536_v31  ;;  %6075 = vmatprep.subr.bf16.mxu0 %v6411_v3  ;;  %v6374_v31 = vld [vmem:[#allocation2 + $0x8] sm:$0xff] }
0x1139   : > { %v6134_v53 = vpop.permute.xlu0 %6133 }
0x113a   : > { %6066 = vmatmul.mubr.msk.bf16.vlgmr.msra.gmra.mxu0 %vm886_vm3, %v2538_v59  ;;  %v6136_v61 = vunpack.i.h.bf16 %v6134_v53  ;;  %v6135_v63 = vunpack.i.l.bf16 %v6134_v53 }
0x113b   : > { %6083 = vmatprep.mubr.msk.bf16.mxu0 %vm6412_vm1, %v6411_v3  ;;  %6076 = vmatpush3.bf16.msra.mxu0 %v6169_v13 }
0x113c   : > { %6077 = vmatprep.subr.bf16.mxu0 %v6411_v3  ;;  %v2699_v18 = vsel %vm2697_vm6, %v2696_v16, %v6136_v61  ;;  %v5403_v61 = vcombine.low %v2876_v54, %v2884_v55 }
0x113d   : > { %v6144_v0 = vpop.permute.xlu0 %6143  ;;  %v2702_v29 = vsel %vm2700_vm7, %v2699_v18, %v6141_v25  ;;  %v2869_v18 = vld [vmem:[%s6548_s1 + $0xc8] sm:$0xff]  ;;  %v2844_v25 = vld [vmem:[%s6548_s1] sm:$0xff] }
0x113e   : > { %v6146_v22 = vunpack.i.h.bf16 %v6144_v0  ;;  %v6145_v24 = vunpack.i.l.bf16 %v6144_v0  ;;  %v5406_v0 = vcombine.high %v2877_v56, %v2885_v58 }
0x113f   : > { %v6364_v4 = vpop.eup %6363  ;;  %6078 = vmatpush3.bf16.msra.mxu0 %v6170_v15 }
0x1140   : > { %v2537_v6 = vmul.f32 %v6364_v4, %v6360_v57  ;;  %6079 = vmatprep.subr.bf16.mxu0 %v6411_v3  ;;  %v2705_v33 = vsel %vm2703_vm8, %v2702_v29, %v6146_v22  ;;  %v2853_v29 = vld [vmem:[%s6548_s1 + $0x48] sm:$0xff] }
0x1141   : > { %v2708_v39 = vsel %vm2706_vm9, %v2705_v33, %v6151_v34  ;;  %v5373_v33 = vcombine.low %v2845_v27, %v2853_v29  ;;  %v5374_v34 = vcombine.high %v2845_v27, %v2853_v29  ;;  %v2881_v27 = vld [vmem:[%s6548_s1 + $0x128] sm:$0xff] }
0x1142   : > { %v2539_v60 = vpack.c.bf16 %v2537_v6, %v2537_v6 }
0x1143   : > { %6080 = vmatpush3.bf16.msra.mxu0 %v6171_v42 }
0x1144   : > { %6072 = vmatmul.mubr.msk.bf16.vlgmr.msra.gmra.mxu1 %vm886_vm3, %v2539_v60  ;;  %6081 = vmatprep.subr.bf16.mxu0 %v6411_v3  ;;  %v6130_v3 = vunpack.i.l.bf16 %v6129_v52 }
0x1146   : > { %v2695_v14 = vsel %vm2694_vm5, %v2692_v10, %v6130_v3  ;;  %v5404_v3 = vcombine.high %v2876_v54, %v2884_v55  ;;  %v2868_v10 = vld [vmem:[%s6548_s1 + $0xc0] sm:$0xff]  ;;  %v2846_v54 = vld [vmem:[%s6548_s1 + $0x10] sm:$0xff] }
0x1147   : > { %6082 = vmatpush3.bf16.msra.mxu0 %v6172_v43  ;;  %v2698_v20 = vsel %vm2697_vm6, %v2695_v14, %v6135_v63  ;;  %v5405_v63 = vcombine.low %v2877_v56, %v2885_v58  ;;  %v2861_v14 = vld [vmem:[%s6548_s1 + $0x88] sm:$0xff]  ;;  %v5388_v16 = vcombine.high %v2860_v5, %v2868_v10  ;;  %v2854_v55 = vld [vmem:[%s6548_s1 + $0x50] sm:$0xff]  ;;  %v2847_v56 = vld [vmem:[%s6548_s1 + $0x18] sm:$0xff] }
0x1148   : > { %v2701_v28 = vsel %vm2700_vm7, %v2698_v20, %v6140_v26  ;;  %v5387_v20 = vcombine.low %v2860_v5, %v2868_v10  ;;  %v5389_v22 = vcombine.low %v2861_v14, %v2869_v18  ;;  %v2852_v26 = vld [vmem:[%s6548_s1 + $0x40] sm:$0xff] }
0x1149   : > { %v2704_v32 = vsel %vm2703_vm8, %v2701_v28, %v6145_v24  ;;  %v5390_v24 = vcombine.high %v2861_v14, %v2869_v18  ;;  %v5372_v28 = vcombine.high %v2844_v25, %v2852_v26  ;;  %v2896_v5 = vld [vmem:[%s6548_s1 + $0x1a0] sm:$0xff]  ;;  %v2897_v14 = vld [vmem:[%s6548_s1 + $0x1a8] sm:$0xff]  ;;  %v5375_v18 = vcombine.low %v2846_v54, %v2854_v55 }
0x114a   : > { %v2707_v38 = vsel %vm2706_vm9, %v2704_v32, %v6150_v36  ;;  %v5371_v32 = vcombine.low %v2844_v25, %v2852_v26  ;;  %v2894_v36 = vld [vmem:[%s6548_s1 + $0x190] sm:$0xff]  ;;  %v2904_v10 = vld [vmem:[%s6548_s1 + $0x1e0] sm:$0xff] }
0x114b   : > { %v2880_v25 = vld [vmem:[%s6548_s1 + $0x120] sm:$0xff]  ;;  %v5427_v29 = vcombine.low %v2896_v5, %v2904_v10 }
0x114c   : > { %v2888_v26 = vld [vmem:[%s6548_s1 + $0x160] sm:$0xff] }
0x11fa   : > { %v2582_v35 = vpop.f32.mrf.mxu0 }
0x11fc   : > { %v6067_v44 = vpop.f32.mrf.mxu0 }
0x11fe   : > { %v2585_v45 = vpop.f32.mrf.mxu0 }
0x1200   : > { %v6068_v46 = vpop.f32.mrf.mxu0 }
0x1204   : > { %v2630_v47 = vpop.f32.mrf.mxu1 }
0x1205   : > { %v6152_v48 = vpack.i.bf16 %v2630_v47, %v2582_v35  ;;  %v2892_v47 = vld [vmem:[%s6548_s1 + $0x180] sm:$0xff] }
0x1206   : > { %v6073_v49 = vpop.f32.mrf.mxu1 }
0x1207   : > { %6153 = vrot.lane.b32.xlu0 %v6152_v48, %s6426_s25  ;;  %v2900_v48 = vld [vmem:[%s6548_s1 + $0x1c0] sm:$0xff]  ;;  %v2893_v49 = vld [vmem:[%s6548_s1 + $0x188] sm:$0xff]  ;;  %s6428_s25 = smov [#allocation2]  }
0x1208   : > { %v2633_v50 = vpop.f32.mrf.mxu1  ;;  %v5419_v30 = vcombine.low %v2892_v47, %v2900_v48  ;;  %s5120_s16 = sshll.u32 %s6428_s25, 4  ;;  %s5121_s16 = int_to_ptr.vmem [resolvable:$true] %s5120_s16 }
0x1209   : > { %v5420_v50 = vcombine.high %v2892_v47, %v2900_v48  ;;  %v2862_v47 = vld [vmem:[%s6548_s1 + $0x90] sm:$0xff]  ;;  %p6382_p9 = scmp.lt.s32.totalorder %s5121_s16, %s5121_s16 }
0x120a   : > { %v6074_v51 = vpop.f32.mrf.mxu1  ;;  %v2870_v48 = vld [vmem:[%s6548_s1 + $0xd0] sm:$0xff] }
0x120b   : > { %v2901_v51 = vld [vmem:[%s6548_s1 + $0x1c8] sm:$0xff]  ;;  %3323 = vmatprep.subr.bf16.mxu1 %v5420_v50  ;;  %v2871_v50 = vld [vmem:[%s6548_s1 + $0xd8] sm:$0xff]  ;;  %v5391_v58 = vcombine.low %v2862_v47, %v2870_v48 }
0x120c   : > { %v5421_v52 = vcombine.low %v2893_v49, %v2901_v51  ;;  %v5422_v53 = vcombine.high %v2893_v49, %v2901_v51  ;;  %3324 = vmatpush1.bf16.msra.mxu1 %v5419_v30  ;;  %v2863_v49 = vld [vmem:[%s6548_s1 + $0x98] sm:$0xff] }
0x120d   : > { %3325 = vmatprep.subr.bf16.mxu1 %v5404_v3  ;;  %v2855_v3 = vld [vmem:[%s6548_s1 + $0x58] sm:$0xff] }
0x120e   : > { %3366 = vmatprep.subr.bf16.mxu0 %v5422_v53  ;;  %v5394_v53 = vcombine.high %v2863_v49, %v2871_v50 }
0x1210   : > { %3326 = vmatpush1.bf16.msra.mxu1 %v5403_v61  ;;  %v5393_v61 = vcombine.low %v2863_v49, %v2871_v50 }
0x1211   : > { %3327 = vmatprep.subr.bf16.mxu1 %v5388_v16  ;;  %v2905_v16 = vld [vmem:[%s6548_s1 + $0x1e8] sm:$0xff] }
0x1214   : > { %3328 = vmatpush1.bf16.msra.mxu1 %v5387_v20  ;;  %v5377_v20 = vcombine.low %v2847_v56, %v2855_v3 }
0x1215   : > { %3329 = vmatprep.subr.bf16.mxu1 %v5372_v28  ;;  %v2889_v28 = vld [vmem:[%s6548_s1 + $0x168] sm:$0xff] }
0x1218   : > { %3330 = vmatpush1.bf16.msra.mxu1 %v5371_v32  ;;  %v5429_v32 = vcombine.low %v2897_v14, %v2905_v16 }
0x1279   : > { %v6154_v23 = vpop.permute.xlu0 %6153 }
0x127a   : > { %v6156_v9 = vunpack.i.h.bf16 %v6154_v23  ;;  %v6155_v37 = vunpack.i.l.bf16 %v6154_v23  ;;  %v2902_v23 = vld [vmem:[%s6548_s1 + $0x1d0] sm:$0xff] }
0x127c   : > { %v2711_v11 = vsel %vm2709_vm10, %v2708_v39, %v6156_v9  ;;  %v2710_v17 = vsel %vm2709_vm10, %v2707_v38, %v6155_v37  ;;  %v2895_v9 = vld [vmem:[%s6548_s1 + $0x198] sm:$0xff]  ;;  %v5423_v37 = vcombine.low %v2894_v36, %v2902_v23  ;;  %v5424_v38 = vcombine.high %v2894_v36, %v2902_v23  ;;  %v2864_v36 = vld [vmem:[%s6548_s1 + $0xa0] sm:$0xff] }
0x127d   : > { %v2712_v19 = vpack.c.bf16 %v2711_v11, %v2710_v17  ;;  %v2903_v39 = vld [vmem:[%s6548_s1 + $0x1d8] sm:$0xff]  ;;  %v6427_v11 = vmov 0   ;;  %v2872_v23 = vld [vmem:[%s6548_s1 + $0xe0] sm:$0xff] }
0x127e   : > { %3347 = vmatprep.mubr.bf16.mxu1 %v6427_v11  ;;  %v5425_v17 = vcombine.low %v2895_v9, %v2903_v39  ;;  %3409 = vmatprep.subr.bf16.mxu1 %v5424_v38  ;;  %v5411_v38 = vcombine.low %v2880_v25, %v2888_v26 }
0x127f   : > { %6084 = vmatmul.mubr.msk.bf16.vlgmr.msra.gmra.mxu0 %vm657_vm2, %v2712_v19  ;;  %v5426_v19 = vcombine.high %v2895_v9, %v2903_v39  ;;  %v2865_v9 = vld [vmem:[%s6548_s1 + $0xa8] sm:$0xff]  ;;  %v5413_v39 = vcombine.low %v2881_v27, %v2889_v28 }
0x1280   : > { %3367 = vmatpush1.bf16.msra.mxu0 %v5421_v52  ;;  %3390 = vmatprep.mubr.bf16.mxu0 %v6427_v11  ;;  %v5392_v52 = vcombine.high %v2862_v47, %v2870_v48 }
0x1281   : > { %3368 = vmatprep.subr.bf16.mxu0 %v5406_v0  ;;  %v5378_v0 = vcombine.high %v2847_v56, %v2855_v3 }
0x1284   : > { %3369 = vmatpush1.bf16.msra.mxu0 %v5405_v63  ;;  %v5376_v63 = vcombine.high %v2846_v54, %v2854_v55 }
0x1285   : > { %3370 = vmatprep.subr.bf16.mxu0 %v5390_v24  ;;  %v5430_v24 = vcombine.high %v2897_v14, %v2905_v16 }
0x1288   : > { %3371 = vmatpush1.bf16.msra.mxu0 %v5389_v22  ;;  %v5428_v22 = vcombine.high %v2896_v5, %v2904_v10 }
0x1289   : > { %3372 = vmatprep.subr.bf16.mxu0 %v5374_v34  ;;  %v5414_v34 = vcombine.high %v2881_v27, %v2889_v28  ;;  %v6178_v27 = vld [vmem:[%s6560_s13 + $0xf0] sm:$0xff]  }
0x128a   : > { %v6179_v28 = vld [vmem:[%s6560_s13 + $0x30] sm:$0xff]  }
0x128c   : > { %3373 = vmatpush1.bf16.msra.mxu0 %v5373_v33  ;;  %v5412_v33 = vcombine.high %v2880_v25, %v2888_v26  ;;  %v6176_v25 = vld [vmem:[%s6560_s13 + $0xb8] sm:$0xff]   ;;  %v6177_v26 = vld [vmem:[%s6560_s13 + $0x70] sm:$0xff]  }
0x128d   : > { %3452 = vmatprep.subr.bf16.mxu0 %v5426_v19 }
0x133f   : > { %v2789_v8 = vpop.f32.mrf.mxu0 }
0x1340   : > { %v2790_v12 = vadd.f32 %v5363_v1, %v2789_v8 }
0x1341   : > { %v6085_v57 = vpop.f32.mrf.mxu0 }
0x1342   : > { %v2796_v7 = vadd.f32 %v6373_v2, %v2790_v12 }
0x1343   : > { %v2792_v40 = vpop.f32.mrf.mxu0 }
0x1344   : > { %v2793_v41 = vadd.f32 %v5363_v1, %v2792_v40  ;;  %v2800_v21 = vsel %vm657_vm2, %v2796_v7, 0.0 }
0x1345   : > { %2801 = vadd.xlane.f32.xlu1 %v2800_v21  ;;  %v6086_v62 = vpop.f32.mrf.mxu0  ;;  %v5369_v21 = vld [vmem:[%s7393_s28] ss:$0 sm:$0xff] }
0x1346   : > { %v2797_v59 = vadd.f32 %v6374_v31, %v2793_v41 }
0x1348   : > { %v2803_v4 = vsel %vm657_vm2, %v2797_v59, 0.0 }
0x1349   : > { %2804 = vadd.xlane.f32.xlu0 %v2803_v4  ;;  %v5370_v4 = vld [vmem:[%s7394_s23] ss:$0 sm:$0xff] }
0x13ce   : > { %v2802_v6 = vpop.xlane.xlu1 %2801 }
0x13cf   : > { %v2807_v60 = vmul.f32 0.015625, %v2802_v6 }
0x13d1   : > { %v6983_v13 = vsub.f32 %v2796_v7, %v2807_v60  ;;  %v2878_v60 = vld [vmem:[%s6548_s1 + $0x110] sm:$0xff] }
0x13d2   : > { %v2805_v15 = vpop.xlane.xlu0 %2804 }
0x13d3   : > { %v2808_v42 = vmul.f32 0.015625, %v2805_v15  ;;  %v2811_v35 = vmul.f32 %v6983_v13, %v6983_v13  ;;  %v2879_v15 = vld [vmem:[%s6548_s1 + $0x118] sm:$0xff] }
0x13d5   : > { %v6987_v43 = vsub.f32 %v2797_v59, %v2808_v42  ;;  %v2813_v44 = vsel %vm657_vm2, %v2811_v35, 0.0  ;;  %v2887_v42 = vld [vmem:[%s6548_s1 + $0x158] sm:$0xff] }
0x13d6   : > { %2814 = vadd.xlane.f32.xlu0 %v2813_v44  ;;  %v5409_v30 = vcombine.low %v2879_v15, %v2887_v42 }
0x13d7   : > { %v2812_v45 = vmul.f32 %v6987_v43, %v6987_v43 }
0x13d9   : > { %v2816_v46 = vsel %vm657_vm2, %v2812_v45, 0.0 }
0x13da   : > { %2817 = vadd.xlane.f32.xlu0 %v2816_v46 }
0x145f   : > { %v2815_v1 = vpop.xlane.xlu0 %2814 }
0x1460   : > { %v2819_v8 = vmul.f32 0.015625, %v2815_v1  ;;  %v2848_v1 = vld [vmem:[%s6548_s1 + $0x20] sm:$0xff] }
0x1462   : > { %v2821_v12 = vadd.f32 1e-05, %v2819_v8  ;;  %v2856_v8 = vld [vmem:[%s6548_s1 + $0x60] sm:$0xff] }
0x1463   : > { %v2818_v57 = vpop.xlane.xlu0 %2817 }
0x1464   : > { %6365 = vrsqrt.f32 %v2821_v12  ;;  %v2820_v2 = vmul.f32 0.015625, %v2818_v57  ;;  %v2849_v12 = vld [vmem:[%s6548_s1 + $0x28] sm:$0xff] }
0x1465   : > { %v2857_v57 = vld [vmem:[%s6548_s1 + $0x68] sm:$0xff] }
0x1466   : > { %v2822_v7 = vadd.f32 1e-05, %v2820_v2  ;;  %v5395_v2 = vcombine.low %v2864_v36, %v2872_v23 }
0x1468   : > { %6367 = vrsqrt.f32 %v2822_v7 }
0x1471   : > { %v6366_v40 = vpop.eup %6365 }
0x1472   : > { %v2825_v41 = vmul.f32 %v6366_v40, %v6983_v13  ;;  %v2886_v13 = vld [vmem:[%s6548_s1 + $0x150] sm:$0xff]  ;;  %v5380_v40 = vcombine.high %v2848_v1, %v2856_v8 }
0x1473   : > { %v5408_v46 = vcombine.high %v2878_v60, %v2886_v13  ;;  %v5407_v51 = vcombine.low %v2878_v60, %v2886_v13 }
0x1474   : > { %v2833_v31 = vmul.f32 %v5369_v21, %v2825_v41  ;;  %v5382_v41 = vcombine.high %v2849_v12, %v2857_v57 }
0x1475   : > { %v6368_v62 = vpop.eup %6367 }
0x1476   : > { %v2826_v59 = vmul.f32 %v6368_v62, %v6987_v43  ;;  %v7031_v35 = vadd.f32 %v5370_v4, %v2833_v31  ;;  %v5410_v43 = vcombine.high %v2879_v15, %v2887_v42  ;;  %v2906_v62 = vld [vmem:[%s6548_s1 + $0x1f0] sm:$0xff]  ;;  %v2899_v31 = vld [vmem:[%s6548_s1 + $0x1b8] sm:$0xff] }
0x1477   : > { %v2882_v15 = vld [vmem:[%s6548_s1 + $0x130] sm:$0xff] }
0x1478   : > { %v2834_v6 = vmul.f32 %v5369_v21, %v2826_v59  ;;  %v2898_v21 = vld [vmem:[%s6548_s1 + $0x1b0] sm:$0xff]  ;;  %v2907_v59 = vld [vmem:[%s6548_s1 + $0x1f8] sm:$0xff] }
0x1479   : > { %v5432_v60 = vcombine.high %v2898_v21, %v2906_v62  ;;  %v5434_v13 = vcombine.high %v2899_v31, %v2907_v59  ;;  %v2890_v42 = vld [vmem:[%s6548_s1 + $0x170] sm:$0xff]  ;;  %v5431_v47 = vcombine.low %v2898_v21, %v2906_v62  ;;  %v5433_v48 = vcombine.low %v2899_v31, %v2907_v59  ;;  %v6201_v21 = vld [vmem:[%s6560_s13 + $0x40] sm:$0xff]  }
0x147a   : > { %v7033_v44 = vadd.f32 %v5370_v4, %v2834_v6  ;;  %v5379_v4 = vcombine.low %v2848_v1, %v2856_v8  ;;  %v5381_v6 = vcombine.low %v2849_v12, %v2857_v57  ;;  %v5416_v49 = vcombine.high %v2882_v15, %v2890_v42  ;;  %v6193_v1 = vld [vmem:[%s6560_s13 + $0x50] sm:$0xff]   ;;  %v6202_v62 = vld [vmem:[%s6560_s13 + $0xc0] sm:$0xff]  }
0x147b   : > { %v5415_v54 = vcombine.low %v2882_v15, %v2890_v42  ;;  %v6194_v8 = vld [vmem:[%s6560_s13 + $0xd0] sm:$0xff]   ;;  %v6203_v31 = vld [vmem:[%s6560_s13] sm:$0xff]   ;;  %v7139_v42 = vld [vmem:[%s6554_s30 + $0x8] sm:$0xff] }
0x147c   : > { %v7037_v45 = vpack.c.bf16 %v7033_v44, %v7031_v35  ;;  %v6195_v12 = vld [vmem:[%s6560_s13 + $0x10] sm:$0xff]   ;;  %v6204_v59 = vld [vmem:[%s6560_s13 + $0x80] sm:$0xff]  }
0x147d   : > { %v6196_v57 = vld [vmem:[%s6560_s13 + $0x90] sm:$0xff]  }
0x147e   : > { %5435 = vmatmul.mubr.msk.bf16.vlgmr.msra.gmra.mxu1 %vm657_vm2, %v7037_v45  ;;  %5436 = vmatmul.mubr.msk.bf16.vlgmr.msra.gmra.mxu0 %vm657_vm2, %v7037_v45 }
0x147f   : > { %3410 = vmatpush1.bf16.msra.mxu1 %v5423_v37  ;;  %3453 = vmatpush1.bf16.msra.mxu0 %v5425_v17  ;;  %v2873_v37 = vld [vmem:[%s6548_s1 + $0xe8] sm:$0xff]  ;;  %v5396_v17 = vcombine.high %v2864_v36, %v2872_v23  ;;  %v6186_v23 = vld [vmem:[%s6560_s13 + $0xe0] sm:$0xff]  }
0x1480   : > { %3411 = vmatprep.subr.bf16.mxu1 %v5408_v46  ;;  %3454 = vmatprep.subr.bf16.mxu0 %v5410_v43  ;;  %v5398_v19 = vcombine.high %v2865_v9, %v2873_v37  ;;  %v5397_v7 = vcombine.low %v2865_v9, %v2873_v37  ;;  %v2883_v46 = vld [vmem:[%s6548_s1 + $0x138] sm:$0xff]  ;;  %v6184_v36 = vld [vmem:[%s6560_s13 + $0xa8] sm:$0xff]   ;;  %v6187_v9 = vld [vmem:[%s6560_s13 + $0x20] sm:$0xff]  }
0x1481   : > { %3433 = vmatprep.mubr.bf16.mxu1 %v6427_v11  ;;  %3476 = vmatprep.mubr.bf16.mxu0 %v6427_v11  ;;  %v2891_v43 = vld [vmem:[%s6548_s1 + $0x178] sm:$0xff]  ;;  %v6188_v37 = vld [vmem:[%s6560_s13 + $0xa0] sm:$0xff]  }
0x1482   : > { %v5418_v50 = vcombine.high %v2883_v46, %v2891_v43  ;;  %v5417_v55 = vcombine.low %v2883_v46, %v2891_v43 }
0x1483   : > { %3412 = vmatpush1.bf16.msra.mxu1 %v5407_v51  ;;  %3455 = vmatpush1.bf16.msra.mxu0 %v5409_v30  ;;  %v2866_v51 = vld [vmem:[%s6548_s1 + $0xb0] sm:$0xff] }
0x1484   : > { %3413 = vmatprep.subr.bf16.mxu1 %v5392_v52  ;;  %3456 = vmatprep.subr.bf16.mxu0 %v5394_v53  ;;  %v2874_v30 = vld [vmem:[%s6548_s1 + $0xf0] sm:$0xff]  ;;  %v2867_v52 = vld [vmem:[%s6548_s1 + $0xb8] sm:$0xff] }
0x1485   : > { %v2875_v53 = vld [vmem:[%s6548_s1 + $0xf8] sm:$0xff]  ;;  %v5400_v56 = vcombine.high %v2866_v51, %v2874_v30  ;;  %v5399_v5 = vcombine.low %v2866_v51, %v2874_v30 }
0x1486   : > { %v5402_v3 = vcombine.high %v2867_v52, %v2875_v53  ;;  %v5401_v10 = vcombine.low %v2867_v52, %v2875_v53 }
0x1487   : > { %3414 = vmatpush1.bf16.msra.mxu1 %v5391_v58  ;;  %3457 = vmatpush1.bf16.msra.mxu0 %v5393_v61  ;;  %v2850_v58 = vld [vmem:[%s6548_s1 + $0x30] sm:$0xff] }
0x1488   : > { %3415 = vmatprep.subr.bf16.mxu1 %v5376_v63  ;;  %3458 = vmatprep.subr.bf16.mxu0 %v5378_v0  ;;  %v2858_v61 = vld [vmem:[%s6548_s1 + $0x70] sm:$0xff]  ;;  %v2851_v63 = vld [vmem:[%s6548_s1 + $0x38] sm:$0xff] }
0x1489   : > { %v2859_v0 = vld [vmem:[%s6548_s1 + $0x78] sm:$0xff]  ;;  %v5384_v14 = vcombine.high %v2850_v58, %v2858_v61 }
0x148a   : > { %v5386_v16 = vcombine.high %v2851_v63, %v2859_v0 }
0x148b   : > { %3416 = vmatpush1.bf16.msra.mxu1 %v5375_v18  ;;  %3459 = vmatpush1.bf16.msra.mxu0 %v5377_v20  ;;  %v5383_v18 = vcombine.low %v2850_v58, %v2858_v61  ;;  %v5385_v20 = vcombine.low %v2851_v63, %v2859_v0 }
0x148c   : > { %3495 = vmatprep.subr.bf16.mxu1 %v5428_v22  ;;  %3538 = vmatprep.subr.bf16.mxu0 %v5430_v24  ;;  %v6174_v22 = vld [vmem:[%s6560_s13 + $0xf8] sm:$0xff]  }
0x148d   : > { %v6175_v24 = vld [vmem:[%s6560_s13 + $0x38] sm:$0xff]  }
0x148e   : > { %5437 = vmatmul.mubr.msk.bf16.vlgmr.msra.gmra.mxu1 %vm657_vm2, %v7037_v45  ;;  %5438 = vmatmul.mubr.msk.bf16.vlgmr.msra.gmra.mxu0 %vm657_vm2, %v7037_v45 }
0x148f   : > { %3496 = vmatpush1.bf16.msra.mxu1 %v5427_v29  ;;  %3539 = vmatpush1.bf16.msra.mxu0 %v5429_v32  ;;  %v6180_v29 = vld [vmem:[%s6560_s13 + $0xb0] sm:$0xff]   ;;  %v6181_v32 = vld [vmem:[%s6560_s13 + $0x68] sm:$0xff]  }
0x1490   : > { %3497 = vmatprep.subr.bf16.mxu1 %v5412_v33  ;;  %3540 = vmatprep.subr.bf16.mxu0 %v5414_v34  ;;  %v6182_v33 = vld [vmem:[%s6560_s13 + $0xe8] sm:$0xff]  }
0x1491   : > { %3519 = vmatprep.mubr.bf16.mxu1 %v6427_v11  ;;  %3562 = vmatprep.mubr.bf16.mxu0 %v6427_v11  ;;  %v6183_v34 = vld [vmem:[%s6560_s13 + $0x28] sm:$0xff]  }
0x1493   : > { %3498 = vmatpush1.bf16.msra.mxu1 %v5411_v38  ;;  %3541 = vmatpush1.bf16.msra.mxu0 %v5413_v39  ;;  %v6189_v38 = vld [vmem:[%s6560_s13 + $0x58] sm:$0xff]  }
0x1494   : > { %3499 = vmatprep.subr.bf16.mxu1 %v5396_v17  ;;  %3542 = vmatprep.subr.bf16.mxu0 %v5398_v19  ;;  %v6190_v39 = vld [vmem:[%s6560_s13 + $0xd8] sm:$0xff]  }
0x1495   : > { %v6191_v17 = vld [vmem:[%s6560_s13 + $0x18] sm:$0xff]  }
0x1496   : > { %v6192_v19 = vld [vmem:[%s6560_s13 + $0x98] sm:$0xff]  }
0x1497   : > { %3500 = vmatpush1.bf16.msra.mxu1 %v5395_v2  ;;  %3543 = vmatpush1.bf16.msra.mxu0 %v5397_v7  ;;  %v6197_v2 = vld [vmem:[%s6560_s13 + $0x48] sm:$0xff]  }
0x1498   : > { %3501 = vmatprep.subr.bf16.mxu1 %v5380_v40  ;;  %3544 = vmatprep.subr.bf16.mxu0 %v5382_v41  ;;  %v6198_v7 = vld [vmem:[%s6560_s13 + $0xc8] sm:$0xff]  }
0x1499   : > { %v6199_v40 = vld [vmem:[%s6560_s13 + $0x8] sm:$0xff]  }
0x149a   : > { %v6200_v41 = vld [vmem:[%s6560_s13 + $0x88] sm:$0xff]  }
0x149b   : > { %3502 = vmatpush1.bf16.msra.mxu1 %v5379_v4  ;;  %3545 = vmatpush1.bf16.msra.mxu0 %v5381_v6  ;;  %v6205_v4 = vld [vmem:[%s6560_s13 + $0x178] sm:$0xff]  }
0x149c   : > { %3581 = vmatprep.subr.bf16.mxu1 %v5432_v60  ;;  %3624 = vmatprep.subr.bf16.mxu0 %v5434_v13  ;;  %v6206_v6 = vld [vmem:[%s6560_s13 + $0x1f8] sm:$0xff]   ;;  %v2912_v60 = vlaneseq }
0x149e   : > { %5439 = vmatmul.mubr.msk.bf16.vlgmr.msra.gmra.mxu1 %vm657_vm2, %v7037_v45  ;;  %5440 = vmatmul.mubr.msk.bf16.vlgmr.msra.gmra.mxu0 %vm657_vm2, %v7037_v45  ;;  %v7135_v13 = vshrl.u32 %v2912_v60, 7  ;;  %v6217_v60 = vld [vmem:[%s6560_s13 + $0x160] sm:$0xff]  }
0x149f   : > { %3582 = vmatpush1.bf16.msra.mxu1 %v5431_v47  ;;  %3625 = vmatpush1.bf16.msra.mxu0 %v5433_v48 }
0x14a0   : > { %3583 = vmatprep.subr.bf16.mxu1 %v5416_v49  ;;  %3626 = vmatprep.subr.bf16.mxu0 %v5418_v50  ;;  %v2938_v15 = vsub.s32 6, %v7135_v13  ;;  %v2918_v43 = vsub.s32 1, %v7135_v13  ;;  %v2926_v47 = vsub.s32 3, %v7135_v13  ;;  %v2914_v48 = vsub.s32 0, %v7135_v13  ;;  %v7151_v50 = vld [vmem:[%s6554_s30] sm:$0xff] }
0x14a1   : > { %3605 = vmatprep.mubr.bf16.mxu1 %v6427_v11  ;;  %3648 = vmatprep.mubr.bf16.mxu0 %v6427_v11  ;;  %v6173_v11 = vld [vmem:[%s6560_s13 + $0x78] sm:$0xff]   ;;  %v2922_v49 = vsub.s32 2, %v7135_v13 }
0x14a2   : > { %v7144_v46 = vrot.slane %v7139_v42, %v2938_v15  ;;  %v2919_v52 = vrot.slane %v7151_v50, %v2918_v43  ;;  %v2927_v53 = vrot.slane %v7151_v50, %v2926_v47 }
0x14a3   : > { %3584 = vmatpush1.bf16.msra.mxu1 %v5415_v54  ;;  %3627 = vmatpush1.bf16.msra.mxu0 %v5417_v55  ;;  %v2915_v54 = vrot.slane %v7151_v50, %v2914_v48  ;;  %v2923_v55 = vrot.slane %v7151_v50, %v2922_v49 }
0x14a4   : > { %3585 = vmatprep.subr.bf16.mxu1 %v5400_v56  ;;  %3628 = vmatprep.subr.bf16.mxu0 %v5402_v3 }
0x14a7   : > { %3586 = vmatpush1.bf16.msra.mxu1 %v5399_v5  ;;  %3629 = vmatpush1.bf16.msra.mxu0 %v5401_v10 }
0x14a8   : > { %3587 = vmatprep.subr.bf16.mxu1 %v5384_v14  ;;  %3630 = vmatprep.subr.bf16.mxu0 %v5386_v16 }
0x14ab   : > { %3588 = vmatpush1.bf16.msra.mxu1 %v5383_v18  ;;  %3631 = vmatpush1.bf16.msra.mxu0 %v5385_v20 }
0x14ac   : > { %5671 = vmatprep.subr.bf16.mxu1 %v6173_v11  ;;  %5693 = vmatprep.subr.bf16.mxu0 %v6174_v22 }
0x14ae   : > { %5441 = vmatmul.mubr.msk.bf16.vlgmr.msra.gmra.mxu1 %vm657_vm2, %v7037_v45  ;;  %5442 = vmatmul.mubr.msk.bf16.vlgmr.msra.gmra.mxu0 %vm657_vm2, %v7037_v45  ;;  %v6185_v45 = vld [vmem:[%s6560_s13 + $0x60] sm:$0xff]  }
0x14af   : > { %5672 = vmatpush3.bf16.msra.mxu1 %v6175_v24  ;;  %5694 = vmatpush3.bf16.msra.mxu0 %v6176_v25 }
0x14b0   : > { %5673 = vmatprep.subr.bf16.mxu1 %v6177_v26  ;;  %5695 = vmatprep.subr.bf16.mxu0 %v6178_v27 }
0x14b3   : > { %5674 = vmatpush3.bf16.msra.mxu1 %v6179_v28  ;;  %5696 = vmatpush3.bf16.msra.mxu0 %v6180_v29 }
0x14b4   : > { %5675 = vmatprep.subr.bf16.mxu1 %v6181_v32  ;;  %5697 = vmatprep.subr.bf16.mxu0 %v6182_v33 }
0x14b7   : > { %5676 = vmatpush3.bf16.msra.mxu1 %v6183_v34  ;;  %5698 = vmatpush3.bf16.msra.mxu0 %v6184_v36 }
0x14b8   : > { %5677 = vmatprep.subr.bf16.mxu1 %v6185_v45  ;;  %5699 = vmatprep.subr.bf16.mxu0 %v6186_v23  ;;  %v6207_v45 = vld [vmem:[%s6560_s13 + $0x138] sm:$0xff]  }
0x14b9   : > { %v6208_v23 = vld [vmem:[%s6560_s13 + $0x1b8] sm:$0xff]  }
0x14bb   : > { %5678 = vmatpush3.bf16.msra.mxu1 %v6187_v9  ;;  %5700 = vmatpush3.bf16.msra.mxu0 %v6188_v37 }
0x14bc   : > { %5679 = vmatprep.subr.bf16.mxu1 %v6189_v38  ;;  %5701 = vmatprep.subr.bf16.mxu0 %v6190_v39  ;;  %v6209_v38 = vld [vmem:[%s6560_s13 + $0x170] sm:$0xff]  }
0x14bd   : > { %v6210_v39 = vld [vmem:[%s6560_s13 + $0x1f0] sm:$0xff]  }
0x14bf   : > { %5680 = vmatpush3.bf16.msra.mxu1 %v6191_v17  ;;  %5702 = vmatpush3.bf16.msra.mxu0 %v6192_v19  ;;  %v2934_v17 = vsub.s32 5, %v7135_v13  ;;  %v2942_v19 = vsub.s32 7, %v7135_v13 }
0x14c0   : > { %5681 = vmatprep.subr.bf16.mxu1 %v6193_v1  ;;  %5703 = vmatprep.subr.bf16.mxu0 %v6194_v8  ;;  %v6211_v1 = vld [vmem:[%s6560_s13 + $0x130] sm:$0xff]  }
0x14c1   : > { %v6212_v8 = vld [vmem:[%s6560_s13 + $0x1b0] sm:$0xff]  }
0x14c3   : > { %5682 = vmatpush3.bf16.msra.mxu1 %v6195_v12  ;;  %5704 = vmatpush3.bf16.msra.mxu0 %v6196_v57 }
0x14c4   : > { %5683 = vmatprep.subr.bf16.mxu1 %v6197_v2  ;;  %5705 = vmatprep.subr.bf16.mxu0 %v6198_v7  ;;  %v6213_v2 = vld [vmem:[%s6560_s13 + $0x168] sm:$0xff]  }
0x14c5   : > { %v6214_v7 = vld [vmem:[%s6560_s13 + $0x1e8] sm:$0xff]  }
0x14c7   : > { %5684 = vmatpush3.bf16.msra.mxu1 %v6199_v40  ;;  %5706 = vmatpush3.bf16.msra.mxu0 %v6200_v41  ;;  %v2935_v40 = vrot.slane %v7151_v50, %v2934_v17  ;;  %v2943_v41 = vrot.slane %v7151_v50, %v2942_v19 }
0x14c8   : > { %5685 = vmatprep.subr.bf16.mxu1 %v6201_v21  ;;  %5707 = vmatprep.subr.bf16.mxu0 %v6202_v62 }
0x14cb   : > { %5686 = vmatpush3.bf16.msra.mxu1 %v6203_v31  ;;  %5708 = vmatpush3.bf16.msra.mxu0 %v6204_v59  ;;  %v6215_v31 = vld [vmem:[%s6560_s13 + $0x128] sm:$0xff]  }
0x14cc   : > { %5715 = vmatprep.subr.bf16.mxu1 %v6205_v4  ;;  %5737 = vmatprep.subr.bf16.mxu0 %v6206_v6  ;;  %v6216_v59 = vld [vmem:[%s6560_s13 + $0x1a8] sm:$0xff]  }
0x153e   : > { %v3349_v51 = vpop.f32.mrf.mxu1  ;;  %v3392_v30 = vpop.f32.mrf.mxu0 }
0x153f   : > { %v3350_v14 = vadd.f32 %v3349_v51, %v2915_v54  ;;  %v3393_v16 = vadd.f32 %v3392_v30, %v2923_v55  ;;  %v6218_v51 = vld [vmem:[%s6560_s13 + $0x1e0] sm:$0xff]  }
0x1540   : > { %v3351_v56 = vpop.f32.mrf.mxu1  ;;  %v3394_v3 = vpop.f32.mrf.mxu0 }
0x1541   : > { %v3352_v63 = vadd.f32 %v3351_v56, %v2919_v52  ;;  %v3395_v0 = vadd.f32 %v3394_v3, %v2927_v53  ;;  %v3659_v32 = vmax.f32 %v3350_v14, 0.0  ;;  %v3661_v33 = vmax.f32 %v3393_v16, 0.0  ;;  %v6219_v3 = vld [vmem:[%s6560_s13 + $0x120] sm:$0xff]  }
0x1542   : > { %v3353_v58 = vpop.f32.mrf.mxu1  ;;  %v3396_v61 = vpop.f32.mrf.mxu0 }
0x1543   : > { %v3354_v5 = vadd.f32 %v3353_v58, %v2915_v54  ;;  %v3397_v10 = vadd.f32 %v3396_v61, %v2923_v55  ;;  %v3660_v26 = vmax.f32 %v3352_v63, 0.0  ;;  %v3662_v27 = vmax.f32 %v3395_v0, 0.0  ;;  %v6220_v58 = vld [vmem:[%s6560_s13 + $0x1a0] sm:$0xff]   ;;  %v6221_v61 = vld [vmem:[%s6560_s13 + $0x158] sm:$0xff]  }
0x1544   : > { %v3355_v18 = vpop.f32.mrf.mxu1  ;;  %v3398_v20 = vpop.f32.mrf.mxu0  ;;  %v6222_v63 = vld [vmem:[%s6560_s13 + $0x1d8] sm:$0xff]  }
0x1545   : > { %v3356_v11 = vadd.f32 %v3355_v18, %v2919_v52  ;;  %v3399_v22 = vadd.f32 %v3398_v20, %v2927_v53  ;;  %v3675_v24 = vmax.f32 %v3354_v5, 0.0  ;;  %v3677_v25 = vmax.f32 %v3397_v10, 0.0  ;;  %v6223_v20 = vld [vmem:[%s6560_s13 + $0x118] sm:$0xff]  }
0x1547   : > { %v3676_v28 = vmax.f32 %v3356_v11, 0.0  ;;  %v3678_v29 = vmax.f32 %v3399_v22, 0.0  ;;  %v3691_v9 = vpack.c.bf16 %v3675_v24, %v3659_v32  ;;  %v3693_v37 = vpack.c.bf16 %v3677_v25, %v3661_v33  ;;  %v6224_v11 = vld [vmem:[%s6560_s13 + $0x198] sm:$0xff]   ;;  %v6225_v22 = vld [vmem:[%s6560_s13 + $0x150] sm:$0xff]   ;;  %v6229_v32 = vld [vmem:[%s6560_s13 + $0x148] sm:$0xff]  }
0x1548   : > { %v6226_v24 = vld [vmem:[%s6560_s13 + $0x1d0] sm:$0xff]   ;;  %v2930_v25 = vsub.s32 4, %v7135_v13  ;;  %v6230_v33 = vld [vmem:[%s6560_s13 + $0x1c8] sm:$0xff]  }
0x1549   : > { %v3692_v34 = vpack.c.bf16 %v3676_v28, %v3660_v26  ;;  %v3694_v36 = vpack.c.bf16 %v3678_v29, %v3662_v27  ;;  %v6227_v26 = vld [vmem:[%s6560_s13 + $0x110] sm:$0xff]  }
0x154a   : > { %v6228_v27 = vld [vmem:[%s6560_s13 + $0x190] sm:$0xff]  }
0x154b   : > { %4770 = vmatprep.mubr.bf16.mxu1 %v3692_v34  ;;  %4811 = vmatprep.mubr.bf16.mxu0 %v3694_v36  ;;  %v2931_v34 = vrot.slane %v7151_v50, %v2930_v25  ;;  %v2939_v36 = vrot.slane %v7151_v50, %v2938_v15  ;;  %v6233_v50 = vld [vmem:[%s6560_s13 + $0x140] sm:$0xff]  }
0x154c   : > { %4771 = vmatmul.mubr.bf16.vlgmr.msra.gmra.mxu1 %v3691_v9  ;;  %4812 = vmatmul.mubr.bf16.vlgmr.msra.gmra.mxu0 %v3693_v37  ;;  %v2951_v9 = vrot.slane %v7139_v42, %v2918_v43  ;;  %v6231_v37 = vld [vmem:[%s6560_s13 + $0x108] sm:$0xff]   ;;  %v6234_v43 = vld [vmem:[%s6560_s13 + $0x1c0] sm:$0xff]  }
0x154d   : > { %5716 = vmatpush3.bf16.msra.mxu1 %v6207_v45  ;;  %5738 = vmatpush3.bf16.msra.mxu0 %v6208_v23 }
0x154e   : > { %v7173_v12 = vpop.f32.mrf.mxu1  ;;  %v7175_v57 = vpop.f32.mrf.mxu0  ;;  %5717 = vmatprep.subr.bf16.mxu1 %v6209_v38  ;;  %5739 = vmatprep.subr.bf16.mxu0 %v6210_v39  ;;  %v6232_v38 = vld [vmem:[%s6560_s13 + $0x188] sm:$0xff]  }
0x1550   : > { %v3437_v21 = vpop.f32.mrf.mxu1  ;;  %v3480_v62 = vpop.f32.mrf.mxu0 }
0x1551   : > { %5718 = vmatpush3.bf16.msra.mxu1 %v6211_v1  ;;  %5740 = vmatpush3.bf16.msra.mxu0 %v6212_v8  ;;  %v3438_v30 = vadd.f32 %v3437_v21, %v2935_v40  ;;  %v3481_v52 = vadd.f32 %v3480_v62, %v2943_v41  ;;  %v2959_v8 = vrot.slane %v7139_v42, %v2926_v47 }
0x1552   : > { %v3439_v4 = vpop.f32.mrf.mxu1  ;;  %v3482_v6 = vpop.f32.mrf.mxu0  ;;  %5719 = vmatprep.subr.bf16.mxu1 %v6213_v2  ;;  %5741 = vmatprep.subr.bf16.mxu0 %v6214_v7  ;;  %v3436_v7 = vadd.f32 %v7173_v12, %v2931_v34  ;;  %v6237_v12 = vld [vmem:[%s6560_s13 + $0x278] sm:$0xff]  }
0x1553   : > { %v3664_v0 = vmax.f32 %v3438_v30, 0.0  ;;  %v3666_v5 = vmax.f32 %v3481_v52, 0.0  ;;  %v3440_v39 = vadd.f32 %v3439_v4, %v2931_v34  ;;  %v3483_v1 = vadd.f32 %v3482_v6, %v2939_v36  ;;  %v6236_v4 = vld [vmem:[%s6560_s13 + $0x180] sm:$0xff]   ;;  %v6238_v30 = vld [vmem:[%s6560_s13 + $0x2f8] sm:$0xff]  }
0x1554   : > { %v3441_v53 = vpop.f32.mrf.mxu1  ;;  %v3484_v54 = vpop.f32.mrf.mxu0  ;;  %v3663_v52 = vmax.f32 %v3436_v7, 0.0 }
0x1555   : > { %v3442_v55 = vadd.f32 %v3441_v53, %v2935_v40  ;;  %v3485_v56 = vadd.f32 %v3484_v54, %v2943_v41  ;;  %5720 = vmatpush3.bf16.msra.mxu1 %v6215_v31  ;;  %5742 = vmatpush3.bf16.msra.mxu0 %v6216_v59  ;;  %v3479_v40 = vadd.f32 %v7175_v57, %v2939_v36  ;;  %v6235_v59 = vld [vmem:[%s6560_s13 + $0x100] sm:$0xff]   ;;  %v3679_v6 = vmax.f32 %v3440_v39, 0.0  ;;  %v6256_v39 = vld [vmem:[%s6560_s13 + $0x298] sm:$0xff]  }
0x1556   : > { %5721 = vmatprep.subr.bf16.mxu1 %v6217_v60  ;;  %5743 = vmatprep.subr.bf16.mxu0 %v6218_v51  ;;  %v3681_v60 = vmax.f32 %v3483_v1, 0.0  ;;  %v6252_v36 = vld [vmem:[%s6560_s13 + $0x2a0] sm:$0xff]   ;;  %v6257_v1 = vld [vmem:[%s6560_s13 + $0x250] sm:$0xff]  }
0x1557   : > { %v3680_v10 = vmax.f32 %v3442_v55, 0.0  ;;  %v3682_v14 = vmax.f32 %v3485_v56, 0.0  ;;  %v3665_v53 = vmax.f32 %v3479_v40, 0.0  ;;  %v6239_v56 = vld [vmem:[%s6560_s13 + $0x238] sm:$0xff]   ;;  %v6260_v40 = vld [vmem:[%s6560_s13 + $0x290] sm:$0xff]  }
0x1559   : > { %v3696_v16 = vpack.c.bf16 %v3680_v10, %v3664_v0  ;;  %v3698_v18 = vpack.c.bf16 %v3682_v14, %v3666_v5  ;;  %5722 = vmatpush3.bf16.msra.mxu1 %v6219_v3  ;;  %5744 = vmatpush3.bf16.msra.mxu0 %v6220_v58  ;;  %v3695_v3 = vpack.c.bf16 %v3679_v6, %v3663_v52  ;;  %v6241_v5 = vld [vmem:[%s6560_s13 + $0x270] sm:$0xff]  }
0x155a   : > { %5723 = vmatprep.subr.bf16.mxu1 %v6221_v61  ;;  %5745 = vmatprep.subr.bf16.mxu0 %v6222_v63  ;;  %v3697_v58 = vpack.c.bf16 %v3681_v60, %v3665_v53  ;;  %v6240_v63 = vld [vmem:[%s6560_s13 + $0x2b8] sm:$0xff]   ;;  %v6242_v10 = vld [vmem:[%s6560_s13 + $0x2f0] sm:$0xff]   ;;  %v2967_v6 = vrot.slane %v7139_v42, %v2934_v17  ;;  %v6267_v53 = vld [vmem:[%s6560_s13 + $0x200] sm:$0xff]  }
0x155b   : > { %4852 = vmatprep.mubr.bf16.mxu1 %v3696_v16  ;;  %4893 = vmatprep.mubr.bf16.mxu0 %v3698_v18  ;;  %v6243_v16 = vld [vmem:[%s6560_s13 + $0x230] sm:$0xff]  }
0x155c   : > { %v6244_v18 = vld [vmem:[%s6560_s13 + $0x2b0] sm:$0xff]  }
0x155d   : > { %5724 = vmatpush3.bf16.msra.mxu1 %v6223_v20  ;;  %5746 = vmatpush3.bf16.msra.mxu0 %v6224_v11  ;;  %v6245_v20 = vld [vmem:[%s6560_s13 + $0x268] sm:$0xff]  }
0x155e   : > { %v7200_v28 = vpop.f32.mrf.mxu1  ;;  %v7202_v29 = vpop.f32.mrf.mxu0  ;;  %5725 = vmatprep.subr.bf16.mxu1 %v6225_v22  ;;  %5747 = vmatprep.subr.bf16.mxu0 %v6226_v24  ;;  %v6246_v11 = vld [vmem:[%s6560_s13 + $0x2e8] sm:$0xff]  }
0x155f   : > { %v6247_v22 = vld [vmem:[%s6560_s13 + $0x228] sm:$0xff]  }
0x1560   : > { %v3523_v45 = vpop.f32.mrf.mxu1  ;;  %v3566_v23 = vpop.f32.mrf.mxu0  ;;  %v6248_v24 = vld [vmem:[%s6560_s13 + $0x2a8] sm:$0xff]  }
0x1561   : > { %5726 = vmatpush3.bf16.msra.mxu1 %v6227_v26  ;;  %5748 = vmatpush3.bf16.msra.mxu0 %v6228_v27  ;;  %v3524_v62 = vadd.f32 %v3523_v45, %v2951_v9  ;;  %v3567_v51 = vadd.f32 %v3566_v23, %v2959_v8  ;;  %v6249_v26 = vld [vmem:[%s6560_s13 + $0x260] sm:$0xff]   ;;  %v6253_v45 = vld [vmem:[%s6560_s13 + $0x258] sm:$0xff]  }
0x1562   : > { %v7220_v2 = vpop.f32.mrf.mxu1  ;;  %v7222_v15 = vpop.f32.mrf.mxu0  ;;  %5727 = vmatprep.subr.bf16.mxu1 %v6229_v32  ;;  %5749 = vmatprep.subr.bf16.mxu0 %v6230_v33  ;;  %v6250_v27 = vld [vmem:[%s6560_s13 + $0x2e0] sm:$0xff]   ;;  %v6254_v23 = vld [vmem:[%s6560_s13 + $0x2d8] sm:$0xff]  }
0x1563   : > { %v3668_v55 = vmax.f32 %v3524_v62, 0.0  ;;  %v3670_v61 = vmax.f32 %v3567_v51, 0.0  ;;  %v6251_v33 = vld [vmem:[%s6560_s13 + $0x220] sm:$0xff]   ;;  %v2947_v62 = vrot.slane %v7139_v42, %v2914_v48  ;;  %v6264_v51 = vld [vmem:[%s6560_s13 + $0x288] sm:$0xff]  }
0x1564   : > { %v3527_v41 = vpop.f32.mrf.mxu1  ;;  %v3570_v21 = vpop.f32.mrf.mxu0  ;;  %v6265_v48 = vld [vmem:[%s6560_s13 + $0x240] sm:$0xff]  }
0x1565   : > { %v3528_v47 = vadd.f32 %v3527_v41, %v2951_v9  ;;  %v3571_v31 = vadd.f32 %v3570_v21, %v2959_v8  ;;  %5728 = vmatpush3.bf16.msra.mxu1 %v6231_v37  ;;  %5750 = vmatpush3.bf16.msra.mxu0 %v6232_v38  ;;  %v6255_v37 = vld [vmem:[%s6560_s13 + $0x218] sm:$0xff]   ;;  %v6258_v8 = vld [vmem:[%s6560_s13 + $0x2d0] sm:$0xff]   ;;  %v6261_v41 = vld [vmem:[%s6560_s13 + $0x248] sm:$0xff]  }
0x1566   : > { %5729 = vmatprep.subr.bf16.mxu1 %v6233_v50  ;;  %5751 = vmatprep.subr.bf16.mxu0 %v6234_v43  ;;  %v6259_v43 = vld [vmem:[%s6560_s13 + $0x210] sm:$0xff]   ;;  %v6262_v21 = vld [vmem:[%s6560_s13 + $0x2c8] sm:$0xff]  }
0x1567   : > { %v3684_v57 = vmax.f32 %v3528_v47, 0.0  ;;  %v3686_v54 = vmax.f32 %v3571_v31, 0.0  ;;  %v2955_v47 = vrot.slane %v7139_v42, %v2922_v49  ;;  %v2975_v49 = vrot.slane %v7139_v42, %v2942_v19 }
0x1569   : > { %5730 = vmatpush3.bf16.msra.mxu1 %v6235_v59  ;;  %5752 = vmatpush3.bf16.msra.mxu0 %v6236_v4  ;;  %v3700_v0 = vpack.c.bf16 %v3684_v57, %v3668_v55  ;;  %v3702_v14 = vpack.c.bf16 %v3686_v54, %v3670_v61  ;;  %v6263_v59 = vld [vmem:[%s6560_s13 + $0x208] sm:$0xff]   ;;  %v3526_v4 = vadd.f32 %v7220_v2, %v2947_v62  ;;  %v6266_v2 = vld [vmem:[%s6560_s13 + $0x2c0] sm:$0xff]  }
0x156a   : > { %5759 = vmatprep.subr.bf16.mxu1 %v6237_v12  ;;  %5781 = vmatprep.subr.bf16.mxu0 %v6238_v30  ;;  %v3569_v12 = vadd.f32 %v7222_v15, %v2955_v47  ;;  %v3522_v30 = vadd.f32 %v7200_v28, %v2947_v62  ;;  %v3565_v17 = vadd.f32 %v7202_v29, %v2955_v47  ;;  %v6268_v15 = vld [vmem:[%s6560_s13 + $0x280] sm:$0xff]   ;;  %v6291_v62 = vld [vmem:[%s6560_s13 + $0x310] sm:$0xff]  }
0x156b   : > { %v3683_v54 = vmax.f32 %v3526_v4, 0.0  ;;  %v6292_v47 = vld [vmem:[%s6560_s13 + $0x390] sm:$0xff]   ;;  %v2963_v4 = vrot.slane %v7139_v42, %v2930_v25  ;;  %v6299_v42 = vld [vmem:[%s6560_s13 + $0x300] sm:$0xff]  }
0x156c   : > { %4853 = vmatmul.mubr.bf16.vlgmr.msra.gmra.mxu1 %v3695_v3  ;;  %4894 = vmatmul.mubr.bf16.vlgmr.msra.gmra.mxu0 %v3697_v58  ;;  %v3685_v19 = vmax.f32 %v3569_v12, 0.0  ;;  %v6270_v58 = vld [vmem:[%s6560_s13 + $0x3f8] sm:$0xff]   ;;  %v3667_v28 = vmax.f32 %v3522_v30, 0.0  ;;  %v3669_v29 = vmax.f32 %v3565_v17, 0.0 }
0x156d   : > { %5760 = vmatpush3.bf16.msra.mxu1 %v6239_v56  ;;  %4934 = vmatprep.mubr.bf16.mxu1 %v3700_v0  ;;  %v6269_v56 = vld [vmem:[%s6560_s13 + $0x378] sm:$0xff]  }
0x156e   : > { %5782 = vmatpush3.bf16.msra.mxu0 %v6240_v63  ;;  %4975 = vmatprep.mubr.bf16.mxu0 %v3702_v14  ;;  %v7244_v32 = vpop.f32.mrf.mxu1  ;;  %v7247_v34 = vpop.f32.mrf.mxu0  ;;  %v6271_v0 = vld [vmem:[%s6560_s13 + $0x338] sm:$0xff]  }
0x156f   : > { %5761 = vmatprep.subr.bf16.mxu1 %v6241_v5  ;;  %5783 = vmatprep.subr.bf16.mxu0 %v6242_v10  ;;  %v3699_v5 = vpack.c.bf16 %v3683_v54, %v3667_v28  ;;  %v6272_v14 = vld [vmem:[%s6560_s13 + $0x3b8] sm:$0xff]   ;;  %v3651_v13 = vadd.f32 %v7247_v34, %v7144_v46 }
0x1570   : > { %v3609_v9 = vpop.f32.mrf.mxu1  ;;  %v3652_v38 = vpop.f32.mrf.mxu0 }
0x1571   : > { %5762 = vmatpush3.bf16.msra.mxu1 %v6243_v16  ;;  %v3610_v55 = vadd.f32 %v3609_v9, %v2967_v6  ;;  %v3653_v3 = vadd.f32 %v3652_v38, %v2975_v49  ;;  %v3701_v16 = vpack.c.bf16 %v3685_v19, %v3669_v29  ;;  %v6281_v9 = vld [vmem:[%s6560_s13 + $0x360] sm:$0xff]   ;;  %v3673_v17 = vmax.f32 %v3651_v13, 0.0 }
0x1572   : > { %5784 = vmatpush3.bf16.msra.mxu0 %v6244_v18  ;;  %5763 = vmatprep.subr.bf16.mxu1 %v6245_v20  ;;  %v7256_v50 = vpop.f32.mrf.mxu1  ;;  %v7259_v7 = vpop.f32.mrf.mxu0  ;;  %v6273_v20 = vld [vmem:[%s6560_s13 + $0x370] sm:$0xff]   ;;  %v6283_v38 = vld [vmem:[%s6560_s13 + $0x320] sm:$0xff]  }
0x1573   : > { %5785 = vmatprep.subr.bf16.mxu0 %v6246_v11  ;;  %v3672_v10 = vmax.f32 %v3610_v55, 0.0  ;;  %v3674_v18 = vmax.f32 %v3653_v3, 0.0  ;;  %v3655_v12 = vadd.f32 %v7259_v7, %v7144_v46 }
0x1574   : > { %v3613_v31 = vpop.f32.mrf.mxu1  ;;  %v3656_v60 = vpop.f32.mrf.mxu0 }
0x1575   : > { %5764 = vmatpush3.bf16.msra.mxu1 %v6247_v22  ;;  %v3614_v57 = vadd.f32 %v3613_v31, %v2967_v6  ;;  %v3657_v52 = vadd.f32 %v3656_v60, %v2975_v49  ;;  %v6274_v22 = vld [vmem:[%s6560_s13 + $0x3f0] sm:$0xff]   ;;  %v6293_v31 = vld [vmem:[%s6560_s13 + $0x348] sm:$0xff]   ;;  %v3612_v60 = vadd.f32 %v7256_v50, %v2963_v4  ;;  %v6298_v49 = vld [vmem:[%s6560_s13 + $0x3c0] sm:$0xff]   ;;  %v3689_v30 = vmax.f32 %v3655_v12, 0.0 }
0x1576   : > { %5786 = vmatpush3.bf16.msra.mxu0 %v6248_v24  ;;  %5765 = vmatprep.subr.bf16.mxu1 %v6249_v26  ;;  %v6275_v26 = vld [vmem:[%s6560_s13 + $0x330] sm:$0xff]   ;;  %v6295_v6 = vld [vmem:[%s6560_s13 + $0x308] sm:$0xff]   ;;  %v6300_v50 = vld [vmem:[%s6560_s13 + $0x380] sm:$0xff]  }
0x1577   : > { %5787 = vmatprep.subr.bf16.mxu0 %v6250_v27  ;;  %v3688_v61 = vmax.f32 %v3614_v57, 0.0  ;;  %v3690_v63 = vmax.f32 %v3657_v52, 0.0  ;;  %v6276_v27 = vld [vmem:[%s6560_s13 + $0x3b0] sm:$0xff]   ;;  %v3687_v25 = vmax.f32 %v3612_v60, 0.0  ;;  %v3705_v7 = vpack.c.bf16 %v3689_v30, %v3673_v17 }
0x1579   : > { %5766 = vmatpush3.bf16.msra.mxu1 %v6251_v33  ;;  %v3704_v11 = vpack.c.bf16 %v3688_v61, %v3672_v10  ;;  %v3706_v24 = vpack.c.bf16 %v3690_v63, %v3674_v18  ;;  %v6277_v33 = vld [vmem:[%s6560_s13 + $0x368] sm:$0xff]  }
0x157a   : > { %5788 = vmatpush3.bf16.msra.mxu0 %v6252_v36  ;;  %5767 = vmatprep.subr.bf16.mxu1 %v6253_v45  ;;  %v6278_v36 = vld [vmem:[%s6560_s13 + $0x3e8] sm:$0xff]  }
0x157b   : > { %5789 = vmatprep.subr.bf16.mxu0 %v6254_v23  ;;  %v6279_v45 = vld [vmem:[%s6560_s13 + $0x328] sm:$0xff]  }
0x157c   : > { %v6280_v23 = vld [vmem:[%s6560_s13 + $0x3a8] sm:$0xff]  }
0x157d   : > { %5768 = vmatpush3.bf16.msra.mxu1 %v6255_v37  ;;  %v6282_v37 = vld [vmem:[%s6560_s13 + $0x3e0] sm:$0xff]  }
0x157e   : > { %5790 = vmatpush3.bf16.msra.mxu0 %v6256_v39  ;;  %5769 = vmatprep.subr.bf16.mxu1 %v6257_v1  ;;  %v6284_v39 = vld [vmem:[%s6560_s13 + $0x3a0] sm:$0xff]   ;;  %v6285_v1 = vld [vmem:[%s6560_s13 + $0x358] sm:$0xff]  }
0x157f   : > { %5791 = vmatprep.subr.bf16.mxu0 %v6258_v8  ;;  %v6286_v8 = vld [vmem:[%s6560_s13 + $0x3d8] sm:$0xff]  }
0x1581   : > { %5770 = vmatpush3.bf16.msra.mxu1 %v6259_v43  ;;  %v6287_v43 = vld [vmem:[%s6560_s13 + $0x318] sm:$0xff]  }
0x1582   : > { %5792 = vmatpush3.bf16.msra.mxu0 %v6260_v40  ;;  %5771 = vmatprep.subr.bf16.mxu1 %v6261_v41  ;;  %v6288_v40 = vld [vmem:[%s6560_s13 + $0x398] sm:$0xff]   ;;  %v6289_v41 = vld [vmem:[%s6560_s13 + $0x350] sm:$0xff]  }
0x1583   : > { %5793 = vmatprep.subr.bf16.mxu0 %v6262_v21  ;;  %v6290_v21 = vld [vmem:[%s6560_s13 + $0x3d0] sm:$0xff]  }
0x1585   : > { %5772 = vmatpush3.bf16.msra.mxu1 %v6263_v59  ;;  %v6294_v59 = vld [vmem:[%s6560_s13 + $0x3c8] sm:$0xff]  }
0x1586   : > { %5794 = vmatpush3.bf16.msra.mxu0 %v6264_v51  ;;  %5773 = vmatprep.subr.bf16.mxu1 %v6265_v48  ;;  %v6296_v51 = vld [vmem:[%s6560_s13 + $0x388] sm:$0xff]   ;;  %v6297_v48 = vld [vmem:[%s6560_s13 + $0x340] sm:$0xff]  }
0x1587   : > { %5795 = vmatprep.subr.bf16.mxu0 %v6266_v2  ;;  %v3608_v2 = vadd.f32 %v7244_v32, %v2963_v4 }
0x1589   : > { %5774 = vmatpush3.bf16.msra.mxu1 %v6267_v53  ;;  %v3671_v57 = vmax.f32 %v3608_v2, 0.0 }
0x158a   : > { %5796 = vmatpush3.bf16.msra.mxu0 %v6268_v15  ;;  %5803 = vmatprep.subr.bf16.mxu1 %v6269_v56 }
0x158b   : > { %5825 = vmatprep.subr.bf16.mxu0 %v6270_v58  ;;  %v3703_v52 = vpack.c.bf16 %v3687_v25, %v3671_v57 }
0x158c   : > { %4935 = vmatmul.mubr.bf16.vlgmr.msra.gmra.mxu1 %v3699_v5  ;;  %v5443_v5 = vld [vmem:[%s598_s3] ss:$0 sm:$0xff] }
0x158d   : > { %4976 = vmatmul.mubr.bf16.vlgmr.msra.gmra.mxu0 %v3701_v16  ;;  %5804 = vmatpush3.bf16.msra.mxu1 %v6271_v0 }
0x158e   : > { %5016 = vmatprep.mubr.bf16.mxu1 %v3704_v11  ;;  %5826 = vmatpush3.bf16.msra.mxu0 %v6272_v14 }
0x158f   : > { %5057 = vmatprep.mubr.bf16.mxu0 %v3706_v24  ;;  %5805 = vmatprep.subr.bf16.mxu1 %v6273_v20 }
0x1590   : > { %5827 = vmatprep.subr.bf16.mxu0 %v6274_v22 }
0x1591   : > { %5806 = vmatpush3.bf16.msra.mxu1 %v6275_v26 }
0x1592   : > { %5828 = vmatpush3.bf16.msra.mxu0 %v6276_v27  ;;  %5807 = vmatprep.subr.bf16.mxu1 %v6277_v33 }
0x1593   : > { %5829 = vmatprep.subr.bf16.mxu0 %v6278_v36 }
0x1595   : > { %5808 = vmatpush3.bf16.msra.mxu1 %v6279_v45 }
0x1596   : > { %5830 = vmatpush3.bf16.msra.mxu0 %v6280_v23  ;;  %5809 = vmatprep.subr.bf16.mxu1 %v6281_v9 }
0x1597   : > { %5831 = vmatprep.subr.bf16.mxu0 %v6282_v37 }
0x1599   : > { %5810 = vmatpush3.bf16.msra.mxu1 %v6283_v38 }
0x159a   : > { %5832 = vmatpush3.bf16.msra.mxu0 %v6284_v39  ;;  %5811 = vmatprep.subr.bf16.mxu1 %v6285_v1 }
0x159b   : > { %5833 = vmatprep.subr.bf16.mxu0 %v6286_v8 }
0x159d   : > { %5812 = vmatpush3.bf16.msra.mxu1 %v6287_v43 }
0x159e   : > { %5834 = vmatpush3.bf16.msra.mxu0 %v6288_v40  ;;  %5813 = vmatprep.subr.bf16.mxu1 %v6289_v41 }
0x159f   : > { %5835 = vmatprep.subr.bf16.mxu0 %v6290_v21 }
0x15a1   : > { %5814 = vmatpush3.bf16.msra.mxu1 %v6291_v62 }
0x15a2   : > { %5836 = vmatpush3.bf16.msra.mxu0 %v6292_v47  ;;  %5815 = vmatprep.subr.bf16.mxu1 %v6293_v31 }
0x15a3   : > { %5837 = vmatprep.subr.bf16.mxu0 %v6294_v59 }
0x15a5   : > { %5816 = vmatpush3.bf16.msra.mxu1 %v6295_v6 }
0x15a6   : > { %5838 = vmatpush3.bf16.msra.mxu0 %v6296_v51  ;;  %5817 = vmatprep.subr.bf16.mxu1 %v6297_v48 }
0x15a7   : > { %5839 = vmatprep.subr.bf16.mxu0 %v6298_v49 }
0x15a9   : > { %5818 = vmatpush3.bf16.msra.mxu1 %v6299_v42 }
0x15aa   : > { %5840 = vmatpush3.bf16.msra.mxu0 %v6300_v50 }
0x15ac   : > { %5017 = vmatmul.mubr.bf16.vlgmr.msra.gmra.mxu1 %v3703_v52 }
0x15ad   : > { %5058 = vmatmul.mubr.bf16.vlgmr.msra.gmra.mxu0 %v3705_v7 }
0x160c   : > { %v5687_v32 = vpop.f32.mrf.mxu1  ;;  %v5709_v53 = vpop.f32.mrf.mxu0 }
0x160e   : > { %v5688_v46 = vpop.f32.mrf.mxu1  ;;  %v5710_v34 = vpop.f32.mrf.mxu0 }
0x160f   : > { %v5689_v0 = vadd.f32 %v5688_v46, %v5687_v32  ;;  %v5711_v22 = vadd.f32 %v5710_v34, %v5709_v53 }
0x1610   : > { %v5690_v54 = vpop.f32.mrf.mxu1  ;;  %v5712_v55 = vpop.f32.mrf.mxu0 }
0x1611   : > { %v4773_v16 = vadd.f32 %v5689_v0, %v5443_v5 }
0x1612   : > { %v5691_v15 = vpop.f32.mrf.mxu1  ;;  %v5713_v19 = vpop.f32.mrf.mxu0 }
0x1613   : > { %v5692_v18 = vadd.f32 %v5691_v15, %v5690_v54  ;;  %v4814_v26 = vadd.f32 %v5711_v22, %v4773_v16  ;;  %v5714_v45 = vadd.f32 %v5713_v19, %v5712_v55 }
0x1615   : > { %v4776_v27 = vadd.f32 %v5692_v18, %v5443_v5 }
0x1617   : > { %v4817_v37 = vadd.f32 %v5714_v45, %v4776_v27 }
0x162c   : > { %v5731_v56 = vpop.f32.mrf.mxu1  ;;  %v5753_v3 = vpop.f32.mrf.mxu0 }
0x162e   : > { %v5732_v58 = vpop.f32.mrf.mxu1  ;;  %v5754_v28 = vpop.f32.mrf.mxu0 }
0x162f   : > { %v5733_v24 = vadd.f32 %v5732_v58, %v5731_v56  ;;  %v5755_v38 = vadd.f32 %v5754_v28, %v5753_v3 }
0x1630   : > { %v5734_v61 = vpop.f32.mrf.mxu1  ;;  %v5756_v29 = vpop.f32.mrf.mxu0 }
0x1631   : > { %v4855_v23 = vadd.f32 %v5733_v24, %v4814_v26  ;;  %v5573_v24 = vld [vmem:[%s604_s22] ss:$0 sm:$0xff] }
0x1632   : > { %v5735_v63 = vpop.f32.mrf.mxu1  ;;  %v5757_v14 = vpop.f32.mrf.mxu0 }
0x1633   : > { %v5736_v9 = vadd.f32 %v5735_v63, %v5734_v61  ;;  %v4896_v43 = vadd.f32 %v5755_v38, %v4855_v23  ;;  %v5758_v41 = vadd.f32 %v5757_v14, %v5756_v29 }
0x1635   : > { %v4858_v40 = vadd.f32 %v5736_v9, %v4817_v37 }
0x1637   : > { %v4899_v59 = vadd.f32 %v5758_v41, %v4858_v40 }
0x164c   : > { %v5775_v10 = vpop.f32.mrf.mxu1 }
0x164d   : > { %v5797_v20 = vpop.f32.mrf.mxu0 }
0x164e   : > { %v5776_v11 = vpop.f32.mrf.mxu1 }
0x164f   : > { %v5798_v33 = vpop.f32.mrf.mxu0  ;;  %v5777_v39 = vadd.f32 %v5776_v11, %v5775_v10  ;;  %v5572_v11 = vld [vmem:[%s601_s17] ss:$0 sm:$0xff]  ;;  %s6375_s17 = scalar_lea.vmem %s5121_s16, 256 }
0x1650   : > { %v5778_v36 = vpop.f32.mrf.mxu1  ;;  %v5799_v4 = vadd.f32 %v5798_v33, %v5797_v20  ;;  %p6376_p6 = scmp.ne.s32.totalorder %s5121_s16, %s6375_s17  ;;  %p6383_p10 = scmp.lt.s32.totalorder %s6375_s17, %s6375_s17 }
0x1651   : > { %v5800_v1 = vpop.f32.mrf.mxu0  ;;  %v4937_v21 = vadd.f32 %v5777_v39, %v4896_v43 }
0x1652   : > { %v5779_v8 = vpop.f32.mrf.mxu1  ;;  %p6377_p7 = pnand %p6376_p6, %p6093_p5  ;;  %p6384_p11 = por %p6383_p10, %p6382_p9 }
0x1653   : > { %v5780_v62 = vadd.f32 %v5779_v8, %v5778_v36  ;;  %v5801_v47 = vpop.f32.mrf.mxu0  ;;  %v4978_v51 = vadd.f32 %v5799_v4, %v4937_v21 }
0x1654   : > { %v5802_v13 = vadd.f32 %v5801_v47, %v5800_v1  ;;  %p6378_p8 = pneg %p6377_p7 }
0x1655   : > { %v4940_v48 = vadd.f32 %v5780_v62, %v4899_v59 }
0x1656   : > { %p6385_p12 = pnand %p6384_p11, %p6378_p8 }
0x1657   : > { %v4981_v57 = vadd.f32 %v5802_v13, %v4940_v48 }
0x166c   : > { %v5819_v31 = vpop.f32.mrf.mxu1 }
0x166d   : > { %v5841_v6 = vpop.f32.mrf.mxu0 }
0x166e   : > { %v5820_v60 = vpop.f32.mrf.mxu1 }
0x166f   : > { %v5821_v12 = vadd.f32 %v5820_v60, %v5819_v31  ;;  %v5842_v49 = vpop.f32.mrf.mxu0 }
0x1670   : > { %v5822_v2 = vpop.f32.mrf.mxu1  ;;  %v5843_v25 = vadd.f32 %v5842_v49, %v5841_v6 }
0x1671   : > { %v5019_v42 = vadd.f32 %v5821_v12, %v4978_v51  ;;  %v5844_v50 = vpop.f32.mrf.mxu0 }
0x1672   : > { %v5823_v30 = vpop.f32.mrf.mxu1 }
0x1673   : > { %v5060_v17 = vadd.f32 %v5843_v25, %v5019_v42  ;;  %v5824_v52 = vadd.f32 %v5823_v30, %v5822_v2  ;;  %v5845_v7 = vpop.f32.mrf.mxu0 }
0x1674   : > { %v5846_v53 = vadd.f32 %v5845_v7, %v5844_v50 }
0x1675   : > { %v5022_v32 = vadd.f32 %v5824_v52, %v4981_v57  ;;  %v5066_v46 = vadd.f32 %v5060_v17, %v7031_v35 }
0x1677   : > { %v5063_v34 = vadd.f32 %v5846_v53, %v5022_v32  ;;  %v5070_v54 = vsel %vm657_vm2, %v5066_v46, 0.0 }
0x1678   : > { %5071 = vadd.xlane.f32.xlu1 %v5070_v54 }
0x1679   : > { %v5067_v55 = vadd.f32 %v5063_v34, %v7033_v44 }
0x167b   : > { %v5073_v15 = vsel %vm657_vm2, %v5067_v55, 0.0 }
0x167c   : > { %5074 = vadd.xlane.f32.xlu0 %v5073_v15 }
0x1701   : > { %v5072_v56 = vpop.xlane.xlu1 %5071 }
0x1702   : > { %v5076_v19 = vmul.f32 0.015625, %v5072_v56 }
0x1704   : > { %v5078_v3 = vsub.f32 %v5066_v46, %v5076_v19 }
0x1705   : > { %v5075_v58 = vpop.xlane.xlu0 %5074 }
0x1706   : > { %v5077_v28 = vmul.f32 0.015625, %v5075_v58  ;;  %v5080_v61 = vmul.f32 %v5078_v3, %v5078_v3 }
0x1708   : > { %v5079_v29 = vsub.f32 %v5067_v55, %v5077_v28  ;;  %v5082_v63 = vsel %vm657_vm2, %v5080_v61, 0.0 }
0x1709   : > { %5083 = vadd.xlane.f32.xlu1 %v5082_v63 }
0x170a   : > { %v5081_v35 = vmul.f32 %v5079_v29, %v5079_v29 }
0x170c   : > { %v5085_v0 = vsel %vm657_vm2, %v5081_v35, 0.0 }
0x170d   : > { %5086 = vadd.xlane.f32.xlu0 %v5085_v0 }
0x1792   : > { %v5084_v44 = vpop.xlane.xlu1 %5083 }
0x1793   : > { %v5088_v5 = vmul.f32 0.015625, %v5084_v44 }
0x1795   : > { %v5090_v10 = vadd.f32 1e-05, %v5088_v5 }
0x1796   : > { %v5087_v14 = vpop.xlane.xlu0 %5086 }
0x1797   : > { %6369 = vrsqrt.f32 %v5090_v10  ;;  %v5089_v16 = vmul.f32 0.015625, %v5087_v14 }
0x1799   : > { %v5091_v18 = vadd.f32 1e-05, %v5089_v16 }
0x179b   : > { %6371 = vrsqrt.f32 %v5091_v18 }
0x17a4   : > { %v6370_v20 = vpop.eup %6369 }
0x17a5   : > { %v5094_v22 = vmul.f32 %v6370_v20, %v5078_v3 }
0x17a7   : > { %v5102_v26 = vmul.f32 %v5572_v11, %v5094_v22 }
0x17a8   : > { %v6372_v27 = vpop.eup %6371 }
0x17a9   : > { %v5095_v33 = vmul.f32 %v6372_v27, %v5079_v29  ;;  %v5110_v36 = vadd.f32 %v5573_v24, %v5102_v26 }
0x17ab   : > { %v5103_v45 = vmul.f32 %v5572_v11, %v5095_v33  ;;  %5112 = vst.msk [vmem:[#allocation2] sm:$0xff] %vm657_vm2, %v5110_v36 }
0x17ad   : > { %v5111_v23 = vadd.f32 %v5573_v24, %v5103_v45 }
0x17af   : > { %5113 = vst.msk [vmem:[#allocation2 + $0x8] sm:$0xff] %vm657_vm2, %v5111_v23 }
0x17b0   : > { %6388 = shalt.err (!%p6385_p12)
}
0x17b1   : > { %s6429_s27 = smov 128   ;;  %s7395_s14 = sld [smem:[#allocation10_spill]] }
0x17b7   : > { %6090 = dma.vmem_to_hbm [thread:$0]  (%p6093_p5), %s5121_s16, 256, %s7395_s14, [#allocation3], %s6429_s27, %s6429_s27, %s6420_s18  }
0x17b8   : > { %6404 = dma.done.wait (%p6093_p5), [#allocation3], 256  }
0x17b9   : > { %6406 = vsyncadd (%p6093_p5), [#allocation3], 4294967040 }
0x17ba PF: > { %s7396_s29 = sld [smem:[#allocation5_spill]] }
0x17c0   : > { %s24_s25 = sadd.s32 1, %s7396_s29  }
0x17c1   : > { %p21_p13 = scmp.ge.s32.totalorder %s24_s25, 7  }
0x17c3   :  { %23 = sbr.rel (!%p21_p13) target bundleno = 7 (0x7), region = 140 }
0x17c8   :  { %5136 = vsyncpa [#allocation3], 1 }
0x17c9   :  { %5138 = vsyncpa [#allocation3 + $0x1], 1 }

</bundles_post_ra>
